<compile_context>
chip_gen: v5e
topology: v5e:2x2
jax: 0.10.0
libtpu: 0.0.40
codegen_flags: <defaults>
</compile_context>

<pallas_src>
import jax
import jax.numpy as jnp
from jax.experimental import pallas as pl
from jax.experimental.pallas import tpu as pltpu

TM_MAX = 256  # max batch tile (rows per grid step)

# Logical (PyTorch) dims
D_IN, D1, D2, D3, D_OUT = 1280, 800, 300, 100, 2
# Lane-padded dims (multiples of 128)
D1P, D2P, D3P, D_OUTP = 896, 384, 128, 128


def mlp_kernel(x_ref, w1_ref, b1_ref, w2_ref, b2_ref, w3_ref, b3_ref,
               w4_ref, b4_ref, o_ref):
    # Layer 1: Linear(1280 -> 896pad) + ReLU
    h = jnp.dot(x_ref[...], w1_ref[...], preferred_element_type=jnp.float32)
    h = jnp.maximum(h + b1_ref[...], 0.0)
    # Layer 2: Linear(896pad -> 384pad) + ReLU
    h = jnp.dot(h, w2_ref[...], preferred_element_type=jnp.float32)
    h = jnp.maximum(h + b2_ref[...], 0.0)
    # Layer 3: Linear(384pad -> 128pad) + ReLU
    h = jnp.dot(h, w3_ref[...], preferred_element_type=jnp.float32)
    h = jnp.maximum(h + b3_ref[...], 0.0)
    # Layer 4: Linear(128pad -> 128pad) + Sigmoid (padded cols sliced off in wrapper)
    z = jnp.dot(h, w4_ref[...], preferred_element_type=jnp.float32) + b4_ref[...]
    o_ref[...] = jax.nn.sigmoid(z).astype(o_ref.dtype)


def _pad2(a, rows_to, cols_to):
    r, c = a.shape
    return jnp.pad(a, ((0, rows_to - r), (0, cols_to - c)))


def net_forward(x, params):
    w1, b1, w2, b2, w3, b3, w4, b4 = params  # logical (unpadded) shapes

    # Zero-pad feature dims to lane-dense multiples of 128 (numerically exact).
    w1p = _pad2(w1, D_IN, D1P)
    b1p = _pad2(b1, 1, D1P)
    w2p = _pad2(w2, D1P, D2P)
    b2p = _pad2(b2, 1, D2P)
    w3p = _pad2(w3, D2P, D3P)
    b3p = _pad2(b3, 1, D3P)
    w4p = _pad2(w4, D3P, D_OUTP)
    b4p = _pad2(b4, 1, D_OUTP)

    # Batch tile: adapt to small batches (avoid padding a tiny batch up to 256),
    # cap at TM_MAX for large ones. Keep the sublane (8) constraint satisfied.
    B = x.shape[0]
    tm = min(TM_MAX, ((B + 7) // 8) * 8)
    n_tiles = pl.cdiv(B, tm)
    Bp = n_tiles * tm
    xp = jnp.pad(x, ((0, Bp - B), (0, 0))) if Bp != B else x

    full = lambda i: (0, 0)  # weights/biases resident for every batch tile

    out_padded = pl.pallas_call(
        mlp_kernel,
        out_shape=jax.ShapeDtypeStruct((Bp, D_OUTP), jnp.float32),
        grid_spec=pltpu.PrefetchScalarGridSpec(
            num_scalar_prefetch=0,
            grid=(n_tiles,),
            in_specs=[
                pl.BlockSpec((tm, D_IN), lambda i: (i, 0)),
                pl.BlockSpec((D_IN, D1P), full),
                pl.BlockSpec((1, D1P), full),
                pl.BlockSpec((D1P, D2P), full),
                pl.BlockSpec((1, D2P), full),
                pl.BlockSpec((D2P, D3P), full),
                pl.BlockSpec((1, D3P), full),
                pl.BlockSpec((D3P, D_OUTP), full),
                pl.BlockSpec((1, D_OUTP), full),
            ],
            out_specs=pl.BlockSpec((tm, D_OUTP), lambda i: (i, 0)),
        ),
        compiler_params=pltpu.CompilerParams(
            dimension_semantics=("parallel",),
            # ~15-20 MiB resident (weights x2 bufs + batch tiles); above v5e's
            # 16 MiB scoped default, comfortably under v7x's 64 MiB physical VMEM.
            vmem_limit_bytes=48 * 1024 * 1024,
        ),
    )(xp, w1p, b1p, w2p, b2p, w3p, b3p, w4p, b4p)

    # Strip batch padding and the padded output columns.
    return out_padded[:B, :D_OUT]


def init_params(key):
    """Deterministic init mimicking nn.Linear default: U(-1/sqrt(fan_in), 1/sqrt(fan_in)).

    Weights stored (in_features, out_features) so kernel computes x @ W + b
    (== PyTorch's x @ W_pt.T + b). Biases are (1, out) rows.
    """
    dims = [(D_IN, D1), (D1, D2), (D2, D3), (D3, D_OUT)]
    params = []
    keys = jax.random.split(key, 2 * len(dims))
    for li, (fin, fout) in enumerate(dims):
        bound = 1.0 / jnp.sqrt(jnp.float32(fin))
        w = jax.random.uniform(keys[2 * li], (fin, fout), jnp.float32, -bound, bound)
        b = jax.random.uniform(keys[2 * li + 1], (1, fout), jnp.float32, -bound, bound)
        params += [w, b]
    return tuple(params)


def reference_forward(x, params):
    w1, b1, w2, b2, w3, b3, w4, b4 = params
    h = jnp.maximum(x @ w1 + b1, 0.0)
    h = jnp.maximum(h @ w2 + b2, 0.0)
    h = jnp.maximum(h @ w3 + b3, 0.0)
    return jax.nn.sigmoid(h @ w4 + b4)


if __name__ == "__main__":
    key = jax.random.PRNGKey(0)
    k_x, k_p = jax.random.split(key)
    batch = 16  # small test batch; tile adapts (tm=16) so no wasted padding
    x = jax.random.normal(k_x, (batch, D_IN), jnp.float32)
    params = init_params(k_p)

    fwd = jax.jit(net_forward)
    out = fwd(x, params)
    out = jax.block_until_ready(out)

    ref = reference_forward(x, params)
    assert out.shape == (batch, D_OUT)
    assert jnp.allclose(out, ref, atol=1e-5, rtol=1e-5)
    print("KERNEL_OK")
</pallas_src>

<mosaic_0001>
module attributes {stable_mosaic.version = 11 : i64} {
  func.func @mlp_kernel(%arg0: i32, %arg1: memref<16x1280xf32, #tpu.memory_space<vmem>>, %arg2: memref<1280x896xf32, #tpu.memory_space<vmem>>, %arg3: memref<1x896xf32, #tpu.memory_space<vmem>>, %arg4: memref<896x384xf32, #tpu.memory_space<vmem>>, %arg5: memref<1x384xf32, #tpu.memory_space<vmem>>, %arg6: memref<384x128xf32, #tpu.memory_space<vmem>>, %arg7: memref<1x128xf32, #tpu.memory_space<vmem>>, %arg8: memref<128x128xf32, #tpu.memory_space<vmem>>, %arg9: memref<1x128xf32, #tpu.memory_space<vmem>>, %arg10: memref<16x128xf32, #tpu.memory_space<vmem>>) attributes {dimension_semantics = [#tpu.dimension_semantics<parallel>], iteration_bounds = array<i64: 1>, scalar_prefetch = 0 : i64, scratch_operands = 0 : i64, tpu.core_type = #tpu.core_type<tc>, window_params = [{transform_indices = @transform_0, window_bounds = array<i64: 16, 1280>}, {pipeline_mode = #tpu.pipeline_mode<synchronous>, transform_indices = @transform_1, window_bounds = array<i64: 1280, 896>}, {pipeline_mode = #tpu.pipeline_mode<synchronous>, transform_indices = @transform_2, window_bounds = array<i64: 1, 896>}, {pipeline_mode = #tpu.pipeline_mode<synchronous>, transform_indices = @transform_3, window_bounds = array<i64: 896, 384>}, {pipeline_mode = #tpu.pipeline_mode<synchronous>, transform_indices = @transform_4, window_bounds = array<i64: 1, 384>}, {pipeline_mode = #tpu.pipeline_mode<synchronous>, transform_indices = @transform_5, window_bounds = array<i64: 384, 128>}, {pipeline_mode = #tpu.pipeline_mode<synchronous>, transform_indices = @transform_6, window_bounds = array<i64: 1, 128>}, {pipeline_mode = #tpu.pipeline_mode<synchronous>, transform_indices = @transform_7, window_bounds = array<i64: 128, 128>}, {pipeline_mode = #tpu.pipeline_mode<synchronous>, transform_indices = @transform_8, window_bounds = array<i64: 1, 128>}, {transform_indices = @transform_9, window_bounds = array<i64: 16, 128>}]} {
    %c0 = arith.constant 0 : index
    %c0_0 = arith.constant 0 : index
    %0 = vector.load %arg1[%c0, %c0_0] : memref<16x1280xf32, #tpu.memory_space<vmem>>, vector<16x1280xf32>
    %c0_1 = arith.constant 0 : index
    %c0_2 = arith.constant 0 : index
    %1 = vector.load %arg2[%c0_1, %c0_2] : memref<1280x896xf32, #tpu.memory_space<vmem>>, vector<1280x896xf32>
    %cst = arith.constant dense<0.000000e+00> : vector<16x896xf32>
    %2 = tpu.matmul %0, %1, %cst {dimension_numbers = #tpu.dot_dimension_numbers<[1], [0], [0], [1], [0, 0, 1, 1], [], []>} : vector<16x1280xf32>, vector<1280x896xf32>, vector<16x896xf32> -> vector<16x896xf32>
    %c0_3 = arith.constant 0 : index
    %c0_4 = arith.constant 0 : index
    %3 = vector.load %arg3[%c0_3, %c0_4] : memref<1x896xf32, #tpu.memory_space<vmem>>, vector<1x896xf32>
    %4 = vector.broadcast %3 : vector<1x896xf32> to vector<16x896xf32>
    %5 = arith.addf %2, %4 : vector<16x896xf32>
    %cst_5 = arith.constant 0.000000e+00 : f32
    %6 = vector.broadcast %cst_5 : f32 to vector<16x896xf32>
    %7 = arith.maximumf %5, %6 : vector<16x896xf32>
    %c0_6 = arith.constant 0 : index
    %c0_7 = arith.constant 0 : index
    %8 = vector.load %arg4[%c0_6, %c0_7] : memref<896x384xf32, #tpu.memory_space<vmem>>, vector<896x384xf32>
    %cst_8 = arith.constant dense<0.000000e+00> : vector<16x384xf32>
    %9 = tpu.matmul %7, %8, %cst_8 {dimension_numbers = #tpu.dot_dimension_numbers<[1], [0], [0], [1], [0, 0, 1, 1], [], []>} : vector<16x896xf32>, vector<896x384xf32>, vector<16x384xf32> -> vector<16x384xf32>
    %c0_9 = arith.constant 0 : index
    %c0_10 = arith.constant 0 : index
    %10 = vector.load %arg5[%c0_9, %c0_10] : memref<1x384xf32, #tpu.memory_space<vmem>>, vector<1x384xf32>
    %11 = vector.broadcast %10 : vector<1x384xf32> to vector<16x384xf32>
    %12 = arith.addf %9, %11 : vector<16x384xf32>
    %cst_11 = arith.constant 0.000000e+00 : f32
    %13 = vector.broadcast %cst_11 : f32 to vector<16x384xf32>
    %14 = arith.maximumf %12, %13 : vector<16x384xf32>
    %c0_12 = arith.constant 0 : index
    %c0_13 = arith.constant 0 : index
    %15 = vector.load %arg6[%c0_12, %c0_13] : memref<384x128xf32, #tpu.memory_space<vmem>>, vector<384x128xf32>
    %cst_14 = arith.constant dense<0.000000e+00> : vector<16x128xf32>
    %16 = tpu.matmul %14, %15, %cst_14 {dimension_numbers = #tpu.dot_dimension_numbers<[1], [0], [0], [1], [0, 0, 1, 1], [], []>} : vector<16x384xf32>, vector<384x128xf32>, vector<16x128xf32> -> vector<16x128xf32>
    %c0_15 = arith.constant 0 : index
    %c0_16 = arith.constant 0 : index
    %17 = vector.load %arg7[%c0_15, %c0_16] : memref<1x128xf32, #tpu.memory_space<vmem>>, vector<1x128xf32>
    %18 = vector.broadcast %17 : vector<1x128xf32> to vector<16x128xf32>
    %19 = arith.addf %16, %18 : vector<16x128xf32>
    %cst_17 = arith.constant 0.000000e+00 : f32
    %20 = vector.broadcast %cst_17 : f32 to vector<16x128xf32>
    %21 = arith.maximumf %19, %20 : vector<16x128xf32>
    %c0_18 = arith.constant 0 : index
    %c0_19 = arith.constant 0 : index
    %22 = vector.load %arg8[%c0_18, %c0_19] : memref<128x128xf32, #tpu.memory_space<vmem>>, vector<128x128xf32>
    %cst_20 = arith.constant dense<0.000000e+00> : vector<16x128xf32>
    %23 = tpu.matmul %21, %22, %cst_20 {dimension_numbers = #tpu.dot_dimension_numbers<[1], [0], [0], [1], [0, 0, 1, 1], [], []>} : vector<16x128xf32>, vector<128x128xf32>, vector<16x128xf32> -> vector<16x128xf32>
    %c0_21 = arith.constant 0 : index
    %c0_22 = arith.constant 0 : index
    %24 = vector.load %arg9[%c0_21, %c0_22] : memref<1x128xf32, #tpu.memory_space<vmem>>, vector<1x128xf32>
    %25 = vector.broadcast %24 : vector<1x128xf32> to vector<16x128xf32>
    %26 = arith.addf %23, %25 : vector<16x128xf32>
    %27 = arith.negf %26 : vector<16x128xf32>
    %28 = math.exp %27 : vector<16x128xf32>
    %cst_23 = arith.constant 1.000000e+00 : f32
    %29 = vector.broadcast %cst_23 : f32 to vector<16x128xf32>
    %30 = arith.addf %29, %28 : vector<16x128xf32>
    %31 = arith.divf %29, %30 : vector<16x128xf32>
    %c0_24 = arith.constant 0 : index
    %c0_25 = arith.constant 0 : index
    %32 = vector.load %arg10[%c0_24, %c0_25] : memref<16x128xf32, #tpu.memory_space<vmem>>, vector<16x128xf32>
    tpu.vector_store %arg10[%c0_24, %c0_25], %31 {strides = array<i32>} : memref<16x128xf32, #tpu.memory_space<vmem>>, vector<16x128xf32>,
    return
  }
  func.func @transform_0(%arg0: i32) -> (i32, i32) {
    %c0_i32 = arith.constant 0 : i32
    %c0_i32_0 = arith.constant 0 : i32
    return %arg0, %c0_i32 : i32, i32
  }
  func.func @transform_1(%arg0: i32) -> (i32, i32) {
    %c0_i32 = arith.constant 0 : i32
    %c0_i32_0 = arith.constant 0 : i32
    %c0_i32_1 = arith.constant 0 : i32
    return %c0_i32, %c0_i32_0 : i32, i32
  }
  func.func @transform_2(%arg0: i32) -> (i32, i32) {
    %c0_i32 = arith.constant 0 : i32
    %c0_i32_0 = arith.constant 0 : i32
    %c0_i32_1 = arith.constant 0 : i32
    return %c0_i32, %c0_i32_0 : i32, i32
  }
  func.func @transform_3(%arg0: i32) -> (i32, i32) {
    %c0_i32 = arith.constant 0 : i32
    %c0_i32_0 = arith.constant 0 : i32
    %c0_i32_1 = arith.constant 0 : i32
    return %c0_i32, %c0_i32_0 : i32, i32
  }
  func.func @transform_4(%arg0: i32) -> (i32, i32) {
    %c0_i32 = arith.constant 0 : i32
    %c0_i32_0 = arith.constant 0 : i32
    %c0_i32_1 = arith.constant 0 : i32
    return %c0_i32, %c0_i32_0 : i32, i32
  }
  func.func @transform_5(%arg0: i32) -> (i32, i32) {
    %c0_i32 = arith.constant 0 : i32
    %c0_i32_0 = arith.constant 0 : i32
    %c0_i32_1 = arith.constant 0 : i32
    return %c0_i32, %c0_i32_0 : i32, i32
  }
  func.func @transform_6(%arg0: i32) -> (i32, i32) {
    %c0_i32 = arith.constant 0 : i32
    %c0_i32_0 = arith.constant 0 : i32
    %c0_i32_1 = arith.constant 0 : i32
    return %c0_i32, %c0_i32_0 : i32, i32
  }
  func.func @transform_7(%arg0: i32) -> (i32, i32) {
    %c0_i32 = arith.constant 0 : i32
    %c0_i32_0 = arith.constant 0 : i32
    %c0_i32_1 = arith.constant 0 : i32
    return %c0_i32, %c0_i32_0 : i32, i32
  }
  func.func @transform_8(%arg0: i32) -> (i32, i32) {
    %c0_i32 = arith.constant 0 : i32
    %c0_i32_0 = arith.constant 0 : i32
    %c0_i32_1 = arith.constant 0 : i32
    return %c0_i32, %c0_i32_0 : i32, i32
  }
  func.func @transform_9(%arg0: i32) -> (i32, i32) {
    %c0_i32 = arith.constant 0 : i32
    %c0_i32_0 = arith.constant 0 : i32
    return %arg0, %c0_i32 : i32, i32
  }
}

</mosaic_0001>

<bundles_post_ra>
// kernel: net_forward.1
= control target key start
LH: loop header
LB: loop body
LE: loop exit
PB: predicated region body
PF: predicated region fallthrough
CT: control target
= control target key end

     0   :  { %s9470_s1 = inlined_call_operand.vmem [shape: f32[1280,896], index: 1, kind: input, shape index: {}]   ;;  %s9471_s0 = inlined_call_operand.vmem [shape: f32[16,1280], index: 0, kind: input, shape index: {}]   ;;  %s9472_s2 = inlined_call_operand.vmem [shape: f32[1,896], index: 2, kind: input, shape index: {}]   ;;  %s9473_s3 = inlined_call_operand.vmem [shape: f32[896,384], index: 3, kind: input, shape index: {}]   ;;  %s9474_s5 = inlined_call_operand.vmem [shape: f32[384,128], index: 5, kind: input, shape index: {}]   ;;  %s9475_s6 = inlined_call_operand.vmem [shape: f32[1,128], index: 6, kind: input, shape index: {}]   ;;  %s9476_s4 = inlined_call_operand.vmem [shape: f32[1,384], index: 4, kind: input, shape index: {}]   ;;  %s9477_s8 = inlined_call_operand.vmem [shape: f32[1,128], index: 8, kind: input, shape index: {}]   ;;  %s9478_s7 = inlined_call_operand.vmem [shape: f32[128,128], index: 7, kind: input, shape index: {}]   ;;  %s9479_s9 = inlined_call_operand.vmem [shape: f32[16,128], index: 9, kind: output, shape index: {}]  }
   0x1   :  { %v157_v0 = vld [vmem:[%s9470_s1 + $0x348] sm:$0xff]  ;;  %v150_v4 = vld [vmem:[%s9470_s1 + $0x310] sm:$0xff]  ;;  %v143_v8 = vld [vmem:[%s9470_s1 + $0x2d8] sm:$0xff] }
   0x2   :  { %v269_v1 = vld [vmem:[%s9470_s1 + $0x6c8] sm:$0xff]  ;;  %1188 = vmatpush.msra.mxu0 %v157_v0  ;;  %v262_v5 = vld [vmem:[%s9470_s1 + $0x690] sm:$0xff]  ;;  %v255_v9 = vld [vmem:[%s9470_s1 + $0x658] sm:$0xff] }
   0x3   :  { %v381_v2 = vld [vmem:[%s9470_s1 + $0xa48] sm:$0xff]  ;;  %1211 = vmatpush.msra.mxu1 %v269_v1  ;;  %v374_v6 = vld [vmem:[%s9470_s1 + $0xa10] sm:$0xff]  ;;  %v367_v10 = vld [vmem:[%s9470_s1 + $0x9d8] sm:$0xff] }
   0x4   :  { %v493_v3 = vld [vmem:[%s9470_s1 + $0xdc8] sm:$0xff]  ;;  %1234 = vmatpush.msra.mxu2 %v381_v2  ;;  %v486_v7 = vld [vmem:[%s9470_s1 + $0xd90] sm:$0xff]  ;;  %1189 = vmatpush.msra.mxu0 %v150_v4  ;;  %v479_v11 = vld [vmem:[%s9470_s1 + $0xd58] sm:$0xff] }
   0x5   :  { %1257 = vmatpush.msra.mxu3 %v493_v3  ;;  %1212 = vmatpush.msra.mxu1 %v262_v5  ;;  %v136_v12 = vld [vmem:[%s9470_s1 + $0x2a0] sm:$0xff]  ;;  %v129_v16 = vld [vmem:[%s9470_s1 + $0x268] sm:$0xff]  ;;  %v122_v20 = vld [vmem:[%s9470_s1 + $0x230] sm:$0xff] }
   0x6   :  { %1235 = vmatpush.msra.mxu2 %v374_v6  ;;  %v248_v13 = vld [vmem:[%s9470_s1 + $0x620] sm:$0xff]  ;;  %1190 = vmatpush.msra.mxu0 %v143_v8  ;;  %v241_v17 = vld [vmem:[%s9470_s1 + $0x5e8] sm:$0xff]  ;;  %v234_v21 = vld [vmem:[%s9470_s1 + $0x5b0] sm:$0xff] }
   0x7   :  { %1258 = vmatpush.msra.mxu3 %v486_v7  ;;  %1213 = vmatpush.msra.mxu1 %v255_v9  ;;  %v360_v14 = vld [vmem:[%s9470_s1 + $0x9a0] sm:$0xff]  ;;  %v353_v18 = vld [vmem:[%s9470_s1 + $0x968] sm:$0xff]  ;;  %v346_v22 = vld [vmem:[%s9470_s1 + $0x930] sm:$0xff] }
   0x8   :  { %v472_v15 = vld [vmem:[%s9470_s1 + $0xd20] sm:$0xff]  ;;  %1236 = vmatpush.msra.mxu2 %v367_v10  ;;  %1191 = vmatpush.msra.mxu0 %v136_v12  ;;  %v465_v19 = vld [vmem:[%s9470_s1 + $0xce8] sm:$0xff]  ;;  %v458_v23 = vld [vmem:[%s9470_s1 + $0xcb0] sm:$0xff] }
   0x9   :  { %1259 = vmatpush.msra.mxu3 %v479_v11  ;;  %1214 = vmatpush.msra.mxu1 %v248_v13  ;;  %v115_v24 = vld [vmem:[%s9470_s1 + $0x1f8] sm:$0xff]  ;;  %v108_v28 = vld [vmem:[%s9470_s1 + $0x1c0] sm:$0xff]  ;;  %v101_v32 = vld [vmem:[%s9470_s1 + $0x188] sm:$0xff] }
   0xa   :  { %1237 = vmatpush.msra.mxu2 %v360_v14  ;;  %1192 = vmatpush.msra.mxu0 %v129_v16  ;;  %v227_v25 = vld [vmem:[%s9470_s1 + $0x578] sm:$0xff]  ;;  %v220_v29 = vld [vmem:[%s9470_s1 + $0x540] sm:$0xff]  ;;  %v213_v33 = vld [vmem:[%s9470_s1 + $0x508] sm:$0xff] }
   0xb   :  { %1260 = vmatpush.msra.mxu3 %v472_v15  ;;  %1215 = vmatpush.msra.mxu1 %v241_v17  ;;  %v339_v26 = vld [vmem:[%s9470_s1 + $0x8f8] sm:$0xff]  ;;  %v332_v30 = vld [vmem:[%s9470_s1 + $0x8c0] sm:$0xff]  ;;  %v325_v34 = vld [vmem:[%s9470_s1 + $0x888] sm:$0xff] }
   0xc   :  { %1238 = vmatpush.msra.mxu2 %v353_v18  ;;  %1193 = vmatpush.msra.mxu0 %v122_v20  ;;  %v451_v27 = vld [vmem:[%s9470_s1 + $0xc78] sm:$0xff]  ;;  %v444_v31 = vld [vmem:[%s9470_s1 + $0xc40] sm:$0xff]  ;;  %v437_v35 = vld [vmem:[%s9470_s1 + $0xc08] sm:$0xff] }
   0xd   :  { %1261 = vmatpush.msra.mxu3 %v465_v19  ;;  %1216 = vmatpush.msra.mxu1 %v234_v21  ;;  %v94_v36 = vld [vmem:[%s9470_s1 + $0x150] sm:$0xff]  ;;  %v87_v40 = vld [vmem:[%s9470_s1 + $0x118] sm:$0xff]  ;;  %v80_v44 = vld [vmem:[%s9470_s1 + $0xe0] sm:$0xff] }
   0xe   :  { %1239 = vmatpush.msra.mxu2 %v346_v22  ;;  %1194 = vmatpush.msra.mxu0 %v115_v24  ;;  %v206_v37 = vld [vmem:[%s9470_s1 + $0x4d0] sm:$0xff]  ;;  %v199_v41 = vld [vmem:[%s9470_s1 + $0x498] sm:$0xff]  ;;  %v192_v45 = vld [vmem:[%s9470_s1 + $0x460] sm:$0xff] }
   0xf   :  { %1262 = vmatpush.msra.mxu3 %v458_v23  ;;  %1217 = vmatpush.msra.mxu1 %v227_v25  ;;  %v318_v38 = vld [vmem:[%s9470_s1 + $0x850] sm:$0xff]  ;;  %v311_v42 = vld [vmem:[%s9470_s1 + $0x818] sm:$0xff]  ;;  %v304_v46 = vld [vmem:[%s9470_s1 + $0x7e0] sm:$0xff] }
  0x10   :  { %1240 = vmatpush.msra.mxu2 %v339_v26  ;;  %1195 = vmatpush.msra.mxu0 %v108_v28  ;;  %v430_v39 = vld [vmem:[%s9470_s1 + $0xbd0] sm:$0xff]  ;;  %v423_v43 = vld [vmem:[%s9470_s1 + $0xb98] sm:$0xff]  ;;  %v416_v47 = vld [vmem:[%s9470_s1 + $0xb60] sm:$0xff] }
  0x11   :  { %1263 = vmatpush.msra.mxu3 %v451_v27  ;;  %1218 = vmatpush.msra.mxu1 %v220_v29  ;;  %v73_v48 = vld [vmem:[%s9470_s1 + $0xa8] sm:$0xff]  ;;  %v66_v52 = vld [vmem:[%s9470_s1 + $0x70] sm:$0xff]  ;;  %v59_v56 = vld [vmem:[%s9470_s1 + $0x38] sm:$0xff] }
  0x12   :  { %1241 = vmatpush.msra.mxu2 %v332_v30  ;;  %1196 = vmatpush.msra.mxu0 %v101_v32  ;;  %v185_v49 = vld [vmem:[%s9470_s1 + $0x428] sm:$0xff]  ;;  %v178_v53 = vld [vmem:[%s9470_s1 + $0x3f0] sm:$0xff]  ;;  %v171_v57 = vld [vmem:[%s9470_s1 + $0x3b8] sm:$0xff] }
  0x13   :  { %1264 = vmatpush.msra.mxu3 %v444_v31  ;;  %1219 = vmatpush.msra.mxu1 %v213_v33  ;;  %v297_v50 = vld [vmem:[%s9470_s1 + $0x7a8] sm:$0xff]  ;;  %v290_v54 = vld [vmem:[%s9470_s1 + $0x770] sm:$0xff]  ;;  %v283_v58 = vld [vmem:[%s9470_s1 + $0x738] sm:$0xff] }
  0x14   :  { %1242 = vmatpush.msra.mxu2 %v325_v34  ;;  %1197 = vmatpush.msra.mxu0 %v94_v36  ;;  %v409_v51 = vld [vmem:[%s9470_s1 + $0xb28] sm:$0xff]  ;;  %v402_v55 = vld [vmem:[%s9470_s1 + $0xaf0] sm:$0xff]  ;;  %v395_v59 = vld [vmem:[%s9470_s1 + $0xab8] sm:$0xff] }
  0x15   :  { %1265 = vmatpush.msra.mxu3 %v437_v35  ;;  %1220 = vmatpush.msra.mxu1 %v206_v37  ;;  %v52_v60 = vld [vmem:[%s9470_s1] sm:$0xff]  ;;  %v605_v0 = vld [vmem:[%s9470_s1 + $0x1148] sm:$0xff]  ;;  %v598_v4 = vld [vmem:[%s9470_s1 + $0x1110] sm:$0xff] }
  0x16   :  { %1243 = vmatpush.msra.mxu2 %v318_v38  ;;  %1198 = vmatpush.msra.mxu0 %v87_v40  ;;  %v164_v61 = vld [vmem:[%s9470_s1 + $0x380] sm:$0xff]  ;;  %v717_v1 = vld [vmem:[%s9470_s1 + $0x14c8] sm:$0xff]  ;;  %v710_v5 = vld [vmem:[%s9470_s1 + $0x1490] sm:$0xff] }
  0x17   :  { %1266 = vmatpush.msra.mxu3 %v430_v39  ;;  %1221 = vmatpush.msra.mxu1 %v199_v41  ;;  %v276_v62 = vld [vmem:[%s9470_s1 + $0x700] sm:$0xff]  ;;  %v829_v2 = vld [vmem:[%s9470_s1 + $0x1848] sm:$0xff]  ;;  %v822_v6 = vld [vmem:[%s9470_s1 + $0x1810] sm:$0xff] }
  0x18   :  { %1244 = vmatpush.msra.mxu2 %v311_v42  ;;  %1199 = vmatpush.msra.mxu0 %v80_v44  ;;  %v388_v63 = vld [vmem:[%s9470_s1 + $0xa80] sm:$0xff]  ;;  %v941_v3 = vld [vmem:[%s9470_s1 + $0x1bc8] sm:$0xff]  ;;  %v934_v7 = vld [vmem:[%s9470_s1 + $0x1b90] sm:$0xff] }
  0x19   :  { %1267 = vmatpush.msra.mxu3 %v423_v43  ;;  %1222 = vmatpush.msra.mxu1 %v192_v45  ;;  %v591_v8 = vld [vmem:[%s9470_s1 + $0x10d8] sm:$0xff]  ;;  %v584_v12 = vld [vmem:[%s9470_s1 + $0x10a0] sm:$0xff]  ;;  %v577_v16 = vld [vmem:[%s9470_s1 + $0x1068] sm:$0xff] }
  0x1a   :  { %1245 = vmatpush.msra.mxu2 %v304_v46  ;;  %1200 = vmatpush.msra.mxu0 %v73_v48  ;;  %v703_v9 = vld [vmem:[%s9470_s1 + $0x1458] sm:$0xff]  ;;  %v696_v13 = vld [vmem:[%s9470_s1 + $0x1420] sm:$0xff]  ;;  %v689_v17 = vld [vmem:[%s9470_s1 + $0x13e8] sm:$0xff] }
  0x1b   :  { %1268 = vmatpush.msra.mxu3 %v416_v47  ;;  %1223 = vmatpush.msra.mxu1 %v185_v49  ;;  %v815_v10 = vld [vmem:[%s9470_s1 + $0x17d8] sm:$0xff]  ;;  %v808_v14 = vld [vmem:[%s9470_s1 + $0x17a0] sm:$0xff]  ;;  %v801_v18 = vld [vmem:[%s9470_s1 + $0x1768] sm:$0xff] }
  0x1c   :  { %1246 = vmatpush.msra.mxu2 %v297_v50  ;;  %1201 = vmatpush.msra.mxu0 %v66_v52  ;;  %v927_v11 = vld [vmem:[%s9470_s1 + $0x1b58] sm:$0xff]  ;;  %v920_v15 = vld [vmem:[%s9470_s1 + $0x1b20] sm:$0xff]  ;;  %v913_v19 = vld [vmem:[%s9470_s1 + $0x1ae8] sm:$0xff] }
  0x1d   :  { %1269 = vmatpush.msra.mxu3 %v409_v51  ;;  %1224 = vmatpush.msra.mxu1 %v178_v53  ;;  %v570_v20 = vld [vmem:[%s9470_s1 + $0x1030] sm:$0xff]  ;;  %v563_v24 = vld [vmem:[%s9470_s1 + $0xff8] sm:$0xff]  ;;  %v556_v28 = vld [vmem:[%s9470_s1 + $0xfc0] sm:$0xff] }
  0x1e   :  { %1247 = vmatpush.msra.mxu2 %v290_v54  ;;  %1202 = vmatpush.msra.mxu0 %v59_v56  ;;  %v682_v21 = vld [vmem:[%s9470_s1 + $0x13b0] sm:$0xff]  ;;  %v675_v25 = vld [vmem:[%s9470_s1 + $0x1378] sm:$0xff]  ;;  %v668_v29 = vld [vmem:[%s9470_s1 + $0x1340] sm:$0xff] }
  0x1f   :  { %1270 = vmatpush.msra.mxu3 %v402_v55  ;;  %1225 = vmatpush.msra.mxu1 %v171_v57  ;;  %v794_v22 = vld [vmem:[%s9470_s1 + $0x1730] sm:$0xff]  ;;  %v787_v26 = vld [vmem:[%s9470_s1 + $0x16f8] sm:$0xff]  ;;  %v780_v30 = vld [vmem:[%s9470_s1 + $0x16c0] sm:$0xff] }
  0x20   :  { %1248 = vmatpush.msra.mxu2 %v283_v58  ;;  %1203 = vmatpush.msra.mxu0 %v52_v60  ;;  %v906_v23 = vld [vmem:[%s9470_s1 + $0x1ab0] sm:$0xff]  ;;  %v899_v27 = vld [vmem:[%s9470_s1 + $0x1a78] sm:$0xff]  ;;  %v892_v31 = vld [vmem:[%s9470_s1 + $0x1a40] sm:$0xff] }
  0x21   :  { %1271 = vmatpush.msra.mxu3 %v395_v59  ;;  %1226 = vmatpush.msra.mxu1 %v164_v61  ;;  %v549_v32 = vld [vmem:[%s9470_s1 + $0xf88] sm:$0xff]  ;;  %v542_v36 = vld [vmem:[%s9470_s1 + $0xf50] sm:$0xff]  ;;  %v535_v40 = vld [vmem:[%s9470_s1 + $0xf18] sm:$0xff] }
  0x22   :  { %1249 = vmatpush.msra.mxu2 %v276_v62  ;;  %1280 = vmatpush.msrb.mxu0 %v605_v0  ;;  %v661_v33 = vld [vmem:[%s9470_s1 + $0x1308] sm:$0xff]  ;;  %v654_v37 = vld [vmem:[%s9470_s1 + $0x12d0] sm:$0xff]  ;;  %v647_v41 = vld [vmem:[%s9470_s1 + $0x1298] sm:$0xff] }
  0x23   :  { %1272 = vmatpush.msra.mxu3 %v388_v63  ;;  %1303 = vmatpush.msrb.mxu1 %v717_v1  ;;  %v773_v34 = vld [vmem:[%s9470_s1 + $0x1688] sm:$0xff]  ;;  %v766_v38 = vld [vmem:[%s9470_s1 + $0x1650] sm:$0xff]  ;;  %v759_v42 = vld [vmem:[%s9470_s1 + $0x1618] sm:$0xff] }
  0x24   :  { %1326 = vmatpush.msrb.mxu2 %v829_v2  ;;  %1281 = vmatpush.msrb.mxu0 %v598_v4  ;;  %v885_v35 = vld [vmem:[%s9470_s1 + $0x1a08] sm:$0xff]  ;;  %v878_v39 = vld [vmem:[%s9470_s1 + $0x19d0] sm:$0xff]  ;;  %v871_v43 = vld [vmem:[%s9470_s1 + $0x1998] sm:$0xff] }
  0x25   :  { %1349 = vmatpush.msrb.mxu3 %v941_v3  ;;  %1304 = vmatpush.msrb.mxu1 %v710_v5  ;;  %v4321_v44 = vld [vmem:[%s9471_s0 + $0x10] sm:$0xff]  ;;  %v528_v45 = vld [vmem:[%s9470_s1 + $0xee0] sm:$0xff]  ;;  %v4344_v50 = vld [vmem:[%s9471_s0 + $0x18] sm:$0xff] }
  0x26   :  { %1327 = vmatpush.msrb.mxu2 %v822_v6  ;;  %1282 = vmatpush.msrb.mxu0 %v591_v8  ;;  %v640_v46 = vld [vmem:[%s9470_s1 + $0x1260] sm:$0xff]  ;;  %v521_v51 = vld [vmem:[%s9470_s1 + $0xea8] sm:$0xff]  ;;  %v514_v56 = vld [vmem:[%s9470_s1 + $0xe70] sm:$0xff] }
  0x27   :  { %1350 = vmatpush.msrb.mxu3 %v934_v7  ;;  %1305 = vmatpush.msrb.mxu1 %v703_v9  ;;  %v752_v47 = vld [vmem:[%s9470_s1 + $0x15e0] sm:$0xff]  ;;  %v633_v52 = vld [vmem:[%s9470_s1 + $0x1228] sm:$0xff]  ;;  %v626_v57 = vld [vmem:[%s9470_s1 + $0x11f0] sm:$0xff] }
  0x28   :  { %1328 = vmatpush.msrb.mxu2 %v815_v10  ;;  %1283 = vmatpush.msrb.mxu0 %v584_v12  ;;  %v864_v48 = vld [vmem:[%s9470_s1 + $0x1960] sm:$0xff]  ;;  %v745_v53 = vld [vmem:[%s9470_s1 + $0x15a8] sm:$0xff]  ;;  %v738_v58 = vld [vmem:[%s9470_s1 + $0x1570] sm:$0xff] }
  0x29   :  { %1351 = vmatpush.msrb.mxu3 %v927_v11  ;;  %1306 = vmatpush.msrb.mxu1 %v696_v13  ;;  %v4338_v49 = vld [vmem:[%s9471_s0] sm:$0xff]  ;;  %v857_v54 = vld [vmem:[%s9470_s1 + $0x1928] sm:$0xff]  ;;  %v850_v59 = vld [vmem:[%s9470_s1 + $0x18f0] sm:$0xff] }
  0x2a   :  { %1329 = vmatpush.msrb.mxu2 %v808_v14  ;;  %1284 = vmatpush.msrb.mxu0 %v577_v16  ;;  %v4362_v55 = vld [vmem:[%s9471_s0 + $0x8] sm:$0xff]  ;;  %v507_v60 = vld [vmem:[%s9470_s1 + $0xe38] sm:$0xff]  ;;  %v4393_v0 = vld [vmem:[%s9471_s0 + $0x60] sm:$0xff] }
  0x2b   :  { %1352 = vmatpush.msrb.mxu3 %v920_v15  ;;  %1307 = vmatpush.msrb.mxu1 %v689_v17  ;;  %v619_v61 = vld [vmem:[%s9470_s1 + $0x11b8] sm:$0xff]  ;;  %v500_v1 = vld [vmem:[%s9470_s1 + $0xe00] sm:$0xff]  ;;  %v4410_v5 = vld [vmem:[%s9471_s0 + $0x50] sm:$0xff] }
  0x2c   :  { %1330 = vmatpush.msrb.mxu2 %v801_v18  ;;  %1285 = vmatpush.msrb.mxu0 %v570_v20  ;;  %v731_v62 = vld [vmem:[%s9470_s1 + $0x1538] sm:$0xff]  ;;  %v612_v2 = vld [vmem:[%s9470_s1 + $0x1180] sm:$0xff]  ;;  %v4416_v6 = vld [vmem:[%s9471_s0 + $0x68] sm:$0xff] }
  0x2d   :  { %1353 = vmatpush.msrb.mxu3 %v913_v19  ;;  %1308 = vmatpush.msrb.mxu1 %v682_v21  ;;  %v843_v63 = vld [vmem:[%s9470_s1 + $0x18b8] sm:$0xff]  ;;  %v724_v3 = vld [vmem:[%s9470_s1 + $0x1500] sm:$0xff]  ;;  %v1053_v7 = vld [vmem:[%s9470_s1 + $0x1f48] sm:$0xff] }
  0x2e   :  { %1331 = vmatpush.msrb.mxu2 %v794_v22  ;;  %1286 = vmatpush.msrb.mxu0 %v563_v24  ;;  %v836_v4 = vld [vmem:[%s9470_s1 + $0x1880] sm:$0xff]  ;;  %v1165_v8 = vld [vmem:[%s9470_s1 + $0x22c8] sm:$0xff]  ;;  %v158_v9 = vld [vmem:[%s9470_s1 + $0x350] sm:$0xff] }
  0x2f   :  { %1354 = vmatpush.msrb.mxu3 %v906_v23  ;;  %1309 = vmatpush.msrb.mxu1 %v675_v25  ;;  %v270_v10 = vld [vmem:[%s9470_s1 + $0x6d0] sm:$0xff]  ;;  %v4434_v11 = vld [vmem:[%s9471_s0 + $0x58] sm:$0xff]  ;;  %v144_v18 = vld [vmem:[%s9470_s1 + $0x2e0] sm:$0xff] }
  0x30   :  { %1332 = vmatpush.msrb.mxu2 %v787_v26  ;;  %1287 = vmatpush.msrb.mxu0 %v556_v28  ;;  %v1046_v12 = vld [vmem:[%s9470_s1 + $0x1f10] sm:$0xff]  ;;  %v151_v14 = vld [vmem:[%s9470_s1 + $0x318] sm:$0xff]  ;;  %v256_v19 = vld [vmem:[%s9470_s1 + $0x660] sm:$0xff] }
  0x31   :  { %1355 = vmatpush.msrb.mxu3 %v899_v27  ;;  %1310 = vmatpush.msrb.mxu1 %v668_v29  ;;  %v1158_v13 = vld [vmem:[%s9470_s1 + $0x2290] sm:$0xff]  ;;  %v263_v15 = vld [vmem:[%s9470_s1 + $0x698] sm:$0xff]  ;;  %v1032_v21 = vld [vmem:[%s9470_s1 + $0x1ea0] sm:$0xff] }
  0x32   :  { %1333 = vmatpush.msrb.mxu2 %v780_v30  ;;  %1288 = vmatpush.msrb.mxu0 %v549_v32  ;;  %v1039_v16 = vld [vmem:[%s9470_s1 + $0x1ed8] sm:$0xff]  ;;  %v4465_v20 = vld [vmem:[%s9471_s0 + $0x30] sm:$0xff]  ;;  %v1144_v22 = vld [vmem:[%s9470_s1 + $0x2220] sm:$0xff] }
  0x33   :  { %1356 = vmatpush.msrb.mxu3 %v892_v31  ;;  %1311 = vmatpush.msrb.mxu1 %v661_v33  ;;  %v1151_v17 = vld [vmem:[%s9470_s1 + $0x2258] sm:$0xff]  ;;  %v137_v23 = vld [vmem:[%s9470_s1 + $0x2a8] sm:$0xff]  ;;  %v4482_v25 = vld [vmem:[%s9471_s0 + $0x20] sm:$0xff] }
  0x34   :  { %1334 = vmatpush.msrb.mxu2 %v773_v34  ;;  %1289 = vmatpush.msrb.mxu0 %v542_v36  ;;  %v249_v24 = vld [vmem:[%s9470_s1 + $0x628] sm:$0xff]  ;;  %v4488_v26 = vld [vmem:[%s9471_s0 + $0x38] sm:$0xff]  ;;  %v130_v29 = vld [vmem:[%s9470_s1 + $0x270] sm:$0xff] }
  0x35   :  { %1357 = vmatpush.msrb.mxu3 %v885_v35  ;;  %1312 = vmatpush.msrb.mxu1 %v654_v37  ;;  %v1025_v27 = vld [vmem:[%s9470_s1 + $0x1e68] sm:$0xff]  ;;  %v242_v30 = vld [vmem:[%s9470_s1 + $0x5f0] sm:$0xff]  ;;  %v123_v34 = vld [vmem:[%s9470_s1 + $0x238] sm:$0xff] }
  0x36   :  { %1335 = vmatpush.msrb.mxu2 %v766_v38  ;;  %1290 = vmatpush.msrb.mxu0 %v535_v40  ;;  %v1137_v28 = vld [vmem:[%s9470_s1 + $0x21e8] sm:$0xff]  ;;  %v1018_v32 = vld [vmem:[%s9470_s1 + $0x1e30] sm:$0xff]  ;;  %v235_v35 = vld [vmem:[%s9470_s1 + $0x5b8] sm:$0xff] }
  0x37   :  { %1358 = vmatpush.msrb.mxu3 %v878_v39  ;;  %1313 = vmatpush.msrb.mxu1 %v647_v41  ;;  %v4506_v31 = vld [vmem:[%s9471_s0 + $0x28] sm:$0xff]  ;;  %v1130_v33 = vld [vmem:[%s9470_s1 + $0x21b0] sm:$0xff]  ;;  %v1011_v36 = vld [vmem:[%s9470_s1 + $0x1df8] sm:$0xff] }
  0x38   :  { %1336 = vmatpush.msrb.mxu2 %v759_v42  ;;  %1291 = vmatpush.msrb.mxu0 %v528_v45  ;;  %v1123_v37 = vld [vmem:[%s9470_s1 + $0x2178] sm:$0xff]  ;;  %v116_v38 = vld [vmem:[%s9470_s1 + $0x200] sm:$0xff]  ;;  %v109_v42 = vld [vmem:[%s9470_s1 + $0x1c8] sm:$0xff] }
  0x39   :  { %1359 = vmatpush.msrb.mxu3 %v871_v43  ;;  %1250 = vmatmul.f32.vlgmr.msra.gmra.mxu2 %v4321_v44  ;;  %v228_v39 = vld [vmem:[%s9470_s1 + $0x580] sm:$0xff]  ;;  %v221_v43 = vld [vmem:[%s9470_s1 + $0x548] sm:$0xff] }
  0x3a   :  { %1314 = vmatpush.msrb.mxu1 %v640_v46  ;;  %1337 = vmatpush.msrb.mxu2 %v752_v47  ;;  %v1004_v40 = vld [vmem:[%s9470_s1 + $0x1dc0] sm:$0xff]  ;;  %v997_v45 = vld [vmem:[%s9470_s1 + $0x1d88] sm:$0xff]  ;;  %v102_v47 = vld [vmem:[%s9470_s1 + $0x190] sm:$0xff] }
  0x3b   :  { %1360 = vmatpush.msrb.mxu3 %v864_v48  ;;  %1204 = vmatmul.f32.vlgmr.msra.gmra.mxu0 %v4338_v49  ;;  %v1116_v41 = vld [vmem:[%s9470_s1 + $0x2140] sm:$0xff]  ;;  %v1109_v46 = vld [vmem:[%s9470_s1 + $0x2108] sm:$0xff]  ;;  %v214_v48 = vld [vmem:[%s9470_s1 + $0x510] sm:$0xff] }
  0x3c   :  { %1273 = vmatmul.f32.vlgmr.msra.gmra.mxu3 %v4344_v50  ;;  %1292 = vmatpush.msrb.mxu0 %v521_v51  ;;  %v990_v51 = vld [vmem:[%s9470_s1 + $0x1d50] sm:$0xff] }
  0x3d   :  { %1315 = vmatpush.msrb.mxu1 %v633_v52  ;;  %1338 = vmatpush.msrb.mxu2 %v745_v53  ;;  %v1102_v52 = vld [vmem:[%s9470_s1 + $0x20d0] sm:$0xff]  ;;  %v95_v53 = vld [vmem:[%s9470_s1 + $0x158] sm:$0xff] }
  0x3e   :  { %1361 = vmatpush.msrb.mxu3 %v857_v54  ;;  %1227 = vmatmul.f32.vlgmr.msra.gmra.mxu1 %v4362_v55  ;;  %v207_v54 = vld [vmem:[%s9470_s1 + $0x4d8] sm:$0xff] }
  0x3f   :  { %1293 = vmatpush.msrb.mxu0 %v514_v56  ;;  %1316 = vmatpush.msrb.mxu1 %v626_v57  ;;  %v983_v56 = vld [vmem:[%s9470_s1 + $0x1d18] sm:$0xff] }
  0x40   :  { %1339 = vmatpush.msrb.mxu2 %v738_v58  ;;  %1362 = vmatpush.msrb.mxu3 %v850_v59  ;;  %v1095_v57 = vld [vmem:[%s9470_s1 + $0x2098] sm:$0xff]  ;;  %v88_v58 = vld [vmem:[%s9470_s1 + $0x120] sm:$0xff] }
  0x41   :  { %1294 = vmatpush.msrb.mxu0 %v507_v60  ;;  %1317 = vmatpush.msrb.mxu1 %v619_v61  ;;  %v200_v59 = vld [vmem:[%s9470_s1 + $0x4a0] sm:$0xff] }
  0x42   :  { %1340 = vmatpush.msrb.mxu2 %v731_v62  ;;  %1363 = vmatpush.msrb.mxu3 %v843_v63  ;;  %v976_v60 = vld [vmem:[%s9470_s1 + $0x1ce0] sm:$0xff]  ;;  %v81_v62 = vld [vmem:[%s9470_s1 + $0xe8] sm:$0xff] }
  0x43   :  { %1253 = vmatmul.f32.gmra.mxu2 %v4393_v0  ;;  %1295 = vmatpush.msrb.mxu0 %v500_v1  ;;  %v1088_v61 = vld [vmem:[%s9470_s1 + $0x2060] sm:$0xff]  ;;  %v193_v63 = vld [vmem:[%s9470_s1 + $0x468] sm:$0xff]  ;;  %v4597_v1 = vld [vmem:[%s9471_s0 + $0x70] sm:$0xff] }
  0x44   :  { %1318 = vmatpush.msrb.mxu1 %v612_v2  ;;  %1341 = vmatpush.msrb.mxu2 %v724_v3  ;;  %v1081_v2 = vld [vmem:[%s9470_s1 + $0x2028] sm:$0xff] }
  0x45   :  { %1364 = vmatpush.msrb.mxu3 %v836_v4  ;;  %1207 = vmatmul.f32.gmra.mxu0 %v4410_v5  ;;  %v969_v3 = vld [vmem:[%s9470_s1 + $0x1ca8] sm:$0xff]  ;;  %v74_v4 = vld [vmem:[%s9470_s1 + $0xb0] sm:$0xff] }
  0x46   :  { %1276 = vmatmul.f32.gmra.mxu3 %v4416_v6  ;;  %1372 = vmatpush.msra.mxu0 %v1053_v7  ;;  %v186_v7 = vld [vmem:[%s9470_s1 + $0x430] sm:$0xff] }
  0x47   :  { %1395 = vmatpush.msra.mxu1 %v1165_v8  ;;  %1418 = vmatpush.msra.mxu2 %v158_v9  ;;  %v4614_v8 = vld [vmem:[%s9471_s0 + $0x78] sm:$0xff]  ;;  %v962_v9 = vld [vmem:[%s9470_s1 + $0x1c70] sm:$0xff] }
  0x48   :  { %1441 = vmatpush.msra.mxu3 %v270_v10  ;;  %1230 = vmatmul.f32.gmra.mxu1 %v4434_v11  ;;  %v1074_v10 = vld [vmem:[%s9470_s1 + $0x1ff0] sm:$0xff] }
  0x49   :  { %1373 = vmatpush.msra.mxu0 %v1046_v12  ;;  %1396 = vmatpush.msra.mxu1 %v1158_v13  ;;  %v67_v12 = vld [vmem:[%s9470_s1 + $0x78] sm:$0xff] }
  0x4a   :  { %1419 = vmatpush.msra.mxu2 %v151_v14  ;;  %1442 = vmatpush.msra.mxu3 %v263_v15  ;;  %v179_v13 = vld [vmem:[%s9470_s1 + $0x3f8] sm:$0xff] }
  0x4b   :  { %1374 = vmatpush.msra.mxu0 %v1039_v16  ;;  %1397 = vmatpush.msra.mxu1 %v1151_v17  ;;  %v955_v14 = vld [vmem:[%s9470_s1 + $0x1c38] sm:$0xff]  ;;  %v60_v16 = vld [vmem:[%s9470_s1 + $0x40] sm:$0xff] }
  0x4c   :  { %1420 = vmatpush.msra.mxu2 %v144_v18  ;;  %1443 = vmatpush.msra.mxu3 %v256_v19  ;;  %v1067_v15 = vld [vmem:[%s9470_s1 + $0x1fb8] sm:$0xff]  ;;  %v172_v17 = vld [vmem:[%s9470_s1 + $0x3c0] sm:$0xff] }
  0x4d   :  { %1342 = vmatmul.f32.vlgmr.msrb.gmra.mxu2 %v4465_v20  ;;  %1375 = vmatpush.msra.mxu0 %v1032_v21  ;;  %v4645_v18 = vld [vmem:[%s9471_s0 + $0x80] sm:$0xff] }
  0x4e   :  { %1398 = vmatpush.msra.mxu1 %v1144_v22  ;;  %1421 = vmatpush.msra.mxu2 %v137_v23  ;;  %v948_v19 = vld [vmem:[%s9470_s1 + $0x1c00] sm:$0xff]  ;;  %v53_v22 = vld [vmem:[%s9470_s1 + $0x8] sm:$0xff] }
  0x4f   :  { %1444 = vmatpush.msra.mxu3 %v249_v24  ;;  %1296 = vmatmul.f32.vlgmr.msrb.gmra.mxu0 %v4482_v25  ;;  %v1060_v21 = vld [vmem:[%s9470_s1 + $0x1f80] sm:$0xff]  ;;  %v165_v23 = vld [vmem:[%s9470_s1 + $0x388] sm:$0xff] }
  0x50   :  { %1365 = vmatmul.f32.vlgmr.msrb.gmra.mxu3 %v4488_v26  ;;  %1376 = vmatpush.msra.mxu0 %v1025_v27  ;;  %v4662_v24 = vld [vmem:[%s9471_s0 + $0x40] sm:$0xff]  ;;  %v4668_v27 = vld [vmem:[%s9471_s0 + $0x88] sm:$0xff] }
  0x51   :  { %1399 = vmatpush.msra.mxu1 %v1137_v28  ;;  %1422 = vmatpush.msra.mxu2 %v130_v29  ;;  %v382_v28 = vld [vmem:[%s9470_s1 + $0xa50] sm:$0xff] }
  0x52   :  { %1445 = vmatpush.msra.mxu3 %v242_v30  ;;  %1319 = vmatmul.f32.vlgmr.msrb.gmra.mxu1 %v4506_v31  ;;  %v494_v29 = vld [vmem:[%s9470_s1 + $0xdd0] sm:$0xff] }
  0x53   :  { %1377 = vmatpush.msra.mxu0 %v1018_v32  ;;  %1400 = vmatpush.msra.mxu1 %v1130_v33  ;;  %v606_v30 = vld [vmem:[%s9470_s1 + $0x1150] sm:$0xff]  ;;  %v4686_v33 = vld [vmem:[%s9471_s0 + $0x48] sm:$0xff] }
  0x54   :  { %1423 = vmatpush.msra.mxu2 %v123_v34  ;;  %1446 = vmatpush.msra.mxu3 %v235_v35  ;;  %v718_v32 = vld [vmem:[%s9470_s1 + $0x14d0] sm:$0xff]  ;;  %v375_v34 = vld [vmem:[%s9470_s1 + $0xa18] sm:$0xff] }
  0x55   :  { %1378 = vmatpush.msra.mxu0 %v1011_v36  ;;  %1401 = vmatpush.msra.mxu1 %v1123_v37  ;;  %v487_v35 = vld [vmem:[%s9470_s1 + $0xd98] sm:$0xff] }
  0x56   :  { %1424 = vmatpush.msra.mxu2 %v116_v38  ;;  %1447 = vmatpush.msra.mxu3 %v228_v39  ;;  %v599_v36 = vld [vmem:[%s9470_s1 + $0x1118] sm:$0xff]  ;;  %v368_v38 = vld [vmem:[%s9470_s1 + $0x9e0] sm:$0xff] }
  0x57   :  { %1379 = vmatpush.msra.mxu0 %v1004_v40  ;;  %1402 = vmatpush.msra.mxu1 %v1116_v41  ;;  %v711_v37 = vld [vmem:[%s9470_s1 + $0x1498] sm:$0xff]  ;;  %v480_v39 = vld [vmem:[%s9470_s1 + $0xd60] sm:$0xff] }
  0x58   :  { %1425 = vmatpush.msra.mxu2 %v109_v42  ;;  %1448 = vmatpush.msra.mxu3 %v221_v43  ;;  %v592_v40 = vld [vmem:[%s9470_s1 + $0x10e0] sm:$0xff]  ;;  %v361_v42 = vld [vmem:[%s9470_s1 + $0x9a8] sm:$0xff] }
  0x59   :  { %1380 = vmatpush.msra.mxu0 %v997_v45  ;;  %1403 = vmatpush.msra.mxu1 %v1109_v46  ;;  %v704_v41 = vld [vmem:[%s9470_s1 + $0x1460] sm:$0xff]  ;;  %v473_v43 = vld [vmem:[%s9470_s1 + $0xd28] sm:$0xff] }
  0x5a   :  { %1426 = vmatpush.msra.mxu2 %v102_v47  ;;  %1449 = vmatpush.msra.mxu3 %v214_v48  ;;  %v585_v45 = vld [vmem:[%s9470_s1 + $0x10a8] sm:$0xff]  ;;  %v4729_v47 = vld [vmem:[%s9471_s0 + $0x90] sm:$0xff] }
  0x5b   :  { %1381 = vmatpush.msra.mxu0 %v990_v51  ;;  %1404 = vmatpush.msra.mxu1 %v1102_v52  ;;  %v697_v46 = vld [vmem:[%s9470_s1 + $0x1428] sm:$0xff]  ;;  %v466_v48 = vld [vmem:[%s9470_s1 + $0xcf0] sm:$0xff] }
  0x5c   :  { %1427 = vmatpush.msra.mxu2 %v95_v53  ;;  %1450 = vmatpush.msra.mxu3 %v207_v54  ;;  %v354_v51 = vld [vmem:[%s9470_s1 + $0x970] sm:$0xff]  ;;  %v4746_v54 = vld [vmem:[%s9471_s0 + $0x98] sm:$0xff] }
  0x5d   :  { %1382 = vmatpush.msra.mxu0 %v983_v56  ;;  %1405 = vmatpush.msra.mxu1 %v1095_v57  ;;  %v578_v52 = vld [vmem:[%s9470_s1 + $0x1070] sm:$0xff]  ;;  %v347_v56 = vld [vmem:[%s9470_s1 + $0x938] sm:$0xff] }
  0x5e   :  { %1428 = vmatpush.msra.mxu2 %v88_v58  ;;  %1451 = vmatpush.msra.mxu3 %v200_v59  ;;  %v690_v53 = vld [vmem:[%s9470_s1 + $0x13f0] sm:$0xff]  ;;  %v459_v57 = vld [vmem:[%s9470_s1 + $0xcb8] sm:$0xff] }
  0x5f   :  { %1383 = vmatpush.msra.mxu0 %v976_v60  ;;  %1406 = vmatpush.msra.mxu1 %v1088_v61  ;;  %v571_v58 = vld [vmem:[%s9470_s1 + $0x1038] sm:$0xff]  ;;  %v340_v60 = vld [vmem:[%s9470_s1 + $0x900] sm:$0xff] }
  0x60   :  { %1429 = vmatpush.msra.mxu2 %v81_v62  ;;  %1452 = vmatpush.msra.mxu3 %v193_v63  ;;  %v683_v59 = vld [vmem:[%s9470_s1 + $0x13b8] sm:$0xff]  ;;  %v452_v61 = vld [vmem:[%s9470_s1 + $0xc80] sm:$0xff] }
  0x61   :  { %1299 = vmatmul.f32.gmra.mxu0 %v4597_v1  ;;  %1407 = vmatpush.msra.mxu1 %v1081_v2  ;;  %v564_v62 = vld [vmem:[%s9470_s1 + $0x1000] sm:$0xff]  ;;  %v333_v2 = vld [vmem:[%s9470_s1 + $0x8c8] sm:$0xff] }
  0x62   :  { %1384 = vmatpush.msra.mxu0 %v969_v3  ;;  %1430 = vmatpush.msra.mxu2 %v74_v4  ;;  %v676_v63 = vld [vmem:[%s9470_s1 + $0x1380] sm:$0xff]  ;;  %v445_v3 = vld [vmem:[%s9470_s1 + $0xc48] sm:$0xff] }
  0x63   :  { %1453 = vmatpush.msra.mxu3 %v186_v7  ;;  %1322 = vmatmul.f32.gmra.mxu1 %v4614_v8  ;;  %v557_v4 = vld [vmem:[%s9470_s1 + $0xfc8] sm:$0xff] }
  0x64   :  { %1385 = vmatpush.msra.mxu0 %v962_v9  ;;  %1408 = vmatpush.msra.mxu1 %v1074_v10  ;;  %v669_v7 = vld [vmem:[%s9470_s1 + $0x1348] sm:$0xff]  ;;  %v326_v9 = vld [vmem:[%s9470_s1 + $0x890] sm:$0xff] }
  0x65   :  { %1431 = vmatpush.msra.mxu2 %v67_v12  ;;  %1454 = vmatpush.msra.mxu3 %v179_v13  ;;  %v438_v10 = vld [vmem:[%s9470_s1 + $0xc10] sm:$0xff] }
  0x66   :  { %1386 = vmatpush.msra.mxu0 %v955_v14  ;;  %1409 = vmatpush.msra.mxu1 %v1067_v15  ;;  %v550_v12 = vld [vmem:[%s9470_s1 + $0xf90] sm:$0xff]  ;;  %v319_v14 = vld [vmem:[%s9470_s1 + $0x858] sm:$0xff] }
  0x67   :  { %1432 = vmatpush.msra.mxu2 %v60_v16  ;;  %1455 = vmatpush.msra.mxu3 %v172_v17  ;;  %v662_v13 = vld [vmem:[%s9470_s1 + $0x1310] sm:$0xff]  ;;  %v431_v15 = vld [vmem:[%s9470_s1 + $0xbd8] sm:$0xff] }
  0x68   :  { %1345 = vmatmul.f32.gmra.mxu2 %v4645_v18  ;;  %1387 = vmatpush.msra.mxu0 %v948_v19  ;;  %v543_v16 = vld [vmem:[%s9470_s1 + $0xf58] sm:$0xff]  ;;  %v312_v19 = vld [vmem:[%s9470_s1 + $0x820] sm:$0xff] }
  0x69   :  { %1410 = vmatpush.msra.mxu1 %v1060_v21  ;;  %1433 = vmatpush.msra.mxu2 %v53_v22  ;;  %v655_v17 = vld [vmem:[%s9470_s1 + $0x12d8] sm:$0xff]  ;;  %v424_v21 = vld [vmem:[%s9470_s1 + $0xba0] sm:$0xff] }
  0x6a   :  { %1456 = vmatpush.msra.mxu3 %v165_v23  ;;  %1388 = vmatmul.f32.vlgmr.msra.gmra.mxu0 %v4662_v24  ;;  %v536_v22 = vld [vmem:[%s9470_s1 + $0xf20] sm:$0xff] }
  0x6b   :  { %1368 = vmatmul.f32.gmra.mxu3 %v4668_v27  ;;  %1464 = vmatpush.msrb.mxu0 %v382_v28  ;;  %v648_v23 = vld [vmem:[%s9470_s1 + $0x12a0] sm:$0xff]  ;;  %v305_v28 = vld [vmem:[%s9470_s1 + $0x7e8] sm:$0xff] }
  0x6c   :  { %1487 = vmatpush.msrb.mxu1 %v494_v29  ;;  %1510 = vmatpush.msrb.mxu2 %v606_v30  ;;  %v417_v29 = vld [vmem:[%s9470_s1 + $0xb68] sm:$0xff] }
  0x6d   :  { %1533 = vmatpush.msrb.mxu3 %v718_v32  ;;  %1411 = vmatmul.f32.vlgmr.msra.gmra.mxu1 %v4686_v33  ;;  %v529_v30 = vld [vmem:[%s9470_s1 + $0xee8] sm:$0xff] }
  0x6e   :  { %1465 = vmatpush.msrb.mxu0 %v375_v34  ;;  %1488 = vmatpush.msrb.mxu1 %v487_v35  ;;  %v641_v32 = vld [vmem:[%s9470_s1 + $0x1268] sm:$0xff]  ;;  %v298_v34 = vld [vmem:[%s9470_s1 + $0x7b0] sm:$0xff] }
  0x6f   :  { %1511 = vmatpush.msrb.mxu2 %v599_v36  ;;  %1534 = vmatpush.msrb.mxu3 %v711_v37  ;;  %v410_v35 = vld [vmem:[%s9470_s1 + $0xb30] sm:$0xff] }
  0x70   :  { %1466 = vmatpush.msrb.mxu0 %v368_v38  ;;  %1489 = vmatpush.msrb.mxu1 %v480_v39  ;;  %v522_v36 = vld [vmem:[%s9470_s1 + $0xeb0] sm:$0xff]  ;;  %v291_v38 = vld [vmem:[%s9470_s1 + $0x778] sm:$0xff] }
  0x71   :  { %1512 = vmatpush.msrb.mxu2 %v592_v40  ;;  %1535 = vmatpush.msrb.mxu3 %v704_v41  ;;  %v634_v37 = vld [vmem:[%s9470_s1 + $0x1230] sm:$0xff]  ;;  %v403_v39 = vld [vmem:[%s9470_s1 + $0xaf8] sm:$0xff] }
  0x72   :  { %1467 = vmatpush.msrb.mxu0 %v361_v42  ;;  %1490 = vmatpush.msrb.mxu1 %v473_v43  ;;  %v515_v40 = vld [vmem:[%s9470_s1 + $0xe78] sm:$0xff]  ;;  %v284_v42 = vld [vmem:[%s9470_s1 + $0x740] sm:$0xff] }
  0x73   :  { %1513 = vmatpush.msrb.mxu2 %v585_v45  ;;  %1536 = vmatpush.msrb.mxu3 %v697_v46  ;;  %v627_v41 = vld [vmem:[%s9470_s1 + $0x11f8] sm:$0xff]  ;;  %v396_v43 = vld [vmem:[%s9470_s1 + $0xac0] sm:$0xff] }
  0x74   :  { %1391 = vmatmul.f32.gmra.mxu0 %v4729_v47  ;;  %1491 = vmatpush.msrb.mxu1 %v466_v48  ;;  %v508_v45 = vld [vmem:[%s9470_s1 + $0xe40] sm:$0xff]  ;;  %v277_v48 = vld [vmem:[%s9470_s1 + $0x708] sm:$0xff] }
  0x75   :  { %1468 = vmatpush.msrb.mxu0 %v354_v51  ;;  %1514 = vmatpush.msrb.mxu2 %v578_v52  ;;  %v620_v46 = vld [vmem:[%s9470_s1 + $0x11c0] sm:$0xff]  ;;  %v389_v51 = vld [vmem:[%s9470_s1 + $0xa88] sm:$0xff] }
  0x76   :  { %1537 = vmatpush.msrb.mxu3 %v690_v53  ;;  %1414 = vmatmul.f32.gmra.mxu1 %v4746_v54  ;;  %v501_v52 = vld [vmem:[%s9470_s1 + $0xe08] sm:$0xff] }
  0x77   :  { %1469 = vmatpush.msrb.mxu0 %v347_v56  ;;  %1492 = vmatpush.msrb.mxu1 %v459_v57  ;;  %v613_v53 = vld [vmem:[%s9470_s1 + $0x1188] sm:$0xff]  ;;  %v830_v56 = vld [vmem:[%s9470_s1 + $0x1850] sm:$0xff] }
  0x78   :  { %1515 = vmatpush.msrb.mxu2 %v571_v58  ;;  %1538 = vmatpush.msrb.mxu3 %v683_v59  ;;  %v942_v57 = vld [vmem:[%s9470_s1 + $0x1bd0] sm:$0xff] }
  0x79   :  { %1470 = vmatpush.msrb.mxu0 %v340_v60  ;;  %1493 = vmatpush.msrb.mxu1 %v452_v61  ;;  %v1054_v58 = vld [vmem:[%s9470_s1 + $0x1f50] sm:$0xff]  ;;  %v823_v60 = vld [vmem:[%s9470_s1 + $0x1818] sm:$0xff] }
  0x7a   :  { %1516 = vmatpush.msrb.mxu2 %v564_v62  ;;  %1539 = vmatpush.msrb.mxu3 %v676_v63  ;;  %v1166_v59 = vld [vmem:[%s9470_s1 + $0x22d0] sm:$0xff]  ;;  %v935_v61 = vld [vmem:[%s9470_s1 + $0x1b98] sm:$0xff]  ;;  %v928_v63 = vld [vmem:[%s9470_s1 + $0x1b60] sm:$0xff] }
  0x7b   :  { %1471 = vmatpush.msrb.mxu0 %v333_v2  ;;  %1494 = vmatpush.msrb.mxu1 %v445_v3  ;;  %v1047_v62 = vld [vmem:[%s9470_s1 + $0x1f18] sm:$0xff]  ;;  %v1040_v2 = vld [vmem:[%s9470_s1 + $0x1ee0] sm:$0xff] }
  0x7c   :  { %1517 = vmatpush.msrb.mxu2 %v557_v4  ;;  %1540 = vmatpush.msrb.mxu3 %v669_v7  ;;  %v1152_v3 = vld [vmem:[%s9470_s1 + $0x2260] sm:$0xff]  ;;  %v809_v4 = vld [vmem:[%s9470_s1 + $0x17a8] sm:$0xff] }
  0x7d   :  { %1472 = vmatpush.msrb.mxu0 %v326_v9  ;;  %1495 = vmatpush.msrb.mxu1 %v438_v10  ;;  %v921_v7 = vld [vmem:[%s9470_s1 + $0x1b28] sm:$0xff] }
  0x7e   :  { %1518 = vmatpush.msrb.mxu2 %v550_v12  ;;  %1541 = vmatpush.msrb.mxu3 %v662_v13  ;;  %v1033_v9 = vld [vmem:[%s9470_s1 + $0x1ea8] sm:$0xff]  ;;  %v802_v12 = vld [vmem:[%s9470_s1 + $0x1770] sm:$0xff] }
  0x7f   :  { %1473 = vmatpush.msrb.mxu0 %v319_v14  ;;  %1496 = vmatpush.msrb.mxu1 %v431_v15  ;;  %v1145_v10 = vld [vmem:[%s9470_s1 + $0x2228] sm:$0xff]  ;;  %v914_v13 = vld [vmem:[%s9470_s1 + $0x1af0] sm:$0xff] }
  0x80   :  { %1519 = vmatpush.msrb.mxu2 %v543_v16  ;;  %1542 = vmatpush.msrb.mxu3 %v655_v17  ;;  %v1026_v14 = vld [vmem:[%s9470_s1 + $0x1e70] sm:$0xff]  ;;  %v795_v16 = vld [vmem:[%s9470_s1 + $0x1738] sm:$0xff] }
  0x81   :  { %1474 = vmatpush.msrb.mxu0 %v312_v19  ;;  %1497 = vmatpush.msrb.mxu1 %v424_v21  ;;  %v1138_v15 = vld [vmem:[%s9470_s1 + $0x21f0] sm:$0xff]  ;;  %v907_v17 = vld [vmem:[%s9470_s1 + $0x1ab8] sm:$0xff] }
  0x82   :  { %1520 = vmatpush.msrb.mxu2 %v536_v22  ;;  %1543 = vmatpush.msrb.mxu3 %v648_v23  ;;  %v1019_v19 = vld [vmem:[%s9470_s1 + $0x1e38] sm:$0xff]  ;;  %v788_v22 = vld [vmem:[%s9470_s1 + $0x1700] sm:$0xff] }
  0x83   :  { %1475 = vmatpush.msrb.mxu0 %v305_v28  ;;  %1498 = vmatpush.msrb.mxu1 %v417_v29  ;;  %v1131_v21 = vld [vmem:[%s9470_s1 + $0x21b8] sm:$0xff]  ;;  %v900_v23 = vld [vmem:[%s9470_s1 + $0x1a80] sm:$0xff] }
  0x84   :  { %1521 = vmatpush.msrb.mxu2 %v529_v30  ;;  %1544 = vmatpush.msrb.mxu3 %v641_v32  ;;  %v1012_v28 = vld [vmem:[%s9470_s1 + $0x1e00] sm:$0xff]  ;;  %v781_v30 = vld [vmem:[%s9470_s1 + $0x16c8] sm:$0xff] }
  0x85   :  { %1476 = vmatpush.msrb.mxu0 %v298_v34  ;;  %1499 = vmatpush.msrb.mxu1 %v410_v35  ;;  %v1124_v29 = vld [vmem:[%s9470_s1 + $0x2180] sm:$0xff]  ;;  %v893_v32 = vld [vmem:[%s9470_s1 + $0x1a48] sm:$0xff] }
  0x86   :  { %1522 = vmatpush.msrb.mxu2 %v522_v36  ;;  %1545 = vmatpush.msrb.mxu3 %v634_v37  ;;  %v1005_v34 = vld [vmem:[%s9470_s1 + $0x1dc8] sm:$0xff]  ;;  %v774_v36 = vld [vmem:[%s9470_s1 + $0x1690] sm:$0xff] }
  0x87   :  { %1477 = vmatpush.msrb.mxu0 %v291_v38  ;;  %1500 = vmatpush.msrb.mxu1 %v403_v39  ;;  %v1117_v35 = vld [vmem:[%s9470_s1 + $0x2148] sm:$0xff]  ;;  %v886_v37 = vld [vmem:[%s9470_s1 + $0x1a10] sm:$0xff] }
  0x88   :  { %1523 = vmatpush.msrb.mxu2 %v515_v40  ;;  %1546 = vmatpush.msrb.mxu3 %v627_v41  ;;  %v998_v38 = vld [vmem:[%s9470_s1 + $0x1d90] sm:$0xff]  ;;  %v879_v40 = vld [vmem:[%s9470_s1 + $0x19d8] sm:$0xff] }
  0x89   :  { %1478 = vmatpush.msrb.mxu0 %v284_v42  ;;  %1501 = vmatpush.msrb.mxu1 %v396_v43  ;;  %v1110_v39 = vld [vmem:[%s9470_s1 + $0x2110] sm:$0xff]  ;;  %v991_v41 = vld [vmem:[%s9470_s1 + $0x1d58] sm:$0xff]  ;;  %v760_v43 = vld [vmem:[%s9470_s1 + $0x1620] sm:$0xff] }
  0x8a   :  { %1524 = vmatpush.msrb.mxu2 %v508_v45  ;;  %1547 = vmatpush.msrb.mxu3 %v620_v46  ;;  %v1103_v42 = vld [vmem:[%s9470_s1 + $0x20d8] sm:$0xff]  ;;  %v872_v45 = vld [vmem:[%s9470_s1 + $0x19a0] sm:$0xff] }
  0x8b   :  { %1479 = vmatpush.msrb.mxu0 %v277_v48  ;;  %1502 = vmatpush.msrb.mxu1 %v389_v51  ;;  %v1096_v46 = vld [vmem:[%s9470_s1 + $0x20a0] sm:$0xff]  ;;  %v753_v48 = vld [vmem:[%s9470_s1 + $0x15e8] sm:$0xff] }
  0x8c   :  { %1525 = vmatpush.msrb.mxu2 %v501_v52  ;;  %1548 = vmatpush.msrb.mxu3 %v613_v53  ;;  %v865_v51 = vld [vmem:[%s9470_s1 + $0x1968] sm:$0xff] }
  0x8d   :  { %1434 = vmatmul.f32.vlgmr.msra.gmra.mxu2 %v4338_v49  ;;  %1457 = vmatmul.f32.vlgmr.msra.gmra.mxu3 %v4362_v55  ;;  %v1159_v49 = vld [vmem:[%s9470_s1 + $0x2298] sm:$0xff]  ;;  %v816_v55 = vld [vmem:[%s9470_s1 + $0x17e0] sm:$0xff]  ;;  %v977_v52 = vld [vmem:[%s9470_s1 + $0x1ce8] sm:$0xff] }
  0x8e   :  { %1556 = vmatpush.msra.mxu0 %v830_v56  ;;  %1579 = vmatpush.msra.mxu1 %v942_v57  ;;  %v1089_v53 = vld [vmem:[%s9470_s1 + $0x2068] sm:$0xff]  ;;  %v746_v56 = vld [vmem:[%s9470_s1 + $0x15b0] sm:$0xff] }
  0x8f   :  { %1602 = vmatpush.msra.mxu2 %v1054_v58  ;;  %1625 = vmatpush.msra.mxu3 %v1166_v59  ;;  %v858_v57 = vld [vmem:[%s9470_s1 + $0x1930] sm:$0xff]  ;;  %v739_v59 = vld [vmem:[%s9470_s1 + $0x1578] sm:$0xff] }
  0x90   :  { %1557 = vmatpush.msra.mxu0 %v823_v60  ;;  %1580 = vmatpush.msra.mxu1 %v935_v61  ;;  %v970_v58 = vld [vmem:[%s9470_s1 + $0x1cb0] sm:$0xff]  ;;  %v851_v60 = vld [vmem:[%s9470_s1 + $0x18f8] sm:$0xff] }
  0x91   :  { %1603 = vmatpush.msra.mxu2 %v1047_v62  ;;  %1626 = vmatpush.msra.mxu3 %v1159_v49  ;;  %v1075_v61 = vld [vmem:[%s9470_s1 + $0x1ff8] sm:$0xff]  ;;  %v844_v62 = vld [vmem:[%s9470_s1 + $0x18c0] sm:$0xff] }
  0x92   :  { %1558 = vmatpush.msra.mxu0 %v816_v55  ;;  %1581 = vmatpush.msra.mxu1 %v928_v63  ;;  %v956_v49 = vld [vmem:[%s9470_s1 + $0x1c40] sm:$0xff]  ;;  %v837_v63 = vld [vmem:[%s9470_s1 + $0x1888] sm:$0xff] }
  0x93   :  { %1604 = vmatpush.msra.mxu2 %v1040_v2  ;;  %1627 = vmatpush.msra.mxu3 %v1152_v3  ;;  %v1068_v55 = vld [vmem:[%s9470_s1 + $0x1fc0] sm:$0xff]  ;;  %v949_v2 = vld [vmem:[%s9470_s1 + $0x1c08] sm:$0xff] }
  0x94   :  { %1559 = vmatpush.msra.mxu0 %v809_v4  ;;  %1582 = vmatpush.msra.mxu1 %v921_v7  ;;  %v1061_v3 = vld [vmem:[%s9470_s1 + $0x1f88] sm:$0xff]  ;;  %v159_v4 = vld [vmem:[%s9470_s1 + $0x358] sm:$0xff] }
  0x95   :  { %1605 = vmatpush.msra.mxu2 %v1033_v9  ;;  %1628 = vmatpush.msra.mxu3 %v1145_v10  ;;  %v271_v7 = vld [vmem:[%s9470_s1 + $0x6d8] sm:$0xff]  ;;  %v152_v10 = vld [vmem:[%s9470_s1 + $0x320] sm:$0xff] }
  0x96   :  { %1560 = vmatpush.msra.mxu0 %v802_v12  ;;  %1583 = vmatpush.msra.mxu1 %v914_v13  ;;  %v383_v9 = vld [vmem:[%s9470_s1 + $0xa58] sm:$0xff]  ;;  %v264_v12 = vld [vmem:[%s9470_s1 + $0x6a0] sm:$0xff] }
  0x97   :  { %1606 = vmatpush.msra.mxu2 %v1026_v14  ;;  %1629 = vmatpush.msra.mxu3 %v1138_v15  ;;  %v488_v13 = vld [vmem:[%s9470_s1 + $0xda0] sm:$0xff]  ;;  %v257_v14 = vld [vmem:[%s9470_s1 + $0x668] sm:$0xff] }
  0x98   :  { %1561 = vmatpush.msra.mxu0 %v795_v16  ;;  %1584 = vmatpush.msra.mxu1 %v907_v17  ;;  %v369_v15 = vld [vmem:[%s9470_s1 + $0x9e8] sm:$0xff]  ;;  %v250_v17 = vld [vmem:[%s9470_s1 + $0x630] sm:$0xff] }
  0x99   :  { %1607 = vmatpush.msra.mxu2 %v1019_v19  ;;  %1630 = vmatpush.msra.mxu3 %v1131_v21  ;;  %v481_v16 = vld [vmem:[%s9470_s1 + $0xd68] sm:$0xff]  ;;  %v362_v19 = vld [vmem:[%s9470_s1 + $0x9b0] sm:$0xff] }
  0x9a   :  { %1562 = vmatpush.msra.mxu0 %v788_v22  ;;  %1585 = vmatpush.msra.mxu1 %v900_v23  ;;  %v474_v21 = vld [vmem:[%s9470_s1 + $0xd30] sm:$0xff]  ;;  %v131_v22 = vld [vmem:[%s9470_s1 + $0x278] sm:$0xff] }
  0x9b   :  { %1608 = vmatpush.msra.mxu2 %v1012_v28  ;;  %1631 = vmatpush.msra.mxu3 %v1124_v29  ;;  %v243_v23 = vld [vmem:[%s9470_s1 + $0x5f8] sm:$0xff]  ;;  %v124_v29 = vld [vmem:[%s9470_s1 + $0x240] sm:$0xff] }
  0x9c   :  { %1437 = vmatmul.f32.gmra.mxu2 %v4410_v5  ;;  %1563 = vmatpush.msra.mxu0 %v781_v30  ;;  %v767_v5 = vld [vmem:[%s9470_s1 + $0x1658] sm:$0xff]  ;;  %v236_v30 = vld [vmem:[%s9470_s1 + $0x5c0] sm:$0xff] }
  0x9d   :  { %1586 = vmatpush.msra.mxu1 %v893_v32  ;;  %1609 = vmatpush.msra.mxu2 %v1005_v34  ;;  %v355_v28 = vld [vmem:[%s9470_s1 + $0x978] sm:$0xff]  ;;  %v460_v32 = vld [vmem:[%s9470_s1 + $0xcc0] sm:$0xff]  ;;  %v229_v34 = vld [vmem:[%s9470_s1 + $0x588] sm:$0xff] }
  0x9e   :  { %1632 = vmatpush.msra.mxu3 %v1117_v35  ;;  %1564 = vmatpush.msra.mxu0 %v774_v36  ;;  %v341_v35 = vld [vmem:[%s9470_s1 + $0x908] sm:$0xff] }
  0x9f   :  { %1460 = vmatmul.f32.gmra.mxu3 %v4434_v11  ;;  %1587 = vmatpush.msra.mxu1 %v886_v37  ;;  %v984_v11 = vld [vmem:[%s9470_s1 + $0x1d20] sm:$0xff]  ;;  %v453_v36 = vld [vmem:[%s9470_s1 + $0xc88] sm:$0xff]  ;;  %v222_v37 = vld [vmem:[%s9470_s1 + $0x550] sm:$0xff] }
  0xa0   :  { %1610 = vmatpush.msra.mxu2 %v998_v38  ;;  %1633 = vmatpush.msra.mxu3 %v1110_v39  ;;  %v334_v38 = vld [vmem:[%s9470_s1 + $0x8d0] sm:$0xff] }
  0xa1   :  { %1565 = vmatpush.msra.mxu0 %v767_v5  ;;  %1588 = vmatpush.msra.mxu1 %v879_v40  ;;  %v446_v39 = vld [vmem:[%s9470_s1 + $0xc50] sm:$0xff]  ;;  %v103_v5 = vld [vmem:[%s9470_s1 + $0x198] sm:$0xff] }
  0xa2   :  { %1611 = vmatpush.msra.mxu2 %v991_v41  ;;  %1634 = vmatpush.msra.mxu3 %v1103_v42  ;;  %v215_v40 = vld [vmem:[%s9470_s1 + $0x518] sm:$0xff] }
  0xa3   :  { %1566 = vmatpush.msra.mxu0 %v760_v43  ;;  %1589 = vmatpush.msra.mxu1 %v872_v45  ;;  %v327_v41 = vld [vmem:[%s9470_s1 + $0x898] sm:$0xff]  ;;  %v96_v43 = vld [vmem:[%s9470_s1 + $0x160] sm:$0xff] }
  0xa4   :  { %1612 = vmatpush.msra.mxu2 %v984_v11  ;;  %1635 = vmatpush.msra.mxu3 %v1096_v46  ;;  %v439_v42 = vld [vmem:[%s9470_s1 + $0xc18] sm:$0xff]  ;;  %v208_v45 = vld [vmem:[%s9470_s1 + $0x4e0] sm:$0xff] }
  0xa5   :  { %1526 = vmatmul.f32.vlgmr.msrb.gmra.mxu2 %v4482_v25  ;;  %1567 = vmatpush.msra.mxu0 %v753_v48  ;;  %v1082_v25 = vld [vmem:[%s9470_s1 + $0x2030] sm:$0xff]  ;;  %v320_v11 = vld [vmem:[%s9470_s1 + $0x860] sm:$0xff]  ;;  %v89_v48 = vld [vmem:[%s9470_s1 + $0x128] sm:$0xff] }
  0xa6   :  { %1590 = vmatpush.msra.mxu1 %v865_v51  ;;  %1613 = vmatpush.msra.mxu2 %v977_v52  ;;  %v432_v46 = vld [vmem:[%s9470_s1 + $0xbe0] sm:$0xff]  ;;  %v201_v51 = vld [vmem:[%s9470_s1 + $0x4a8] sm:$0xff] }
  0xa7   :  { %1636 = vmatpush.msra.mxu3 %v1089_v53  ;;  %1480 = vmatmul.f32.vlgmr.msrb.gmra.mxu0 %v4321_v44  ;;  %v963_v44 = vld [vmem:[%s9470_s1 + $0x1c78] sm:$0xff]  ;;  %v313_v52 = vld [vmem:[%s9470_s1 + $0x828] sm:$0xff] }
  0xa8   :  { %1549 = vmatmul.f32.vlgmr.msrb.gmra.mxu3 %v4506_v31  ;;  %1568 = vmatpush.msra.mxu0 %v746_v56  ;;  %v732_v31 = vld [vmem:[%s9470_s1 + $0x1540] sm:$0xff]  ;;  %v425_v53 = vld [vmem:[%s9470_s1 + $0xba8] sm:$0xff]  ;;  %v82_v56 = vld [vmem:[%s9470_s1 + $0xf0] sm:$0xff] }
  0xa9   :  { %1591 = vmatpush.msra.mxu1 %v858_v57  ;;  %1614 = vmatpush.msra.mxu2 %v970_v58  ;;  %v194_v57 = vld [vmem:[%s9470_s1 + $0x470] sm:$0xff] }
  0xaa   :  { %1637 = vmatpush.msra.mxu3 %v1082_v25  ;;  %1503 = vmatmul.f32.vlgmr.msrb.gmra.mxu1 %v4344_v50  ;;  %v725_v50 = vld [vmem:[%s9470_s1 + $0x1508] sm:$0xff]  ;;  %v306_v58 = vld [vmem:[%s9470_s1 + $0x7f0] sm:$0xff] }
  0xab   :  { %1569 = vmatpush.msra.mxu0 %v739_v59  ;;  %1592 = vmatpush.msra.mxu1 %v851_v60  ;;  %v418_v25 = vld [vmem:[%s9470_s1 + $0xb70] sm:$0xff]  ;;  %v75_v59 = vld [vmem:[%s9470_s1 + $0xb8] sm:$0xff] }
  0xac   :  { %1615 = vmatpush.msra.mxu2 %v963_v44  ;;  %1638 = vmatpush.msra.mxu3 %v1075_v61  ;;  %v187_v60 = vld [vmem:[%s9470_s1 + $0x438] sm:$0xff] }
  0xad   :  { %1570 = vmatpush.msra.mxu0 %v732_v31  ;;  %1593 = vmatpush.msra.mxu1 %v844_v62  ;;  %v299_v44 = vld [vmem:[%s9470_s1 + $0x7b8] sm:$0xff]  ;;  %v68_v31 = vld [vmem:[%s9470_s1 + $0x80] sm:$0xff] }
  0xae   :  { %1616 = vmatpush.msra.mxu2 %v956_v49  ;;  %1639 = vmatpush.msra.mxu3 %v1068_v55  ;;  %v411_v61 = vld [vmem:[%s9470_s1 + $0xb38] sm:$0xff]  ;;  %v180_v62 = vld [vmem:[%s9470_s1 + $0x400] sm:$0xff] }
  0xaf   :  { %1529 = vmatmul.f32.gmra.mxu2 %v4597_v1  ;;  %1571 = vmatpush.msra.mxu0 %v725_v50  ;;  %v495_v1 = vld [vmem:[%s9470_s1 + $0xdd8] sm:$0xff]  ;;  %v292_v49 = vld [vmem:[%s9470_s1 + $0x780] sm:$0xff]  ;;  %v61_v50 = vld [vmem:[%s9470_s1 + $0x48] sm:$0xff] }
  0xb0   :  { %1594 = vmatpush.msra.mxu1 %v837_v63  ;;  %1617 = vmatpush.msra.mxu2 %v949_v2  ;;  %v404_v55 = vld [vmem:[%s9470_s1 + $0xb00] sm:$0xff]  ;;  %v173_v63 = vld [vmem:[%s9470_s1 + $0x3c8] sm:$0xff] }
  0xb1   :  { %1640 = vmatpush.msra.mxu3 %v1061_v3  ;;  %1483 = vmatmul.f32.gmra.mxu0 %v4393_v0  ;;  %v376_v0 = vld [vmem:[%s9470_s1 + $0xa20] sm:$0xff]  ;;  %v285_v2 = vld [vmem:[%s9470_s1 + $0x748] sm:$0xff] }
  0xb2   :  { %1552 = vmatmul.f32.gmra.mxu3 %v4614_v8  ;;  %1648 = vmatpush.msrb.mxu0 %v159_v4  ;;  %v145_v8 = vld [vmem:[%s9470_s1 + $0x2e8] sm:$0xff]  ;;  %v54_v4 = vld [vmem:[%s9470_s1 + $0x10] sm:$0xff] }
  0xb3   :  { %1671 = vmatpush.msrb.mxu1 %v271_v7  ;;  %1694 = vmatpush.msrb.mxu2 %v383_v9  ;;  %v397_v3 = vld [vmem:[%s9470_s1 + $0xac8] sm:$0xff]  ;;  %v166_v7 = vld [vmem:[%s9470_s1 + $0x390] sm:$0xff] }
  0xb4   :  { %1717 = vmatpush.msrb.mxu3 %v495_v1  ;;  %1506 = vmatmul.f32.gmra.mxu1 %v4416_v6  ;;  %v138_v6 = vld [vmem:[%s9470_s1 + $0x2b0] sm:$0xff] }
  0xb5   :  { %1649 = vmatpush.msrb.mxu0 %v152_v10  ;;  %1672 = vmatpush.msrb.mxu1 %v264_v12  ;;  %v278_v9 = vld [vmem:[%s9470_s1 + $0x710] sm:$0xff]  ;;  %v607_v10 = vld [vmem:[%s9470_s1 + $0x1158] sm:$0xff] }
  0xb6   :  { %1695 = vmatpush.msrb.mxu2 %v376_v0  ;;  %1718 = vmatpush.msrb.mxu3 %v488_v13  ;;  %v390_v1 = vld [vmem:[%s9470_s1 + $0xa90] sm:$0xff]  ;;  %v719_v12 = vld [vmem:[%s9470_s1 + $0x14d8] sm:$0xff]  ;;  %v600_v13 = vld [vmem:[%s9470_s1 + $0x1120] sm:$0xff] }
  0xb7   :  { %1650 = vmatpush.msrb.mxu0 %v145_v8  ;;  %1673 = vmatpush.msrb.mxu1 %v257_v14  ;;  %v831_v0 = vld [vmem:[%s9470_s1 + $0x1858] sm:$0xff]  ;;  %v712_v8 = vld [vmem:[%s9470_s1 + $0x14a0] sm:$0xff] }
  0xb8   :  { %1696 = vmatpush.msrb.mxu2 %v369_v15  ;;  %1719 = vmatpush.msrb.mxu3 %v481_v16  ;;  %v936_v14 = vld [vmem:[%s9470_s1 + $0x1ba0] sm:$0xff]  ;;  %v705_v15 = vld [vmem:[%s9470_s1 + $0x1468] sm:$0xff] }
  0xb9   :  { %1618 = vmatmul.f32.vlgmr.msra.gmra.mxu2 %v4662_v24  ;;  %1651 = vmatpush.msrb.mxu0 %v138_v6  ;;  %v467_v24 = vld [vmem:[%s9470_s1 + $0xcf8] sm:$0xff]  ;;  %v817_v16 = vld [vmem:[%s9470_s1 + $0x17e8] sm:$0xff] }
  0xba   :  { %1674 = vmatpush.msrb.mxu1 %v250_v17  ;;  %1697 = vmatpush.msrb.mxu2 %v362_v19  ;;  %v929_v6 = vld [vmem:[%s9470_s1 + $0x1b68] sm:$0xff]  ;;  %v698_v17 = vld [vmem:[%s9470_s1 + $0x1430] sm:$0xff] }
  0xbb   :  { %1720 = vmatpush.msrb.mxu3 %v474_v21  ;;  %1572 = vmatmul.f32.vlgmr.msra.gmra.mxu0 %v4465_v20  ;;  %v348_v20 = vld [vmem:[%s9470_s1 + $0x940] sm:$0xff]  ;;  %v810_v19 = vld [vmem:[%s9470_s1 + $0x17b0] sm:$0xff] }
  0xbc   :  { %1641 = vmatmul.f32.vlgmr.msra.gmra.mxu3 %v4686_v33  ;;  %1652 = vmatpush.msrb.mxu0 %v131_v22  ;;  %v117_v33 = vld [vmem:[%s9470_s1 + $0x208] sm:$0xff]  ;;  %v922_v21 = vld [vmem:[%s9470_s1 + $0x1b30] sm:$0xff]  ;;  %v579_v22 = vld [vmem:[%s9470_s1 + $0x1078] sm:$0xff] }
  0xbd   :  { %1675 = vmatpush.msrb.mxu1 %v243_v23  ;;  %1698 = vmatpush.msrb.mxu2 %v355_v28  ;;  %v691_v23 = vld [vmem:[%s9470_s1 + $0x13f8] sm:$0xff] }
  0xbe   :  { %1721 = vmatpush.msrb.mxu3 %v467_v24  ;;  %1595 = vmatmul.f32.vlgmr.msra.gmra.mxu1 %v4488_v26  ;;  %v110_v26 = vld [vmem:[%s9470_s1 + $0x1d0] sm:$0xff]  ;;  %v803_v28 = vld [vmem:[%s9470_s1 + $0x1778] sm:$0xff] }
  0xbf   :  { %1653 = vmatpush.msrb.mxu0 %v124_v29  ;;  %1676 = vmatpush.msrb.mxu1 %v236_v30  ;;  %v915_v24 = vld [vmem:[%s9470_s1 + $0x1af8] sm:$0xff]  ;;  %v572_v29 = vld [vmem:[%s9470_s1 + $0x1040] sm:$0xff] }
  0xc0   :  { %1699 = vmatpush.msrb.mxu2 %v348_v20  ;;  %1722 = vmatpush.msrb.mxu3 %v460_v32  ;;  %v684_v30 = vld [vmem:[%s9470_s1 + $0x13c0] sm:$0xff] }
  0xc1   :  { %1654 = vmatpush.msrb.mxu0 %v117_v33  ;;  %1677 = vmatpush.msrb.mxu1 %v229_v34  ;;  %v796_v20 = vld [vmem:[%s9470_s1 + $0x1740] sm:$0xff]  ;;  %v565_v33 = vld [vmem:[%s9470_s1 + $0x1008] sm:$0xff] }
  0xc2   :  { %1700 = vmatpush.msrb.mxu2 %v341_v35  ;;  %1723 = vmatpush.msrb.mxu3 %v453_v36  ;;  %v908_v32 = vld [vmem:[%s9470_s1 + $0x1ac0] sm:$0xff]  ;;  %v677_v34 = vld [vmem:[%s9470_s1 + $0x1388] sm:$0xff] }
  0xc3   :  { %1655 = vmatpush.msrb.mxu0 %v110_v26  ;;  %1678 = vmatpush.msrb.mxu1 %v222_v37  ;;  %v789_v35 = vld [vmem:[%s9470_s1 + $0x1708] sm:$0xff]  ;;  %v558_v26 = vld [vmem:[%s9470_s1 + $0xfd0] sm:$0xff] }
  0xc4   :  { %1701 = vmatpush.msrb.mxu2 %v334_v38  ;;  %1724 = vmatpush.msrb.mxu3 %v446_v39  ;;  %v901_v36 = vld [vmem:[%s9470_s1 + $0x1a88] sm:$0xff]  ;;  %v670_v37 = vld [vmem:[%s9470_s1 + $0x1350] sm:$0xff] }
  0xc5   :  { %1656 = vmatpush.msrb.mxu0 %v103_v5  ;;  %1679 = vmatpush.msrb.mxu1 %v215_v40  ;;  %v782_v38 = vld [vmem:[%s9470_s1 + $0x16d0] sm:$0xff]  ;;  %v551_v5 = vld [vmem:[%s9470_s1 + $0xf98] sm:$0xff] }
  0xc6   :  { %1702 = vmatpush.msrb.mxu2 %v327_v41  ;;  %1725 = vmatpush.msrb.mxu3 %v439_v42  ;;  %v894_v39 = vld [vmem:[%s9470_s1 + $0x1a50] sm:$0xff]  ;;  %v663_v40 = vld [vmem:[%s9470_s1 + $0x1318] sm:$0xff] }
  0xc7   :  { %1657 = vmatpush.msrb.mxu0 %v96_v43  ;;  %1680 = vmatpush.msrb.mxu1 %v208_v45  ;;  %v775_v41 = vld [vmem:[%s9470_s1 + $0x1698] sm:$0xff]  ;;  %v544_v43 = vld [vmem:[%s9470_s1 + $0xf60] sm:$0xff] }
  0xc8   :  { %1703 = vmatpush.msrb.mxu2 %v320_v11  ;;  %1726 = vmatpush.msrb.mxu3 %v432_v46  ;;  %v887_v42 = vld [vmem:[%s9470_s1 + $0x1a18] sm:$0xff]  ;;  %v656_v45 = vld [vmem:[%s9470_s1 + $0x12e0] sm:$0xff] }
  0xc9   :  { %1658 = vmatpush.msrb.mxu0 %v89_v48  ;;  %1681 = vmatpush.msrb.mxu1 %v201_v51  ;;  %v768_v11 = vld [vmem:[%s9470_s1 + $0x1660] sm:$0xff]  ;;  %v537_v48 = vld [vmem:[%s9470_s1 + $0xf28] sm:$0xff] }
  0xca   :  { %1704 = vmatpush.msrb.mxu2 %v313_v52  ;;  %1727 = vmatpush.msrb.mxu3 %v425_v53  ;;  %v880_v46 = vld [vmem:[%s9470_s1 + $0x19e0] sm:$0xff]  ;;  %v649_v51 = vld [vmem:[%s9470_s1 + $0x12a8] sm:$0xff] }
  0xcb   :  { %1659 = vmatpush.msrb.mxu0 %v82_v56  ;;  %1682 = vmatpush.msrb.mxu1 %v194_v57  ;;  %v761_v52 = vld [vmem:[%s9470_s1 + $0x1628] sm:$0xff]  ;;  %v530_v56 = vld [vmem:[%s9470_s1 + $0xef0] sm:$0xff] }
  0xcc   :  { %1705 = vmatpush.msrb.mxu2 %v306_v58  ;;  %1728 = vmatpush.msrb.mxu3 %v418_v25  ;;  %v873_v53 = vld [vmem:[%s9470_s1 + $0x19a8] sm:$0xff]  ;;  %v642_v57 = vld [vmem:[%s9470_s1 + $0x1270] sm:$0xff] }
  0xcd   :  { %1660 = vmatpush.msrb.mxu0 %v75_v59  ;;  %1683 = vmatpush.msrb.mxu1 %v187_v60  ;;  %v754_v58 = vld [vmem:[%s9470_s1 + $0x15f0] sm:$0xff]  ;;  %v523_v60 = vld [vmem:[%s9470_s1 + $0xeb8] sm:$0xff] }
  0xce   :  { %1706 = vmatpush.msrb.mxu2 %v299_v44  ;;  %1729 = vmatpush.msrb.mxu3 %v411_v61  ;;  %v866_v25 = vld [vmem:[%s9470_s1 + $0x1970] sm:$0xff]  ;;  %v635_v44 = vld [vmem:[%s9470_s1 + $0x1238] sm:$0xff] }
  0xcf   :  { %1661 = vmatpush.msrb.mxu0 %v68_v31  ;;  %1684 = vmatpush.msrb.mxu1 %v180_v62  ;;  %v5433_v59 = vld [vmem:[%s9471_s0 + $0x10] sm:$0xff]  ;;  %v747_v61 = vld [vmem:[%s9470_s1 + $0x15b8] sm:$0xff]  ;;  %v5448_v31 = vld [vmem:[%s9471_s0] sm:$0xff] }
  0xd0   :  { %1707 = vmatpush.msrb.mxu2 %v292_v49  ;;  %1730 = vmatpush.msrb.mxu3 %v404_v55  ;;  %v859_v62 = vld [vmem:[%s9470_s1 + $0x1938] sm:$0xff]  ;;  %v516_v55 = vld [vmem:[%s9470_s1 + $0xe80] sm:$0xff] }
  0xd1   :  { %1662 = vmatpush.msrb.mxu0 %v61_v50  ;;  %1685 = vmatpush.msrb.mxu1 %v173_v63  ;;  %v5457_v49 = vld [vmem:[%s9471_s0 + $0x18] sm:$0xff]  ;;  %v628_v50 = vld [vmem:[%s9470_s1 + $0x1200] sm:$0xff] }
  0xd2   :  { %1708 = vmatpush.msrb.mxu2 %v285_v2  ;;  %1731 = vmatpush.msrb.mxu3 %v397_v3  ;;  %v740_v63 = vld [vmem:[%s9470_s1 + $0x1580] sm:$0xff]  ;;  %v5475_v3 = vld [vmem:[%s9471_s0 + $0x8] sm:$0xff] }
  0xd3   :  { %1621 = vmatmul.f32.gmra.mxu2 %v4729_v47  ;;  %1663 = vmatpush.msrb.mxu0 %v54_v4  ;;  %v943_v47 = vld [vmem:[%s9470_s1 + $0x1bd8] sm:$0xff]  ;;  %v852_v2 = vld [vmem:[%s9470_s1 + $0x1900] sm:$0xff]  ;;  %v509_v4 = vld [vmem:[%s9470_s1 + $0xe48] sm:$0xff] }
  0xd4   :  { %1686 = vmatpush.msrb.mxu1 %v166_v7  ;;  %1709 = vmatpush.msrb.mxu2 %v278_v9  ;;  %v621_v7 = vld [vmem:[%s9470_s1 + $0x11c8] sm:$0xff] }
  0xd5   :  { %1732 = vmatpush.msrb.mxu3 %v390_v1  ;;  %1575 = vmatmul.f32.gmra.mxu0 %v4645_v18  ;;  %v824_v18 = vld [vmem:[%s9470_s1 + $0x1820] sm:$0xff]  ;;  %v733_v9 = vld [vmem:[%s9470_s1 + $0x1548] sm:$0xff] }
  0xd6   :  { %1644 = vmatmul.f32.gmra.mxu3 %v4746_v54  ;;  %1740 = vmatpush.msra.mxu0 %v607_v10  ;;  %v593_v54 = vld [vmem:[%s9470_s1 + $0x10e8] sm:$0xff]  ;;  %v502_v10 = vld [vmem:[%s9470_s1 + $0xe10] sm:$0xff] }
  0xd7   :  { %1763 = vmatpush.msra.mxu1 %v719_v12  ;;  %1786 = vmatpush.msra.mxu2 %v831_v0  ;;  %v845_v1 = vld [vmem:[%s9470_s1 + $0x18c8] sm:$0xff]  ;;  %v614_v12 = vld [vmem:[%s9470_s1 + $0x1190] sm:$0xff] }
  0xd8   :  { %1809 = vmatpush.msra.mxu3 %v943_v47  ;;  %1598 = vmatmul.f32.gmra.mxu1 %v4668_v27  ;;  %v586_v27 = vld [vmem:[%s9470_s1 + $0x10b0] sm:$0xff] }
  0xd9   :  { %1741 = vmatpush.msra.mxu0 %v600_v13  ;;  %1764 = vmatpush.msra.mxu1 %v712_v8  ;;  %v726_v0 = vld [vmem:[%s9470_s1 + $0x1510] sm:$0xff]  ;;  %v5505_v13 = vld [vmem:[%s9471_s0 + $0x60] sm:$0xff]  ;;  %v1055_v8 = vld [vmem:[%s9470_s1 + $0x1f58] sm:$0xff] }
  0xda   :  { %1787 = vmatpush.msra.mxu2 %v824_v18  ;;  %1810 = vmatpush.msra.mxu3 %v936_v14  ;;  %v838_v47 = vld [vmem:[%s9470_s1 + $0x1890] sm:$0xff]  ;;  %v1167_v18 = vld [vmem:[%s9470_s1 + $0x22d8] sm:$0xff]  ;;  %v160_v14 = vld [vmem:[%s9470_s1 + $0x360] sm:$0xff] }
  0xdb   :  { %1742 = vmatpush.msra.mxu0 %v593_v54  ;;  %1765 = vmatpush.msra.mxu1 %v705_v15  ;;  %v5520_v54 = vld [vmem:[%s9471_s0 + $0x50] sm:$0xff]  ;;  %v272_v15 = vld [vmem:[%s9470_s1 + $0x6e0] sm:$0xff] }
  0xdc   :  { %1788 = vmatpush.msra.mxu2 %v817_v16  ;;  %1811 = vmatpush.msra.mxu3 %v929_v6  ;;  %v5529_v16 = vld [vmem:[%s9471_s0 + $0x68] sm:$0xff]  ;;  %v1048_v6 = vld [vmem:[%s9470_s1 + $0x1f20] sm:$0xff] }
  0xdd   :  { %1743 = vmatpush.msra.mxu0 %v586_v27  ;;  %1766 = vmatpush.msra.mxu1 %v698_v17  ;;  %v1160_v27 = vld [vmem:[%s9470_s1 + $0x22a0] sm:$0xff]  ;;  %v153_v17 = vld [vmem:[%s9470_s1 + $0x328] sm:$0xff] }
  0xde   :  { %1789 = vmatpush.msra.mxu2 %v810_v19  ;;  %1812 = vmatpush.msra.mxu3 %v922_v21  ;;  %v265_v19 = vld [vmem:[%s9470_s1 + $0x6a8] sm:$0xff]  ;;  %v5547_v21 = vld [vmem:[%s9471_s0 + $0x58] sm:$0xff] }
  0xdf   :  { %1744 = vmatpush.msra.mxu0 %v579_v22  ;;  %1767 = vmatpush.msra.mxu1 %v691_v23  ;;  %v1041_v22 = vld [vmem:[%s9470_s1 + $0x1ee8] sm:$0xff] }
  0xe0   :  { %1790 = vmatpush.msra.mxu2 %v803_v28  ;;  %1813 = vmatpush.msra.mxu3 %v915_v24  ;;  %v1153_v23 = vld [vmem:[%s9470_s1 + $0x2268] sm:$0xff]  ;;  %v146_v28 = vld [vmem:[%s9470_s1 + $0x2f0] sm:$0xff] }
  0xe1   :  { %1745 = vmatpush.msra.mxu0 %v572_v29  ;;  %1768 = vmatpush.msra.mxu1 %v684_v30  ;;  %v258_v24 = vld [vmem:[%s9470_s1 + $0x670] sm:$0xff] }
  0xe2   :  { %1791 = vmatpush.msra.mxu2 %v796_v20  ;;  %1814 = vmatpush.msra.mxu3 %v908_v32  ;;  %v1034_v29 = vld [vmem:[%s9470_s1 + $0x1eb0] sm:$0xff]  ;;  %v139_v20 = vld [vmem:[%s9470_s1 + $0x2b8] sm:$0xff] }
  0xe3   :  { %1746 = vmatpush.msra.mxu0 %v565_v33  ;;  %1769 = vmatpush.msra.mxu1 %v677_v34  ;;  %v1146_v30 = vld [vmem:[%s9470_s1 + $0x2230] sm:$0xff]  ;;  %v251_v32 = vld [vmem:[%s9470_s1 + $0x638] sm:$0xff] }
  0xe4   :  { %1792 = vmatpush.msra.mxu2 %v789_v35  ;;  %1815 = vmatpush.msra.mxu3 %v901_v36  ;;  %v5577_v33 = vld [vmem:[%s9471_s0 + $0x30] sm:$0xff]  ;;  %v1027_v34 = vld [vmem:[%s9470_s1 + $0x1e78] sm:$0xff]  ;;  %v132_v36 = vld [vmem:[%s9470_s1 + $0x280] sm:$0xff] }
  0xe5   :  { %1747 = vmatpush.msra.mxu0 %v558_v26  ;;  %1770 = vmatpush.msra.mxu1 %v670_v37  ;;  %v1139_v35 = vld [vmem:[%s9470_s1 + $0x21f8] sm:$0xff]  ;;  %v5592_v26 = vld [vmem:[%s9471_s0 + $0x20] sm:$0xff] }
  0xe6   :  { %1793 = vmatpush.msra.mxu2 %v782_v38  ;;  %1816 = vmatpush.msra.mxu3 %v894_v39  ;;  %v244_v37 = vld [vmem:[%s9470_s1 + $0x600] sm:$0xff]  ;;  %v5601_v38 = vld [vmem:[%s9471_s0 + $0x38] sm:$0xff] }
  0xe7   :  { %1748 = vmatpush.msra.mxu0 %v551_v5  ;;  %1771 = vmatpush.msra.mxu1 %v663_v40  ;;  %v1020_v39 = vld [vmem:[%s9470_s1 + $0x1e40] sm:$0xff]  ;;  %v125_v40 = vld [vmem:[%s9470_s1 + $0x248] sm:$0xff] }
  0xe8   :  { %1794 = vmatpush.msra.mxu2 %v775_v41  ;;  %1817 = vmatpush.msra.mxu3 %v887_v42  ;;  %v1132_v5 = vld [vmem:[%s9470_s1 + $0x21c0] sm:$0xff]  ;;  %v237_v41 = vld [vmem:[%s9470_s1 + $0x5c8] sm:$0xff] }
  0xe9   :  { %1749 = vmatpush.msra.mxu0 %v544_v43  ;;  %1772 = vmatpush.msra.mxu1 %v656_v45  ;;  %v5619_v42 = vld [vmem:[%s9471_s0 + $0x28] sm:$0xff] }
  0xea   :  { %1795 = vmatpush.msra.mxu2 %v768_v11  ;;  %1818 = vmatpush.msra.mxu3 %v880_v46  ;;  %v1013_v43 = vld [vmem:[%s9470_s1 + $0x1e08] sm:$0xff]  ;;  %v118_v11 = vld [vmem:[%s9470_s1 + $0x210] sm:$0xff] }
  0xeb   :  { %1750 = vmatpush.msra.mxu0 %v537_v48  ;;  %1773 = vmatpush.msra.mxu1 %v649_v51  ;;  %v1125_v45 = vld [vmem:[%s9470_s1 + $0x2188] sm:$0xff]  ;;  %v230_v46 = vld [vmem:[%s9470_s1 + $0x590] sm:$0xff] }
  0xec   :  { %1796 = vmatpush.msra.mxu2 %v761_v52  ;;  %1819 = vmatpush.msra.mxu3 %v873_v53  ;;  %v1006_v48 = vld [vmem:[%s9470_s1 + $0x1dd0] sm:$0xff]  ;;  %v111_v52 = vld [vmem:[%s9470_s1 + $0x1d8] sm:$0xff] }
  0xed   :  { %1710 = vmatmul.f32.vlgmr.msrb.gmra.mxu2 %v5433_v59  ;;  %1751 = vmatpush.msra.mxu0 %v530_v56  ;;  %v1118_v51 = vld [vmem:[%s9470_s1 + $0x2150] sm:$0xff]  ;;  %v223_v53 = vld [vmem:[%s9470_s1 + $0x558] sm:$0xff] }
  0xee   :  { %1774 = vmatpush.msra.mxu1 %v642_v57  ;;  %1797 = vmatpush.msra.mxu2 %v754_v58  ;;  %v999_v56 = vld [vmem:[%s9470_s1 + $0x1d98] sm:$0xff]  ;;  %v104_v58 = vld [vmem:[%s9470_s1 + $0x1a0] sm:$0xff] }
  0xef   :  { %1820 = vmatpush.msra.mxu3 %v866_v25  ;;  %1664 = vmatmul.f32.vlgmr.msrb.gmra.mxu0 %v5448_v31  ;;  %v1111_v57 = vld [vmem:[%s9470_s1 + $0x2118] sm:$0xff]  ;;  %v216_v25 = vld [vmem:[%s9470_s1 + $0x520] sm:$0xff] }
  0xf0   :  { %1733 = vmatmul.f32.vlgmr.msrb.gmra.mxu3 %v5457_v49  ;;  %1752 = vmatpush.msra.mxu0 %v523_v60  ;;  %v992_v60 = vld [vmem:[%s9470_s1 + $0x1d60] sm:$0xff] }
  0xf1   :  { %1775 = vmatpush.msra.mxu1 %v635_v44  ;;  %1798 = vmatpush.msra.mxu2 %v747_v61  ;;  %v1104_v44 = vld [vmem:[%s9470_s1 + $0x20e0] sm:$0xff]  ;;  %v97_v61 = vld [vmem:[%s9470_s1 + $0x168] sm:$0xff] }
  0xf2   :  { %1821 = vmatpush.msra.mxu3 %v859_v62  ;;  %1687 = vmatmul.f32.vlgmr.msrb.gmra.mxu1 %v5475_v3  ;;  %v209_v62 = vld [vmem:[%s9470_s1 + $0x4e8] sm:$0xff] }
  0xf3   :  { %1753 = vmatpush.msra.mxu0 %v516_v55  ;;  %1776 = vmatpush.msra.mxu1 %v628_v50  ;;  %v985_v55 = vld [vmem:[%s9470_s1 + $0x1d28] sm:$0xff] }
  0xf4   :  { %1799 = vmatpush.msra.mxu2 %v740_v63  ;;  %1822 = vmatpush.msra.mxu3 %v852_v2  ;;  %v1097_v50 = vld [vmem:[%s9470_s1 + $0x20a8] sm:$0xff]  ;;  %v90_v63 = vld [vmem:[%s9470_s1 + $0x130] sm:$0xff] }
  0xf5   :  { %1754 = vmatpush.msra.mxu0 %v509_v4  ;;  %1777 = vmatpush.msra.mxu1 %v621_v7  ;;  %v202_v2 = vld [vmem:[%s9470_s1 + $0x4b0] sm:$0xff] }
  0xf6   :  { %1800 = vmatpush.msra.mxu2 %v733_v9  ;;  %1823 = vmatpush.msra.mxu3 %v845_v1  ;;  %v978_v4 = vld [vmem:[%s9470_s1 + $0x1cf0] sm:$0xff]  ;;  %v83_v9 = vld [vmem:[%s9470_s1 + $0xf8] sm:$0xff] }
  0xf7   :  { %1713 = vmatmul.f32.gmra.mxu2 %v5505_v13  ;;  %1755 = vmatpush.msra.mxu0 %v502_v10  ;;  %v1090_v7 = vld [vmem:[%s9470_s1 + $0x2070] sm:$0xff]  ;;  %v195_v1 = vld [vmem:[%s9470_s1 + $0x478] sm:$0xff] }
  0xf8   :  { %1778 = vmatpush.msra.mxu1 %v614_v12  ;;  %1801 = vmatpush.msra.mxu2 %v726_v0  ;;  %v1083_v10 = vld [vmem:[%s9470_s1 + $0x2038] sm:$0xff]  ;;  %v76_v0 = vld [vmem:[%s9470_s1 + $0xc0] sm:$0xff] }
  0xf9   :  { %1824 = vmatpush.msra.mxu3 %v838_v47  ;;  %1667 = vmatmul.f32.gmra.mxu0 %v5520_v54  ;;  %v971_v12 = vld [vmem:[%s9470_s1 + $0x1cb8] sm:$0xff]  ;;  %v188_v47 = vld [vmem:[%s9470_s1 + $0x440] sm:$0xff] }
  0xfa   :  { %1736 = vmatmul.f32.gmra.mxu3 %v5529_v16  ;;  %1832 = vmatpush.msrb.mxu0 %v1055_v8  ;;  %v5709_v8 = vld [vmem:[%s9471_s0 + $0x70] sm:$0xff] }
  0xfb   :  { %1855 = vmatpush.msrb.mxu1 %v1167_v18  ;;  %1878 = vmatpush.msrb.mxu2 %v160_v14  ;;  %v964_v18 = vld [vmem:[%s9470_s1 + $0x1c80] sm:$0xff] }
  0xfc   :  { %1901 = vmatpush.msrb.mxu3 %v272_v15  ;;  %1690 = vmatmul.f32.gmra.mxu1 %v5547_v21  ;;  %v1076_v14 = vld [vmem:[%s9470_s1 + $0x2000] sm:$0xff]  ;;  %v69_v15 = vld [vmem:[%s9470_s1 + $0x88] sm:$0xff] }
  0xfd   :  { %1833 = vmatpush.msrb.mxu0 %v1048_v6  ;;  %1856 = vmatpush.msrb.mxu1 %v1160_v27  ;;  %v181_v6 = vld [vmem:[%s9470_s1 + $0x408] sm:$0xff]  ;;  %v5727_v27 = vld [vmem:[%s9471_s0 + $0x78] sm:$0xff] }
  0xfe   :  { %1879 = vmatpush.msrb.mxu2 %v153_v17  ;;  %1902 = vmatpush.msrb.mxu3 %v265_v19  ;;  %v957_v17 = vld [vmem:[%s9470_s1 + $0x1c48] sm:$0xff] }
  0xff   :  { %1834 = vmatpush.msrb.mxu0 %v1041_v22  ;;  %1857 = vmatpush.msrb.mxu1 %v1153_v23  ;;  %v1069_v19 = vld [vmem:[%s9470_s1 + $0x1fc8] sm:$0xff]  ;;  %v62_v22 = vld [vmem:[%s9470_s1 + $0x50] sm:$0xff] }
 0x100   :  { %1880 = vmatpush.msrb.mxu2 %v146_v28  ;;  %1903 = vmatpush.msrb.mxu3 %v258_v24  ;;  %v174_v23 = vld [vmem:[%s9470_s1 + $0x3d0] sm:$0xff] }
 0x101   :  { %1802 = vmatmul.f32.vlgmr.msra.gmra.mxu2 %v5577_v33  ;;  %1835 = vmatpush.msrb.mxu0 %v1034_v29  ;;  %v950_v28 = vld [vmem:[%s9470_s1 + $0x1c10] sm:$0xff]  ;;  %v55_v29 = vld [vmem:[%s9470_s1 + $0x18] sm:$0xff] }
 0x102   :  { %1858 = vmatpush.msrb.mxu1 %v1146_v30  ;;  %1881 = vmatpush.msrb.mxu2 %v139_v20  ;;  %v1062_v24 = vld [vmem:[%s9470_s1 + $0x1f90] sm:$0xff]  ;;  %v167_v30 = vld [vmem:[%s9470_s1 + $0x398] sm:$0xff]  ;;  %v5757_v20 = vld [vmem:[%s9471_s0 + $0x80] sm:$0xff] }
 0x103   :  { %1904 = vmatpush.msrb.mxu3 %v251_v32  ;;  %1756 = vmatmul.f32.vlgmr.msra.gmra.mxu0 %v5592_v26  ;;  %v384_v32 = vld [vmem:[%s9470_s1 + $0xa60] sm:$0xff] }
 0x104   :  { %1825 = vmatmul.f32.vlgmr.msra.gmra.mxu3 %v5601_v38  ;;  %1836 = vmatpush.msrb.mxu0 %v1027_v34  ;;  %v496_v34 = vld [vmem:[%s9470_s1 + $0xde0] sm:$0xff] }
 0x105   :  { %1859 = vmatpush.msrb.mxu1 %v1139_v35  ;;  %1882 = vmatpush.msrb.mxu2 %v132_v36  ;;  %v608_v35 = vld [vmem:[%s9470_s1 + $0x1160] sm:$0xff] }
 0x106   :  { %1905 = vmatpush.msrb.mxu3 %v244_v37  ;;  %1779 = vmatmul.f32.vlgmr.msra.gmra.mxu1 %v5619_v42  ;;  %v5772_v36 = vld [vmem:[%s9471_s0 + $0x40] sm:$0xff] }
 0x107   :  { %1837 = vmatpush.msrb.mxu0 %v1020_v39  ;;  %1860 = vmatpush.msrb.mxu1 %v1132_v5  ;;  %v720_v37 = vld [vmem:[%s9470_s1 + $0x14e0] sm:$0xff]  ;;  %v5781_v39 = vld [vmem:[%s9471_s0 + $0x88] sm:$0xff] }
 0x108   :  { %1883 = vmatpush.msrb.mxu2 %v125_v40  ;;  %1906 = vmatpush.msrb.mxu3 %v237_v41  ;;  %v377_v5 = vld [vmem:[%s9470_s1 + $0xa28] sm:$0xff] }
 0x109   :  { %1838 = vmatpush.msrb.mxu0 %v1013_v43  ;;  %1861 = vmatpush.msrb.mxu1 %v1125_v45  ;;  %v489_v40 = vld [vmem:[%s9470_s1 + $0xda8] sm:$0xff] }
 0x10a   :  { %1884 = vmatpush.msrb.mxu2 %v118_v11  ;;  %1907 = vmatpush.msrb.mxu3 %v230_v46  ;;  %v601_v41 = vld [vmem:[%s9470_s1 + $0x1128] sm:$0xff]  ;;  %v370_v11 = vld [vmem:[%s9470_s1 + $0x9f0] sm:$0xff] }
 0x10b   :  { %1839 = vmatpush.msrb.mxu0 %v1006_v48  ;;  %1862 = vmatpush.msrb.mxu1 %v1118_v51  ;;  %v713_v43 = vld [vmem:[%s9470_s1 + $0x14a8] sm:$0xff]  ;;  %v482_v46 = vld [vmem:[%s9470_s1 + $0xd70] sm:$0xff] }
 0x10c   :  { %1885 = vmatpush.msrb.mxu2 %v111_v52  ;;  %1908 = vmatpush.msrb.mxu3 %v223_v53  ;;  %v5799_v45 = vld [vmem:[%s9471_s0 + $0x48] sm:$0xff]  ;;  %v594_v48 = vld [vmem:[%s9470_s1 + $0x10f0] sm:$0xff]  ;;  %v363_v52 = vld [vmem:[%s9470_s1 + $0x9b8] sm:$0xff] }
 0x10d   :  { %1840 = vmatpush.msrb.mxu0 %v999_v56  ;;  %1863 = vmatpush.msrb.mxu1 %v1111_v57  ;;  %v706_v51 = vld [vmem:[%s9470_s1 + $0x1470] sm:$0xff]  ;;  %v475_v53 = vld [vmem:[%s9470_s1 + $0xd38] sm:$0xff] }
 0x10e   :  { %1886 = vmatpush.msrb.mxu2 %v104_v58  ;;  %1909 = vmatpush.msrb.mxu3 %v216_v25  ;;  %v587_v56 = vld [vmem:[%s9470_s1 + $0x10b8] sm:$0xff]  ;;  %v468_v58 = vld [vmem:[%s9470_s1 + $0xd00] sm:$0xff] }
 0x10f   :  { %1841 = vmatpush.msrb.mxu0 %v992_v60  ;;  %1864 = vmatpush.msrb.mxu1 %v1104_v44  ;;  %v699_v57 = vld [vmem:[%s9470_s1 + $0x1438] sm:$0xff]  ;;  %v356_v25 = vld [vmem:[%s9470_s1 + $0x980] sm:$0xff] }
 0x110   :  { %1887 = vmatpush.msrb.mxu2 %v97_v61  ;;  %1910 = vmatpush.msrb.mxu3 %v209_v62  ;;  %v580_v60 = vld [vmem:[%s9470_s1 + $0x1080] sm:$0xff]  ;;  %v5841_v61 = vld [vmem:[%s9471_s0 + $0x90] sm:$0xff]  ;;  %v349_v62 = vld [vmem:[%s9470_s1 + $0x948] sm:$0xff] }
 0x111   :  { %1842 = vmatpush.msrb.mxu0 %v985_v55  ;;  %1865 = vmatpush.msrb.mxu1 %v1097_v50  ;;  %v692_v44 = vld [vmem:[%s9470_s1 + $0x1400] sm:$0xff]  ;;  %v461_v55 = vld [vmem:[%s9470_s1 + $0xcc8] sm:$0xff] }
 0x112   :  { %1888 = vmatpush.msrb.mxu2 %v90_v63  ;;  %1911 = vmatpush.msrb.mxu3 %v202_v2  ;;  %v573_v50 = vld [vmem:[%s9470_s1 + $0x1048] sm:$0xff]  ;;  %v5859_v2 = vld [vmem:[%s9471_s0 + $0x98] sm:$0xff] }
 0x113   :  { %1843 = vmatpush.msrb.mxu0 %v978_v4  ;;  %1866 = vmatpush.msrb.mxu1 %v1090_v7  ;;  %v685_v63 = vld [vmem:[%s9470_s1 + $0x13c8] sm:$0xff]  ;;  %v342_v4 = vld [vmem:[%s9470_s1 + $0x910] sm:$0xff] }
 0x114   :  { %1889 = vmatpush.msrb.mxu2 %v83_v9  ;;  %1912 = vmatpush.msrb.mxu3 %v195_v1  ;;  %v454_v7 = vld [vmem:[%s9470_s1 + $0xc90] sm:$0xff] }
 0x115   :  { %1759 = vmatmul.f32.gmra.mxu0 %v5709_v8  ;;  %1867 = vmatpush.msrb.mxu1 %v1083_v10  ;;  %v566_v9 = vld [vmem:[%s9470_s1 + $0x1010] sm:$0xff]  ;;  %v335_v10 = vld [vmem:[%s9470_s1 + $0x8d8] sm:$0xff] }
 0x116   :  { %1844 = vmatpush.msrb.mxu0 %v971_v12  ;;  %1890 = vmatpush.msrb.mxu2 %v76_v0  ;;  %v678_v1 = vld [vmem:[%s9470_s1 + $0x1390] sm:$0xff]  ;;  %v447_v12 = vld [vmem:[%s9470_s1 + $0xc58] sm:$0xff] }
 0x117   :  { %1913 = vmatpush.msrb.mxu3 %v188_v47  ;;  %1782 = vmatmul.f32.gmra.mxu1 %v5727_v27  ;;  %v559_v0 = vld [vmem:[%s9470_s1 + $0xfd8] sm:$0xff] }
 0x118   :  { %1845 = vmatpush.msrb.mxu0 %v964_v18  ;;  %1868 = vmatpush.msrb.mxu1 %v1076_v14  ;;  %v671_v47 = vld [vmem:[%s9470_s1 + $0x1358] sm:$0xff]  ;;  %v328_v18 = vld [vmem:[%s9470_s1 + $0x8a0] sm:$0xff] }
 0x119   :  { %1891 = vmatpush.msrb.mxu2 %v69_v15  ;;  %1914 = vmatpush.msrb.mxu3 %v181_v6  ;;  %v440_v14 = vld [vmem:[%s9470_s1 + $0xc20] sm:$0xff] }
 0x11a   :  { %1846 = vmatpush.msrb.mxu0 %v957_v17  ;;  %1869 = vmatpush.msrb.mxu1 %v1069_v19  ;;  %v552_v15 = vld [vmem:[%s9470_s1 + $0xfa0] sm:$0xff]  ;;  %v321_v17 = vld [vmem:[%s9470_s1 + $0x868] sm:$0xff] }
 0x11b   :  { %1892 = vmatpush.msrb.mxu2 %v62_v22  ;;  %1915 = vmatpush.msrb.mxu3 %v174_v23  ;;  %v664_v6 = vld [vmem:[%s9470_s1 + $0x1320] sm:$0xff]  ;;  %v433_v19 = vld [vmem:[%s9470_s1 + $0xbe8] sm:$0xff] }
 0x11c   :  { %1805 = vmatmul.f32.gmra.mxu2 %v5757_v20  ;;  %1847 = vmatpush.msrb.mxu0 %v950_v28  ;;  %v545_v22 = vld [vmem:[%s9470_s1 + $0xf68] sm:$0xff]  ;;  %v314_v28 = vld [vmem:[%s9470_s1 + $0x830] sm:$0xff] }
 0x11d   :  { %1870 = vmatpush.msrb.mxu1 %v1062_v24  ;;  %1893 = vmatpush.msrb.mxu2 %v55_v29  ;;  %v657_v23 = vld [vmem:[%s9470_s1 + $0x12e8] sm:$0xff]  ;;  %v426_v24 = vld [vmem:[%s9470_s1 + $0xbb0] sm:$0xff] }
 0x11e   :  { %1916 = vmatpush.msrb.mxu3 %v167_v30  ;;  %1848 = vmatmul.f32.vlgmr.msrb.gmra.mxu0 %v5772_v36  ;;  %v538_v29 = vld [vmem:[%s9470_s1 + $0xf30] sm:$0xff] }
 0x11f   :  { %1828 = vmatmul.f32.gmra.mxu3 %v5781_v39  ;;  %1924 = vmatpush.msra.mxu0 %v384_v32  ;;  %v650_v30 = vld [vmem:[%s9470_s1 + $0x12b0] sm:$0xff]  ;;  %v307_v32 = vld [vmem:[%s9470_s1 + $0x7f8] sm:$0xff] }
 0x120   :  { %1947 = vmatpush.msra.mxu1 %v496_v34  ;;  %1970 = vmatpush.msra.mxu2 %v608_v35  ;;  %v419_v34 = vld [vmem:[%s9470_s1 + $0xb78] sm:$0xff] }
 0x121   :  { %1993 = vmatpush.msra.mxu3 %v720_v37  ;;  %1871 = vmatmul.f32.vlgmr.msrb.gmra.mxu1 %v5799_v45  ;;  %v531_v35 = vld [vmem:[%s9470_s1 + $0xef8] sm:$0xff] }
 0x122   :  { %1925 = vmatpush.msra.mxu0 %v377_v5  ;;  %1948 = vmatpush.msra.mxu1 %v489_v40  ;;  %v643_v37 = vld [vmem:[%s9470_s1 + $0x1278] sm:$0xff]  ;;  %v300_v5 = vld [vmem:[%s9470_s1 + $0x7c0] sm:$0xff] }
 0x123   :  { %1971 = vmatpush.msra.mxu2 %v601_v41  ;;  %1994 = vmatpush.msra.mxu3 %v713_v43  ;;  %v412_v40 = vld [vmem:[%s9470_s1 + $0xb40] sm:$0xff] }
 0x124   :  { %1926 = vmatpush.msra.mxu0 %v370_v11  ;;  %1949 = vmatpush.msra.mxu1 %v482_v46  ;;  %v524_v41 = vld [vmem:[%s9470_s1 + $0xec0] sm:$0xff]  ;;  %v293_v11 = vld [vmem:[%s9470_s1 + $0x788] sm:$0xff] }
 0x125   :  { %1972 = vmatpush.msra.mxu2 %v594_v48  ;;  %1995 = vmatpush.msra.mxu3 %v706_v51  ;;  %v636_v43 = vld [vmem:[%s9470_s1 + $0x1240] sm:$0xff]  ;;  %v405_v46 = vld [vmem:[%s9470_s1 + $0xb08] sm:$0xff] }
 0x126   :  { %1927 = vmatpush.msra.mxu0 %v363_v52  ;;  %1950 = vmatpush.msra.mxu1 %v475_v53  ;;  %v517_v48 = vld [vmem:[%s9470_s1 + $0xe88] sm:$0xff]  ;;  %v286_v52 = vld [vmem:[%s9470_s1 + $0x750] sm:$0xff] }
 0x127   :  { %1973 = vmatpush.msra.mxu2 %v587_v56  ;;  %1996 = vmatpush.msra.mxu3 %v699_v57  ;;  %v629_v51 = vld [vmem:[%s9470_s1 + $0x1208] sm:$0xff]  ;;  %v398_v53 = vld [vmem:[%s9470_s1 + $0xad0] sm:$0xff] }
 0x128   :  { %1851 = vmatmul.f32.gmra.mxu0 %v5841_v61  ;;  %1951 = vmatpush.msra.mxu1 %v468_v58  ;;  %v510_v56 = vld [vmem:[%s9470_s1 + $0xe50] sm:$0xff]  ;;  %v279_v58 = vld [vmem:[%s9470_s1 + $0x718] sm:$0xff] }
 0x129   :  { %1928 = vmatpush.msra.mxu0 %v356_v25  ;;  %1974 = vmatpush.msra.mxu2 %v580_v60  ;;  %v622_v57 = vld [vmem:[%s9470_s1 + $0x11d0] sm:$0xff]  ;;  %v391_v25 = vld [vmem:[%s9470_s1 + $0xa98] sm:$0xff] }
 0x12a   :  { %1997 = vmatpush.msra.mxu3 %v692_v44  ;;  %1874 = vmatmul.f32.gmra.mxu1 %v5859_v2  ;;  %v503_v60 = vld [vmem:[%s9470_s1 + $0xe18] sm:$0xff] }
 0x12b   :  { %1929 = vmatpush.msra.mxu0 %v349_v62  ;;  %1952 = vmatpush.msra.mxu1 %v461_v55  ;;  %v615_v44 = vld [vmem:[%s9470_s1 + $0x1198] sm:$0xff]  ;;  %v832_v62 = vld [vmem:[%s9470_s1 + $0x1860] sm:$0xff] }
 0x12c   :  { %1975 = vmatpush.msra.mxu2 %v573_v50  ;;  %1998 = vmatpush.msra.mxu3 %v685_v63  ;;  %v944_v55 = vld [vmem:[%s9470_s1 + $0x1be0] sm:$0xff] }
 0x12d   :  { %1930 = vmatpush.msra.mxu0 %v342_v4  ;;  %1953 = vmatpush.msra.mxu1 %v454_v7  ;;  %v1056_v50 = vld [vmem:[%s9470_s1 + $0x1f60] sm:$0xff]  ;;  %v825_v4 = vld [vmem:[%s9470_s1 + $0x1828] sm:$0xff] }
 0x12e   :  { %1976 = vmatpush.msra.mxu2 %v566_v9  ;;  %1999 = vmatpush.msra.mxu3 %v678_v1  ;;  %v1168_v63 = vld [vmem:[%s9470_s1 + $0x22e0] sm:$0xff]  ;;  %v937_v7 = vld [vmem:[%s9470_s1 + $0x1ba8] sm:$0xff]  ;;  %v930_v1 = vld [vmem:[%s9470_s1 + $0x1b70] sm:$0xff] }
 0x12f   :  { %1931 = vmatpush.msra.mxu0 %v335_v10  ;;  %1954 = vmatpush.msra.mxu1 %v447_v12  ;;  %v1049_v9 = vld [vmem:[%s9470_s1 + $0x1f28] sm:$0xff]  ;;  %v1042_v10 = vld [vmem:[%s9470_s1 + $0x1ef0] sm:$0xff] }
 0x130   :  { %1977 = vmatpush.msra.mxu2 %v559_v0  ;;  %2000 = vmatpush.msra.mxu3 %v671_v47  ;;  %v1154_v12 = vld [vmem:[%s9470_s1 + $0x2270] sm:$0xff]  ;;  %v811_v0 = vld [vmem:[%s9470_s1 + $0x17b8] sm:$0xff] }
 0x131   :  { %1932 = vmatpush.msra.mxu0 %v328_v18  ;;  %1955 = vmatpush.msra.mxu1 %v440_v14  ;;  %v923_v47 = vld [vmem:[%s9470_s1 + $0x1b38] sm:$0xff] }
 0x132   :  { %1978 = vmatpush.msra.mxu2 %v552_v15  ;;  %2001 = vmatpush.msra.mxu3 %v664_v6  ;;  %v1035_v18 = vld [vmem:[%s9470_s1 + $0x1eb8] sm:$0xff]  ;;  %v804_v15 = vld [vmem:[%s9470_s1 + $0x1780] sm:$0xff] }
 0x133   :  { %1933 = vmatpush.msra.mxu0 %v321_v17  ;;  %1956 = vmatpush.msra.mxu1 %v433_v19  ;;  %v1147_v14 = vld [vmem:[%s9470_s1 + $0x2238] sm:$0xff]  ;;  %v916_v6 = vld [vmem:[%s9470_s1 + $0x1b00] sm:$0xff] }
 0x134   :  { %1979 = vmatpush.msra.mxu2 %v545_v22  ;;  %2002 = vmatpush.msra.mxu3 %v657_v23  ;;  %v1028_v17 = vld [vmem:[%s9470_s1 + $0x1e80] sm:$0xff]  ;;  %v797_v22 = vld [vmem:[%s9470_s1 + $0x1748] sm:$0xff] }
 0x135   :  { %1934 = vmatpush.msra.mxu0 %v314_v28  ;;  %1957 = vmatpush.msra.mxu1 %v426_v24  ;;  %v1140_v19 = vld [vmem:[%s9470_s1 + $0x2200] sm:$0xff]  ;;  %v909_v23 = vld [vmem:[%s9470_s1 + $0x1ac8] sm:$0xff] }
 0x136   :  { %1980 = vmatpush.msra.mxu2 %v538_v29  ;;  %2003 = vmatpush.msra.mxu3 %v650_v30  ;;  %v1021_v28 = vld [vmem:[%s9470_s1 + $0x1e48] sm:$0xff]  ;;  %v790_v29 = vld [vmem:[%s9470_s1 + $0x1710] sm:$0xff] }
 0x137   :  { %1935 = vmatpush.msra.mxu0 %v307_v32  ;;  %1958 = vmatpush.msra.mxu1 %v419_v34  ;;  %v1133_v24 = vld [vmem:[%s9470_s1 + $0x21c8] sm:$0xff]  ;;  %v902_v30 = vld [vmem:[%s9470_s1 + $0x1a90] sm:$0xff] }
 0x138   :  { %1981 = vmatpush.msra.mxu2 %v531_v35  ;;  %2004 = vmatpush.msra.mxu3 %v643_v37  ;;  %v1014_v32 = vld [vmem:[%s9470_s1 + $0x1e10] sm:$0xff]  ;;  %v783_v35 = vld [vmem:[%s9470_s1 + $0x16d8] sm:$0xff] }
 0x139   :  { %1936 = vmatpush.msra.mxu0 %v300_v5  ;;  %1959 = vmatpush.msra.mxu1 %v412_v40  ;;  %v1126_v34 = vld [vmem:[%s9470_s1 + $0x2190] sm:$0xff]  ;;  %v895_v37 = vld [vmem:[%s9470_s1 + $0x1a58] sm:$0xff] }
 0x13a   :  { %1982 = vmatpush.msra.mxu2 %v524_v41  ;;  %2005 = vmatpush.msra.mxu3 %v636_v43  ;;  %v1007_v5 = vld [vmem:[%s9470_s1 + $0x1dd8] sm:$0xff]  ;;  %v776_v41 = vld [vmem:[%s9470_s1 + $0x16a0] sm:$0xff] }
 0x13b   :  { %1937 = vmatpush.msra.mxu0 %v293_v11  ;;  %1960 = vmatpush.msra.mxu1 %v405_v46  ;;  %v1119_v40 = vld [vmem:[%s9470_s1 + $0x2158] sm:$0xff]  ;;  %v888_v43 = vld [vmem:[%s9470_s1 + $0x1a20] sm:$0xff] }
 0x13c   :  { %1983 = vmatpush.msra.mxu2 %v517_v48  ;;  %2006 = vmatpush.msra.mxu3 %v629_v51  ;;  %v1000_v11 = vld [vmem:[%s9470_s1 + $0x1da0] sm:$0xff]  ;;  %v881_v48 = vld [vmem:[%s9470_s1 + $0x19e8] sm:$0xff] }
 0x13d   :  { %1938 = vmatpush.msra.mxu0 %v286_v52  ;;  %1961 = vmatpush.msra.mxu1 %v398_v53  ;;  %v1112_v46 = vld [vmem:[%s9470_s1 + $0x2120] sm:$0xff]  ;;  %v993_v51 = vld [vmem:[%s9470_s1 + $0x1d68] sm:$0xff]  ;;  %v762_v53 = vld [vmem:[%s9470_s1 + $0x1630] sm:$0xff] }
 0x13e   :  { %1984 = vmatpush.msra.mxu2 %v510_v56  ;;  %2007 = vmatpush.msra.mxu3 %v622_v57  ;;  %v1105_v52 = vld [vmem:[%s9470_s1 + $0x20e8] sm:$0xff]  ;;  %v874_v56 = vld [vmem:[%s9470_s1 + $0x19b0] sm:$0xff] }
 0x13f   :  { %1939 = vmatpush.msra.mxu0 %v279_v58  ;;  %1962 = vmatpush.msra.mxu1 %v391_v25  ;;  %v1098_v57 = vld [vmem:[%s9470_s1 + $0x20b0] sm:$0xff]  ;;  %v755_v58 = vld [vmem:[%s9470_s1 + $0x15f8] sm:$0xff] }
 0x140   :  { %1985 = vmatpush.msra.mxu2 %v503_v60  ;;  %2008 = vmatpush.msra.mxu3 %v615_v44  ;;  %v867_v25 = vld [vmem:[%s9470_s1 + $0x1978] sm:$0xff] }
 0x141   :  { %1894 = vmatmul.f32.vlgmr.msrb.gmra.mxu2 %v5448_v31  ;;  %1917 = vmatmul.f32.vlgmr.msrb.gmra.mxu3 %v5475_v3  ;;  %v1161_v31 = vld [vmem:[%s9470_s1 + $0x22a8] sm:$0xff]  ;;  %v818_v3 = vld [vmem:[%s9470_s1 + $0x17f0] sm:$0xff]  ;;  %v979_v60 = vld [vmem:[%s9470_s1 + $0x1cf8] sm:$0xff] }
 0x142   :  { %2016 = vmatpush.msrb.mxu0 %v832_v62  ;;  %2039 = vmatpush.msrb.mxu1 %v944_v55  ;;  %v1091_v44 = vld [vmem:[%s9470_s1 + $0x2078] sm:$0xff]  ;;  %v748_v62 = vld [vmem:[%s9470_s1 + $0x15c0] sm:$0xff] }
 0x143   :  { %2062 = vmatpush.msrb.mxu2 %v1056_v50  ;;  %2085 = vmatpush.msrb.mxu3 %v1168_v63  ;;  %v860_v55 = vld [vmem:[%s9470_s1 + $0x1940] sm:$0xff]  ;;  %v741_v63 = vld [vmem:[%s9470_s1 + $0x1588] sm:$0xff] }
 0x144   :  { %2017 = vmatpush.msrb.mxu0 %v825_v4  ;;  %2040 = vmatpush.msrb.mxu1 %v937_v7  ;;  %v972_v50 = vld [vmem:[%s9470_s1 + $0x1cc0] sm:$0xff]  ;;  %v853_v4 = vld [vmem:[%s9470_s1 + $0x1908] sm:$0xff] }
 0x145   :  { %2063 = vmatpush.msrb.mxu2 %v1049_v9  ;;  %2086 = vmatpush.msrb.mxu3 %v1161_v31  ;;  %v1077_v7 = vld [vmem:[%s9470_s1 + $0x2008] sm:$0xff]  ;;  %v846_v9 = vld [vmem:[%s9470_s1 + $0x18d0] sm:$0xff] }
 0x146   :  { %2018 = vmatpush.msrb.mxu0 %v818_v3  ;;  %2041 = vmatpush.msrb.mxu1 %v930_v1  ;;  %v958_v31 = vld [vmem:[%s9470_s1 + $0x1c50] sm:$0xff]  ;;  %v839_v1 = vld [vmem:[%s9470_s1 + $0x1898] sm:$0xff] }
 0x147   :  { %2064 = vmatpush.msrb.mxu2 %v1042_v10  ;;  %2087 = vmatpush.msrb.mxu3 %v1154_v12  ;;  %v1070_v3 = vld [vmem:[%s9470_s1 + $0x1fd0] sm:$0xff]  ;;  %v951_v10 = vld [vmem:[%s9470_s1 + $0x1c18] sm:$0xff] }
 0x148   :  { %2019 = vmatpush.msrb.mxu0 %v811_v0  ;;  %2042 = vmatpush.msrb.mxu1 %v923_v47  ;;  %v1063_v12 = vld [vmem:[%s9470_s1 + $0x1f98] sm:$0xff]  ;;  %v161_v0 = vld [vmem:[%s9470_s1 + $0x368] sm:$0xff] }
 0x149   :  { %2065 = vmatpush.msrb.mxu2 %v1035_v18  ;;  %2088 = vmatpush.msrb.mxu3 %v1147_v14  ;;  %v273_v47 = vld [vmem:[%s9470_s1 + $0x6e8] sm:$0xff]  ;;  %v154_v14 = vld [vmem:[%s9470_s1 + $0x330] sm:$0xff] }
 0x14a   :  { %2020 = vmatpush.msrb.mxu0 %v804_v15  ;;  %2043 = vmatpush.msrb.mxu1 %v916_v6  ;;  %v385_v18 = vld [vmem:[%s9470_s1 + $0xa68] sm:$0xff]  ;;  %v266_v15 = vld [vmem:[%s9470_s1 + $0x6b0] sm:$0xff] }
 0x14b   :  { %2066 = vmatpush.msrb.mxu2 %v1028_v17  ;;  %2089 = vmatpush.msrb.mxu3 %v1140_v19  ;;  %v490_v6 = vld [vmem:[%s9470_s1 + $0xdb0] sm:$0xff]  ;;  %v259_v17 = vld [vmem:[%s9470_s1 + $0x678] sm:$0xff] }
 0x14c   :  { %2021 = vmatpush.msrb.mxu0 %v797_v22  ;;  %2044 = vmatpush.msrb.mxu1 %v909_v23  ;;  %v371_v19 = vld [vmem:[%s9470_s1 + $0x9f8] sm:$0xff]  ;;  %v252_v23 = vld [vmem:[%s9470_s1 + $0x640] sm:$0xff] }
 0x14d   :  { %2067 = vmatpush.msrb.mxu2 %v1021_v28  ;;  %2090 = vmatpush.msrb.mxu3 %v1133_v24  ;;  %v483_v22 = vld [vmem:[%s9470_s1 + $0xd78] sm:$0xff]  ;;  %v364_v28 = vld [vmem:[%s9470_s1 + $0x9c0] sm:$0xff] }
 0x14e   :  { %2022 = vmatpush.msrb.mxu0 %v790_v29  ;;  %2045 = vmatpush.msrb.mxu1 %v902_v30  ;;  %v476_v24 = vld [vmem:[%s9470_s1 + $0xd40] sm:$0xff]  ;;  %v133_v29 = vld [vmem:[%s9470_s1 + $0x288] sm:$0xff] }
 0x14f   :  { %2068 = vmatpush.msrb.mxu2 %v1014_v32  ;;  %2091 = vmatpush.msrb.mxu3 %v1126_v34  ;;  %v245_v30 = vld [vmem:[%s9470_s1 + $0x608] sm:$0xff]  ;;  %v126_v34 = vld [vmem:[%s9470_s1 + $0x250] sm:$0xff] }
 0x150   :  { %1897 = vmatmul.f32.gmra.mxu2 %v5520_v54  ;;  %2023 = vmatpush.msrb.mxu0 %v783_v35  ;;  %v769_v54 = vld [vmem:[%s9470_s1 + $0x1668] sm:$0xff]  ;;  %v238_v35 = vld [vmem:[%s9470_s1 + $0x5d0] sm:$0xff] }
 0x151   :  { %2046 = vmatpush.msrb.mxu1 %v895_v37  ;;  %2069 = vmatpush.msrb.mxu2 %v1007_v5  ;;  %v357_v32 = vld [vmem:[%s9470_s1 + $0x988] sm:$0xff]  ;;  %v462_v37 = vld [vmem:[%s9470_s1 + $0xcd0] sm:$0xff]  ;;  %v231_v5 = vld [vmem:[%s9470_s1 + $0x598] sm:$0xff] }
 0x152   :  { %2092 = vmatpush.msrb.mxu3 %v1119_v40  ;;  %2024 = vmatpush.msrb.mxu0 %v776_v41  ;;  %v343_v40 = vld [vmem:[%s9470_s1 + $0x918] sm:$0xff] }
 0x153   :  { %1920 = vmatmul.f32.gmra.mxu3 %v5547_v21  ;;  %2047 = vmatpush.msrb.mxu1 %v888_v43  ;;  %v986_v21 = vld [vmem:[%s9470_s1 + $0x1d30] sm:$0xff]  ;;  %v455_v41 = vld [vmem:[%s9470_s1 + $0xc98] sm:$0xff]  ;;  %v224_v43 = vld [vmem:[%s9470_s1 + $0x560] sm:$0xff] }
 0x154   :  { %2070 = vmatpush.msrb.mxu2 %v1000_v11  ;;  %2093 = vmatpush.msrb.mxu3 %v1112_v46  ;;  %v336_v11 = vld [vmem:[%s9470_s1 + $0x8e0] sm:$0xff] }
 0x155   :  { %2025 = vmatpush.msrb.mxu0 %v769_v54  ;;  %2048 = vmatpush.msrb.mxu1 %v881_v48  ;;  %v448_v46 = vld [vmem:[%s9470_s1 + $0xc60] sm:$0xff]  ;;  %v105_v54 = vld [vmem:[%s9470_s1 + $0x1a8] sm:$0xff] }
 0x156   :  { %2071 = vmatpush.msrb.mxu2 %v993_v51  ;;  %2094 = vmatpush.msrb.mxu3 %v1105_v52  ;;  %v217_v48 = vld [vmem:[%s9470_s1 + $0x528] sm:$0xff] }
 0x157   :  { %2026 = vmatpush.msrb.mxu0 %v762_v53  ;;  %2049 = vmatpush.msrb.mxu1 %v874_v56  ;;  %v329_v51 = vld [vmem:[%s9470_s1 + $0x8a8] sm:$0xff]  ;;  %v98_v53 = vld [vmem:[%s9470_s1 + $0x170] sm:$0xff] }
 0x158   :  { %2072 = vmatpush.msrb.mxu2 %v986_v21  ;;  %2095 = vmatpush.msrb.mxu3 %v1098_v57  ;;  %v441_v52 = vld [vmem:[%s9470_s1 + $0xc28] sm:$0xff]  ;;  %v210_v56 = vld [vmem:[%s9470_s1 + $0x4f0] sm:$0xff] }
 0x159   :  { %1986 = vmatmul.f32.vlgmr.msra.gmra.mxu2 %v5592_v26  ;;  %2027 = vmatpush.msrb.mxu0 %v755_v58  ;;  %v1084_v26 = vld [vmem:[%s9470_s1 + $0x2040] sm:$0xff]  ;;  %v322_v21 = vld [vmem:[%s9470_s1 + $0x870] sm:$0xff]  ;;  %v91_v58 = vld [vmem:[%s9470_s1 + $0x138] sm:$0xff] }
 0x15a   :  { %2050 = vmatpush.msrb.mxu1 %v867_v25  ;;  %2073 = vmatpush.msrb.mxu2 %v979_v60  ;;  %v434_v57 = vld [vmem:[%s9470_s1 + $0xbf0] sm:$0xff]  ;;  %v203_v25 = vld [vmem:[%s9470_s1 + $0x4b8] sm:$0xff] }
 0x15b   :  { %2096 = vmatpush.msrb.mxu3 %v1091_v44  ;;  %1940 = vmatmul.f32.vlgmr.msra.gmra.mxu0 %v5433_v59  ;;  %v965_v59 = vld [vmem:[%s9470_s1 + $0x1c88] sm:$0xff]  ;;  %v315_v60 = vld [vmem:[%s9470_s1 + $0x838] sm:$0xff] }
 0x15c   :  { %2009 = vmatmul.f32.vlgmr.msra.gmra.mxu3 %v5619_v42  ;;  %2028 = vmatpush.msrb.mxu0 %v748_v62  ;;  %v734_v42 = vld [vmem:[%s9470_s1 + $0x1550] sm:$0xff]  ;;  %v427_v44 = vld [vmem:[%s9470_s1 + $0xbb8] sm:$0xff]  ;;  %v84_v62 = vld [vmem:[%s9470_s1 + $0x100] sm:$0xff] }
 0x15d   :  { %2051 = vmatpush.msrb.mxu1 %v860_v55  ;;  %2074 = vmatpush.msrb.mxu2 %v972_v50  ;;  %v196_v55 = vld [vmem:[%s9470_s1 + $0x480] sm:$0xff] }
 0x15e   :  { %2097 = vmatpush.msrb.mxu3 %v1084_v26  ;;  %1963 = vmatmul.f32.vlgmr.msra.gmra.mxu1 %v5457_v49  ;;  %v727_v49 = vld [vmem:[%s9470_s1 + $0x1518] sm:$0xff]  ;;  %v308_v50 = vld [vmem:[%s9470_s1 + $0x800] sm:$0xff] }
 0x15f   :  { %2029 = vmatpush.msrb.mxu0 %v741_v63  ;;  %2052 = vmatpush.msrb.mxu1 %v853_v4  ;;  %v420_v26 = vld [vmem:[%s9470_s1 + $0xb80] sm:$0xff]  ;;  %v77_v63 = vld [vmem:[%s9470_s1 + $0xc8] sm:$0xff] }
 0x160   :  { %2075 = vmatpush.msrb.mxu2 %v965_v59  ;;  %2098 = vmatpush.msrb.mxu3 %v1077_v7  ;;  %v189_v4 = vld [vmem:[%s9470_s1 + $0x448] sm:$0xff] }
 0x161   :  { %2030 = vmatpush.msrb.mxu0 %v734_v42  ;;  %2053 = vmatpush.msrb.mxu1 %v846_v9  ;;  %v301_v59 = vld [vmem:[%s9470_s1 + $0x7c8] sm:$0xff]  ;;  %v70_v42 = vld [vmem:[%s9470_s1 + $0x90] sm:$0xff] }
 0x162   :  { %2076 = vmatpush.msrb.mxu2 %v958_v31  ;;  %2099 = vmatpush.msrb.mxu3 %v1070_v3  ;;  %v413_v7 = vld [vmem:[%s9470_s1 + $0xb48] sm:$0xff]  ;;  %v182_v9 = vld [vmem:[%s9470_s1 + $0x410] sm:$0xff] }
 0x163   :  { %1989 = vmatmul.f32.gmra.mxu2 %v5709_v8  ;;  %2031 = vmatpush.msrb.mxu0 %v727_v49  ;;  %v497_v8 = vld [vmem:[%s9470_s1 + $0xde8] sm:$0xff]  ;;  %v294_v31 = vld [vmem:[%s9470_s1 + $0x790] sm:$0xff]  ;;  %v63_v49 = vld [vmem:[%s9470_s1 + $0x58] sm:$0xff] }
 0x164   :  { %2054 = vmatpush.msrb.mxu1 %v839_v1  ;;  %2077 = vmatpush.msrb.mxu2 %v951_v10  ;;  %v406_v3 = vld [vmem:[%s9470_s1 + $0xb10] sm:$0xff]  ;;  %v175_v1 = vld [vmem:[%s9470_s1 + $0x3d8] sm:$0xff] }
 0x165   :  { %2100 = vmatpush.msrb.mxu3 %v1063_v12  ;;  %1943 = vmatmul.f32.gmra.mxu0 %v5505_v13  ;;  %v378_v13 = vld [vmem:[%s9470_s1 + $0xa30] sm:$0xff]  ;;  %v287_v10 = vld [vmem:[%s9470_s1 + $0x758] sm:$0xff] }
 0x166   :  { %2012 = vmatmul.f32.gmra.mxu3 %v5727_v27  ;;  %2108 = vmatpush.msra.mxu0 %v161_v0  ;;  %v147_v27 = vld [vmem:[%s9470_s1 + $0x2f8] sm:$0xff]  ;;  %v56_v0 = vld [vmem:[%s9470_s1 + $0x20] sm:$0xff] }
 0x167   :  { %2131 = vmatpush.msra.mxu1 %v273_v47  ;;  %2154 = vmatpush.msra.mxu2 %v385_v18  ;;  %v399_v12 = vld [vmem:[%s9470_s1 + $0xad8] sm:$0xff]  ;;  %v168_v47 = vld [vmem:[%s9470_s1 + $0x3a0] sm:$0xff] }
 0x168   :  { %2177 = vmatpush.msra.mxu3 %v497_v8  ;;  %1966 = vmatmul.f32.gmra.mxu1 %v5529_v16  ;;  %v140_v16 = vld [vmem:[%s9470_s1 + $0x2c0] sm:$0xff] }
 0x169   :  { %2109 = vmatpush.msra.mxu0 %v154_v14  ;;  %2132 = vmatpush.msra.mxu1 %v266_v15  ;;  %v280_v18 = vld [vmem:[%s9470_s1 + $0x720] sm:$0xff]  ;;  %v609_v14 = vld [vmem:[%s9470_s1 + $0x1168] sm:$0xff] }
 0x16a   :  { %2155 = vmatpush.msra.mxu2 %v378_v13  ;;  %2178 = vmatpush.msra.mxu3 %v490_v6  ;;  %v392_v8 = vld [vmem:[%s9470_s1 + $0xaa0] sm:$0xff]  ;;  %v721_v15 = vld [vmem:[%s9470_s1 + $0x14e8] sm:$0xff]  ;;  %v602_v6 = vld [vmem:[%s9470_s1 + $0x1130] sm:$0xff] }
 0x16b   :  { %2110 = vmatpush.msra.mxu0 %v147_v27  ;;  %2133 = vmatpush.msra.mxu1 %v259_v17  ;;  %v833_v13 = vld [vmem:[%s9470_s1 + $0x1868] sm:$0xff]  ;;  %v714_v27 = vld [vmem:[%s9470_s1 + $0x14b0] sm:$0xff] }
 0x16c   :  { %2156 = vmatpush.msra.mxu2 %v371_v19  ;;  %2179 = vmatpush.msra.mxu3 %v483_v22  ;;  %v938_v17 = vld [vmem:[%s9470_s1 + $0x1bb0] sm:$0xff]  ;;  %v707_v19 = vld [vmem:[%s9470_s1 + $0x1478] sm:$0xff] }
 0x16d   :  { %2078 = vmatmul.f32.vlgmr.msrb.gmra.mxu2 %v5772_v36  ;;  %2111 = vmatpush.msra.mxu0 %v140_v16  ;;  %v469_v36 = vld [vmem:[%s9470_s1 + $0xd08] sm:$0xff]  ;;  %v819_v22 = vld [vmem:[%s9470_s1 + $0x17f8] sm:$0xff] }
 0x16e   :  { %2134 = vmatpush.msra.mxu1 %v252_v23  ;;  %2157 = vmatpush.msra.mxu2 %v364_v28  ;;  %v931_v16 = vld [vmem:[%s9470_s1 + $0x1b78] sm:$0xff]  ;;  %v700_v23 = vld [vmem:[%s9470_s1 + $0x1440] sm:$0xff] }
 0x16f   :  { %2180 = vmatpush.msra.mxu3 %v476_v24  ;;  %2032 = vmatmul.f32.vlgmr.msrb.gmra.mxu0 %v5577_v33  ;;  %v350_v33 = vld [vmem:[%s9470_s1 + $0x950] sm:$0xff]  ;;  %v812_v28 = vld [vmem:[%s9470_s1 + $0x17c0] sm:$0xff] }
 0x170   :  { %2101 = vmatmul.f32.vlgmr.msrb.gmra.mxu3 %v5799_v45  ;;  %2112 = vmatpush.msra.mxu0 %v133_v29  ;;  %v119_v45 = vld [vmem:[%s9470_s1 + $0x218] sm:$0xff]  ;;  %v924_v24 = vld [vmem:[%s9470_s1 + $0x1b40] sm:$0xff]  ;;  %v581_v29 = vld [vmem:[%s9470_s1 + $0x1088] sm:$0xff] }
 0x171   :  { %2135 = vmatpush.msra.mxu1 %v245_v30  ;;  %2158 = vmatpush.msra.mxu2 %v357_v32  ;;  %v693_v30 = vld [vmem:[%s9470_s1 + $0x1408] sm:$0xff] }
 0x172   :  { %2181 = vmatpush.msra.mxu3 %v469_v36  ;;  %2055 = vmatmul.f32.vlgmr.msrb.gmra.mxu1 %v5601_v38  ;;  %v112_v38 = vld [vmem:[%s9470_s1 + $0x1e0] sm:$0xff]  ;;  %v805_v32 = vld [vmem:[%s9470_s1 + $0x1788] sm:$0xff] }
 0x173   :  { %2113 = vmatpush.msra.mxu0 %v126_v34  ;;  %2136 = vmatpush.msra.mxu1 %v238_v35  ;;  %v917_v36 = vld [vmem:[%s9470_s1 + $0x1b08] sm:$0xff]  ;;  %v574_v34 = vld [vmem:[%s9470_s1 + $0x1050] sm:$0xff] }
 0x174   :  { %2159 = vmatpush.msra.mxu2 %v350_v33  ;;  %2182 = vmatpush.msra.mxu3 %v462_v37  ;;  %v686_v35 = vld [vmem:[%s9470_s1 + $0x13d0] sm:$0xff] }
 0x175   :  { %2114 = vmatpush.msra.mxu0 %v119_v45  ;;  %2137 = vmatpush.msra.mxu1 %v231_v5  ;;  %v798_v33 = vld [vmem:[%s9470_s1 + $0x1750] sm:$0xff]  ;;  %v567_v45 = vld [vmem:[%s9470_s1 + $0x1018] sm:$0xff] }
 0x176   :  { %2160 = vmatpush.msra.mxu2 %v343_v40  ;;  %2183 = vmatpush.msra.mxu3 %v455_v41  ;;  %v910_v37 = vld [vmem:[%s9470_s1 + $0x1ad0] sm:$0xff]  ;;  %v679_v5 = vld [vmem:[%s9470_s1 + $0x1398] sm:$0xff] }
 0x177   :  { %2115 = vmatpush.msra.mxu0 %v112_v38  ;;  %2138 = vmatpush.msra.mxu1 %v224_v43  ;;  %v791_v40 = vld [vmem:[%s9470_s1 + $0x1718] sm:$0xff]  ;;  %v6470_v38 = vpop.f32.mrf.mxu0  ;;  %v560_v43 = vld [vmem:[%s9470_s1 + $0xfe0] sm:$0xff] }
 0x178   :  { %2161 = vmatpush.msra.mxu2 %v336_v11  ;;  %2184 = vmatpush.msra.mxu3 %v448_v46  ;;  %v903_v41 = vld [vmem:[%s9470_s1 + $0x1a98] sm:$0xff]  ;;  %v672_v11 = vld [vmem:[%s9470_s1 + $0x1360] sm:$0xff] }
 0x179   :  { %2116 = vmatpush.msra.mxu0 %v105_v54  ;;  %2139 = vmatpush.msra.mxu1 %v217_v48  ;;  %v784_v46 = vld [vmem:[%s9470_s1 + $0x16e0] sm:$0xff]  ;;  %v553_v48 = vld [vmem:[%s9470_s1 + $0xfa8] sm:$0xff] }
 0x17a   :  { %2162 = vmatpush.msra.mxu2 %v329_v51  ;;  %2185 = vmatpush.msra.mxu3 %v441_v52  ;;  %v896_v54 = vld [vmem:[%s9470_s1 + $0x1a60] sm:$0xff]  ;;  %v665_v51 = vld [vmem:[%s9470_s1 + $0x1328] sm:$0xff]  ;;  %v6490_v52 = vpop.f32.mrf.mxu1 }
 0x17b   :  { %2117 = vmatpush.msra.mxu0 %v98_v53  ;;  %2140 = vmatpush.msra.mxu1 %v210_v56  ;;  %v777_v53 = vld [vmem:[%s9470_s1 + $0x16a8] sm:$0xff] }
 0x17c   :  { %2163 = vmatpush.msra.mxu2 %v322_v21  ;;  %2186 = vmatpush.msra.mxu3 %v434_v57  ;;  %v889_v56 = vld [vmem:[%s9470_s1 + $0x1a28] sm:$0xff]  ;;  %v546_v21 = vld [vmem:[%s9470_s1 + $0xf70] sm:$0xff] }
 0x17d   :  { %2118 = vmatpush.msra.mxu0 %v91_v58  ;;  %2141 = vmatpush.msra.mxu1 %v203_v25  ;;  %v658_v57 = vld [vmem:[%s9470_s1 + $0x12f0] sm:$0xff]  ;;  %v6504_v58 = vpop.f32.mrf.mxu2 }
 0x17e   :  { %2164 = vmatpush.msra.mxu2 %v315_v60  ;;  %2187 = vmatpush.msra.mxu3 %v427_v44  ;;  %v770_v25 = vld [vmem:[%s9470_s1 + $0x1670] sm:$0xff]  ;;  %v539_v44 = vld [vmem:[%s9470_s1 + $0xf38] sm:$0xff] }
 0x17f   :  { %2119 = vmatpush.msra.mxu0 %v84_v62  ;;  %2142 = vmatpush.msra.mxu1 %v196_v55  ;;  %v882_v60 = vld [vmem:[%s9470_s1 + $0x19f0] sm:$0xff]  ;;  %v651_v62 = vld [vmem:[%s9470_s1 + $0x12b8] sm:$0xff] }
 0x180   :  { %2165 = vmatpush.msra.mxu2 %v308_v50  ;;  %2188 = vmatpush.msra.mxu3 %v420_v26  ;;  %v763_v55 = vld [vmem:[%s9470_s1 + $0x1638] sm:$0xff]  ;;  %v6524_v26 = vpop.f32.mrf.mxu3 }
 0x181   :  { %2120 = vmatpush.msra.mxu0 %v77_v63  ;;  %2143 = vmatpush.msra.mxu1 %v189_v4  ;;  %v875_v50 = vld [vmem:[%s9470_s1 + $0x19b8] sm:$0xff]  ;;  %v532_v63 = vld [vmem:[%s9470_s1 + $0xf00] sm:$0xff] }
 0x182   :  { %2166 = vmatpush.msra.mxu2 %v301_v59  ;;  %2189 = vmatpush.msra.mxu3 %v413_v7  ;;  %v644_v4 = vld [vmem:[%s9470_s1 + $0x1280] sm:$0xff]  ;;  %v6535_v7 = vpop.f32.mrf.mxu0 }
 0x183   :  { %2121 = vmatpush.msra.mxu0 %v70_v42  ;;  %2144 = vmatpush.msra.mxu1 %v182_v9  ;;  %v756_v59 = vld [vmem:[%s9470_s1 + $0x1600] sm:$0xff]  ;;  %v6543_v9 = vld [vmem:[%s9471_s0 + $0x10] sm:$0xff] }
 0x184   :  { %2167 = vmatpush.msra.mxu2 %v294_v31  ;;  %2190 = vmatpush.msra.mxu3 %v406_v3  ;;  %v868_v42 = vld [vmem:[%s9470_s1 + $0x1980] sm:$0xff]  ;;  %v525_v31 = vld [vmem:[%s9470_s1 + $0xec8] sm:$0xff] }
 0x185   :  { %2122 = vmatpush.msra.mxu0 %v63_v49  ;;  %2145 = vmatpush.msra.mxu1 %v175_v1  ;;  %v637_v3 = vld [vmem:[%s9470_s1 + $0x1248] sm:$0xff]  ;;  %v6555_v1 = vpop.f32.mrf.mxu1 }
 0x186   :  { %2168 = vmatpush.msra.mxu2 %v287_v10  ;;  %2191 = vmatpush.msra.mxu3 %v399_v12  ;;  %v749_v49 = vld [vmem:[%s9470_s1 + $0x15c8] sm:$0xff]  ;;  %v6560_v10 = vld [vmem:[%s9471_s0] sm:$0xff] }
 0x187   :  { %2081 = vmatmul.f32.gmra.mxu2 %v5841_v61  ;;  %2123 = vmatpush.msra.mxu0 %v56_v0  ;;  %v945_v61 = vld [vmem:[%s9470_s1 + $0x1be8] sm:$0xff]  ;;  %v6569_v0 = vld [vmem:[%s9471_s0 + $0x18] sm:$0xff] }
 0x188   :  { %2146 = vmatpush.msra.mxu1 %v168_v47  ;;  %2169 = vmatpush.msra.mxu2 %v280_v18  ;;  %v861_v12 = vld [vmem:[%s9470_s1 + $0x1948] sm:$0xff]  ;;  %v518_v47 = vld [vmem:[%s9470_s1 + $0xe90] sm:$0xff] }
 0x189   :  { %2192 = vmatpush.msra.mxu3 %v392_v8  ;;  %2035 = vmatmul.f32.gmra.mxu0 %v5757_v20  ;;  %v826_v20 = vld [vmem:[%s9470_s1 + $0x1830] sm:$0xff]  ;;  %v6578_v8 = vpop.f32.mrf.mxu2 }
 0x18a   :  { %2104 = vmatmul.f32.gmra.mxu3 %v5859_v2  ;;  %2200 = vmatpush.msrb.mxu0 %v609_v14  ;;  %v595_v2 = vld [vmem:[%s9470_s1 + $0x10f8] sm:$0xff]  ;;  %v630_v18 = vld [vmem:[%s9470_s1 + $0x1210] sm:$0xff] }
 0x18b   :  { %2223 = vmatpush.msrb.mxu1 %v721_v15  ;;  %2246 = vmatpush.msrb.mxu2 %v833_v13  ;;  %v742_v14 = vld [vmem:[%s9470_s1 + $0x1590] sm:$0xff]  ;;  %v6589_v13 = vld [vmem:[%s9471_s0 + $0x8] sm:$0xff] }
 0x18c   :  { %2269 = vmatpush.msrb.mxu3 %v945_v61  ;;  %2058 = vmatmul.f32.gmra.mxu1 %v5781_v39  ;;  %v588_v39 = vld [vmem:[%s9470_s1 + $0x10c0] sm:$0xff]  ;;  %v854_v15 = vld [vmem:[%s9470_s1 + $0x1910] sm:$0xff]  ;;  %v511_v61 = vld [vmem:[%s9470_s1 + $0xe58] sm:$0xff] }
 0x18d   :  { %2201 = vmatpush.msrb.mxu0 %v602_v6  ;;  %2224 = vmatpush.msrb.mxu1 %v714_v27  ;;  %v623_v6 = vld [vmem:[%s9470_s1 + $0x11d8] sm:$0xff] }
 0x18e   :  { %2247 = vmatpush.msrb.mxu2 %v826_v20  ;;  %2270 = vmatpush.msrb.mxu3 %v938_v17  ;;  %v735_v27 = vld [vmem:[%s9470_s1 + $0x1558] sm:$0xff]  ;;  %v6604_v17 = vpop.f32.mrf.mxu3 }
 0x18f   :  { %2202 = vmatpush.msrb.mxu0 %v595_v2  ;;  %2225 = vmatpush.msrb.mxu1 %v707_v19  ;;  %v847_v20 = vld [vmem:[%s9470_s1 + $0x18d8] sm:$0xff]  ;;  %v504_v2 = vld [vmem:[%s9470_s1 + $0xe20] sm:$0xff] }
 0x190   :  { %2248 = vmatpush.msrb.mxu2 %v819_v22  ;;  %2271 = vmatpush.msrb.mxu3 %v931_v16  ;;  %v616_v19 = vld [vmem:[%s9470_s1 + $0x11a0] sm:$0xff]  ;;  %v6615_v16 = vpop.f32.mrf.mxu0 }
 0x191   :  { %2203 = vmatpush.msrb.mxu0 %v588_v39  ;;  %2226 = vmatpush.msrb.mxu1 %v700_v23  ;;  %v728_v22 = vld [vmem:[%s9470_s1 + $0x1520] sm:$0xff] }
 0x192   :  { %2249 = vmatpush.msrb.mxu2 %v812_v28  ;;  %2272 = vmatpush.msrb.mxu3 %v924_v24  ;;  %v840_v39 = vld [vmem:[%s9470_s1 + $0x18a0] sm:$0xff]  ;;  %v1057_v28 = vld [vmem:[%s9470_s1 + $0x1f68] sm:$0xff] }
 0x193   :  { %2204 = vmatpush.msrb.mxu0 %v581_v29  ;;  %2227 = vmatpush.msrb.mxu1 %v693_v30  ;;  %v6623_v23 = vld [vmem:[%s9471_s0 + $0x60] sm:$0xff]  ;;  %v1169_v24 = vld [vmem:[%s9470_s1 + $0x22e8] sm:$0xff]  ;;  %v162_v29 = vld [vmem:[%s9470_s1 + $0x370] sm:$0xff]  ;;  %v6635_v30 = vpop.f32.mrf.mxu1 }
 0x194   :  { %2250 = vmatpush.msrb.mxu2 %v805_v32  ;;  %2273 = vmatpush.msrb.mxu3 %v917_v36  ;;  %v6640_v32 = vld [vmem:[%s9471_s0 + $0x50] sm:$0xff] }
 0x195   :  { %2205 = vmatpush.msrb.mxu0 %v574_v34  ;;  %2228 = vmatpush.msrb.mxu1 %v686_v35  ;;  %v274_v36 = vld [vmem:[%s9470_s1 + $0x6f0] sm:$0xff]  ;;  %v6649_v34 = vld [vmem:[%s9471_s0 + $0x68] sm:$0xff] }
 0x196   :  { %2251 = vmatpush.msrb.mxu2 %v798_v33  ;;  %2274 = vmatpush.msrb.mxu3 %v910_v37  ;;  %v1050_v35 = vld [vmem:[%s9470_s1 + $0x1f30] sm:$0xff]  ;;  %v6658_v37 = vpop.f32.mrf.mxu2 }
 0x197   :  { %2206 = vmatpush.msrb.mxu0 %v567_v45  ;;  %2229 = vmatpush.msrb.mxu1 %v679_v5  ;;  %v1162_v33 = vld [vmem:[%s9470_s1 + $0x22b0] sm:$0xff]  ;;  %v155_v45 = vld [vmem:[%s9470_s1 + $0x338] sm:$0xff] }
 0x198   :  { %2252 = vmatpush.msrb.mxu2 %v791_v40  ;;  %2275 = vmatpush.msrb.mxu3 %v903_v41  ;;  %v267_v5 = vld [vmem:[%s9470_s1 + $0x6b8] sm:$0xff] }
 0x199   :  { %2207 = vmatpush.msrb.mxu0 %v560_v43  ;;  %2230 = vmatpush.msrb.mxu1 %v672_v11  ;;  %v6669_v40 = vld [vmem:[%s9471_s0 + $0x58] sm:$0xff]  ;;  %v148_v11 = vld [vmem:[%s9470_s1 + $0x300] sm:$0xff] }
 0x19a   :  { %2253 = vmatpush.msrb.mxu2 %v784_v46  ;;  %2276 = vmatpush.msrb.mxu3 %v896_v54  ;;  %v1043_v41 = vld [vmem:[%s9470_s1 + $0x1ef8] sm:$0xff]  ;;  %v260_v46 = vld [vmem:[%s9470_s1 + $0x680] sm:$0xff]  ;;  %v6684_v54 = vpop.f32.mrf.mxu3 }
 0x19b   :  { %2208 = vmatpush.msrb.mxu0 %v553_v48  ;;  %2231 = vmatpush.msrb.mxu1 %v665_v51  ;;  %v1155_v43 = vld [vmem:[%s9470_s1 + $0x2278] sm:$0xff]  ;;  %v6686_v48 = vpop.f32.mrf.mxu0  ;;  %v1036_v51 = vld [vmem:[%s9470_s1 + $0x1ec0] sm:$0xff] }
 0x19c   :  { %2254 = vmatpush.msrb.mxu2 %v777_v53  ;;  %2277 = vmatpush.msrb.mxu3 %v889_v56  ;;  %v1148_v53 = vld [vmem:[%s9470_s1 + $0x2240] sm:$0xff]  ;;  %v141_v56 = vld [vmem:[%s9470_s1 + $0x2c8] sm:$0xff] }
 0x19d   :  { %2209 = vmatpush.msrb.mxu0 %v546_v21  ;;  %2232 = vmatpush.msrb.mxu1 %v658_v57  ;;  %v253_v21 = vld [vmem:[%s9470_s1 + $0x648] sm:$0xff]  ;;  %v6700_v57 = vpop.f32.mrf.mxu1 }
 0x19e   :  { %2255 = vmatpush.msrb.mxu2 %v770_v25  ;;  %2278 = vmatpush.msrb.mxu3 %v882_v60  ;;  %v6705_v25 = vld [vmem:[%s9471_s0 + $0x30] sm:$0xff]  ;;  %v1029_v60 = vld [vmem:[%s9470_s1 + $0x1e88] sm:$0xff] }
 0x19f   :  { %2210 = vmatpush.msrb.mxu0 %v539_v44  ;;  %2233 = vmatpush.msrb.mxu1 %v651_v62  ;;  %v1141_v44 = vld [vmem:[%s9470_s1 + $0x2208] sm:$0xff]  ;;  %v134_v62 = vld [vmem:[%s9470_s1 + $0x290] sm:$0xff] }
 0x1a0   :  { %2256 = vmatpush.msrb.mxu2 %v763_v55  ;;  %2279 = vmatpush.msrb.mxu3 %v875_v50  ;;  %v6717_v55 = vpop.f32.mrf.mxu2  ;;  %v6722_v50 = vld [vmem:[%s9471_s0 + $0x20] sm:$0xff] }
 0x1a1   :  { %2170 = vmatmul.f32.vlgmr.msra.gmra.mxu2 %v6543_v9  ;;  %2211 = vmatpush.msrb.mxu0 %v532_v63  ;;  %v246_v63 = vld [vmem:[%s9470_s1 + $0x610] sm:$0xff] }
 0x1a2   :  { %2234 = vmatpush.msrb.mxu1 %v644_v4  ;;  %2257 = vmatpush.msrb.mxu2 %v756_v59  ;;  %v6731_v4 = vld [vmem:[%s9471_s0 + $0x38] sm:$0xff]  ;;  %v1022_v59 = vld [vmem:[%s9470_s1 + $0x1e50] sm:$0xff] }
 0x1a3   :  { %2280 = vmatpush.msrb.mxu3 %v868_v42  ;;  %2124 = vmatmul.f32.vlgmr.msra.gmra.mxu0 %v6560_v10  ;;  %v1134_v42 = vld [vmem:[%s9470_s1 + $0x21d0] sm:$0xff] }
 0x1a4   :  { %2193 = vmatmul.f32.vlgmr.msra.gmra.mxu3 %v6569_v0  ;;  %2212 = vmatpush.msrb.mxu0 %v525_v31  ;;  %v127_v31 = vld [vmem:[%s9470_s1 + $0x258] sm:$0xff] }
 0x1a5   :  { %2235 = vmatpush.msrb.mxu1 %v637_v3  ;;  %2258 = vmatpush.msrb.mxu2 %v749_v49  ;;  %v239_v3 = vld [vmem:[%s9470_s1 + $0x5d8] sm:$0xff]  ;;  %v6746_v49 = vpop.f32.mrf.mxu3 }
 0x1a6   :  { %2281 = vmatpush.msrb.mxu3 %v861_v12  ;;  %2147 = vmatmul.f32.vlgmr.msra.gmra.mxu1 %v6589_v13  ;;  %9480 = vst [vmem:[#allocation2_spill] sm:$0xff] %v6746_v49  ;;  %v6751_v12 = vld [vmem:[%s9471_s0 + $0x28] sm:$0xff]  ;;  %v638_v49 = vld [vmem:[%s9470_s1 + $0x1250] sm:$0xff] }
 0x1a7   :  { %2213 = vmatpush.msrb.mxu0 %v518_v47  ;;  %2236 = vmatpush.msrb.mxu1 %v630_v18  ;;  %v1015_v47 = vld [vmem:[%s9470_s1 + $0x1e18] sm:$0xff] }
 0x1a8   :  { %2259 = vmatpush.msrb.mxu2 %v742_v14  ;;  %2282 = vmatpush.msrb.mxu3 %v854_v15  ;;  %v1127_v18 = vld [vmem:[%s9470_s1 + $0x2198] sm:$0xff]  ;;  %v120_v14 = vld [vmem:[%s9470_s1 + $0x220] sm:$0xff] }
 0x1a9   :  { %2214 = vmatpush.msrb.mxu0 %v511_v61  ;;  %2237 = vmatpush.msrb.mxu1 %v623_v6  ;;  %v232_v15 = vld [vmem:[%s9470_s1 + $0x5a0] sm:$0xff]  ;;  %v6766_v61 = vpop.f32.mrf.mxu0 }
 0x1aa   :  { %2260 = vmatpush.msrb.mxu2 %v735_v27  ;;  %2283 = vmatpush.msrb.mxu3 %v847_v20  ;;  %v1008_v6 = vld [vmem:[%s9470_s1 + $0x1de0] sm:$0xff]  ;;  %v113_v20 = vld [vmem:[%s9470_s1 + $0x1e8] sm:$0xff] }
 0x1ab   :  { %2173 = vmatmul.f32.gmra.mxu2 %v6623_v23  ;;  %2215 = vmatpush.msrb.mxu0 %v504_v2  ;;  %v1120_v27 = vld [vmem:[%s9470_s1 + $0x2160] sm:$0xff]  ;;  %v225_v2 = vld [vmem:[%s9470_s1 + $0x568] sm:$0xff] }
 0x1ac   :  { %2238 = vmatpush.msrb.mxu1 %v616_v19  ;;  %2261 = vmatpush.msrb.mxu2 %v728_v22  ;;  %v1001_v19 = vld [vmem:[%s9470_s1 + $0x1da8] sm:$0xff] }
 0x1ad   :  { %2284 = vmatpush.msrb.mxu3 %v840_v39  ;;  %2127 = vmatmul.f32.gmra.mxu0 %v6640_v32  ;;  %v1113_v22 = vld [vmem:[%s9470_s1 + $0x2128] sm:$0xff]  ;;  %v6786_v39 = vpop.f32.mrf.mxu1 }
 0x1ae   :  { %2196 = vmatmul.f32.gmra.mxu3 %v6649_v34  ;;  %2292 = vmatpush.msra.mxu0 %v1057_v28  ;;  %v6788_v28 = vpop.f32.mrf.mxu2 }
 0x1af   :  { %2315 = vmatpush.msra.mxu1 %v1169_v24  ;;  %2338 = vmatpush.msra.mxu2 %v162_v29  ;;  %v106_v24 = vld [vmem:[%s9470_s1 + $0x1b0] sm:$0xff] }
 0x1b0   :  { %2361 = vmatpush.msra.mxu3 %v274_v36  ;;  %2150 = vmatmul.f32.gmra.mxu1 %v6669_v40  ;;  %v218_v29 = vld [vmem:[%s9470_s1 + $0x530] sm:$0xff] }
 0x1b1   :  { %2293 = vmatpush.msra.mxu0 %v1050_v35  ;;  %2316 = vmatpush.msra.mxu1 %v1162_v33  ;;  %v994_v36 = vld [vmem:[%s9470_s1 + $0x1d70] sm:$0xff]  ;;  %v99_v33 = vld [vmem:[%s9470_s1 + $0x178] sm:$0xff] }
 0x1b2   :  { %2339 = vmatpush.msra.mxu2 %v155_v45  ;;  %2362 = vmatpush.msra.mxu3 %v267_v5  ;;  %v1106_v35 = vld [vmem:[%s9470_s1 + $0x20f0] sm:$0xff]  ;;  %v211_v45 = vld [vmem:[%s9470_s1 + $0x4f8] sm:$0xff]  ;;  %v6808_v5 = vpop.f32.mrf.mxu3 }
 0x1b3   :  { %2294 = vmatpush.msra.mxu0 %v1043_v41  ;;  %2317 = vmatpush.msra.mxu1 %v1155_v43  ;;  %v987_v41 = vld [vmem:[%s9470_s1 + $0x1d38] sm:$0xff] }
 0x1b4   :  { %2340 = vmatpush.msra.mxu2 %v148_v11  ;;  %2363 = vmatpush.msra.mxu3 %v260_v46  ;;  %v1099_v43 = vld [vmem:[%s9470_s1 + $0x20b8] sm:$0xff]  ;;  %v92_v11 = vld [vmem:[%s9470_s1 + $0x140] sm:$0xff] }
 0x1b5   :  { %2262 = vmatmul.f32.vlgmr.msrb.gmra.mxu2 %v6705_v25  ;;  %2295 = vmatpush.msra.mxu0 %v1036_v51  ;;  %v204_v46 = vld [vmem:[%s9470_s1 + $0x4c0] sm:$0xff] }
 0x1b6   :  { %2318 = vmatpush.msra.mxu1 %v1148_v53  ;;  %2341 = vmatpush.msra.mxu2 %v141_v56  ;;  %v980_v51 = vld [vmem:[%s9470_s1 + $0x1d00] sm:$0xff]  ;;  %v85_v56 = vld [vmem:[%s9470_s1 + $0x108] sm:$0xff] }
 0x1b7   :  { %2364 = vmatpush.msra.mxu3 %v253_v21  ;;  %2216 = vmatmul.f32.vlgmr.msrb.gmra.mxu0 %v6722_v50  ;;  %v1092_v53 = vld [vmem:[%s9470_s1 + $0x2080] sm:$0xff]  ;;  %v197_v21 = vld [vmem:[%s9470_s1 + $0x488] sm:$0xff] }
 0x1b8   :  { %2285 = vmatmul.f32.vlgmr.msrb.gmra.mxu3 %v6731_v4  ;;  %2296 = vmatpush.msra.mxu0 %v1029_v60  ;;  %v6834_v60 = vpop.f32.mrf.mxu0 }
 0x1b9   :  { %2319 = vmatpush.msra.mxu1 %v1141_v44  ;;  %2342 = vmatpush.msra.mxu2 %v134_v62  ;;  %9481 = vst [vmem:[#allocation3_spill] sm:$0xff] %v6834_v60  ;;  %v1085_v44 = vld [vmem:[%s9470_s1 + $0x2048] sm:$0xff]  ;;  %v302_v60 = vld [vmem:[%s9470_s1 + $0x7d0] sm:$0xff] }
 0x1ba   :  { %2365 = vmatpush.msra.mxu3 %v246_v63  ;;  %2239 = vmatmul.f32.vlgmr.msrb.gmra.mxu1 %v6751_v12  ;;  %v973_v62 = vld [vmem:[%s9470_s1 + $0x1cc8] sm:$0xff]  ;;  %v78_v63 = vld [vmem:[%s9470_s1 + $0xd0] sm:$0xff] }
 0x1bb   :  { %2297 = vmatpush.msra.mxu0 %v1022_v59  ;;  %2320 = vmatpush.msra.mxu1 %v1134_v42  ;;  %v190_v59 = vld [vmem:[%s9470_s1 + $0x450] sm:$0xff]  ;;  %v6848_v42 = vpop.f32.mrf.mxu1 }
 0x1bc   :  { %2343 = vmatpush.msra.mxu2 %v127_v31  ;;  %2366 = vmatpush.msra.mxu3 %v239_v3  ;;  %9482 = vst [vmem:[#allocation4_spill] sm:$0xff] %v6848_v42  ;;  %v6850_v31 = vpop.f32.mrf.mxu2  ;;  %v6855_v3 = vld [vmem:[%s9471_s0 + $0x70] sm:$0xff]  ;;  %v421_v42 = vld [vmem:[%s9470_s1 + $0xb88] sm:$0xff] }
 0x1bd   :  { %2298 = vmatpush.msra.mxu0 %v1015_v47  ;;  %2321 = vmatpush.msra.mxu1 %v1127_v18  ;;  %v966_v47 = vld [vmem:[%s9470_s1 + $0x1c90] sm:$0xff] }
 0x1be   :  { %2344 = vmatpush.msra.mxu2 %v120_v14  ;;  %2367 = vmatpush.msra.mxu3 %v232_v15  ;;  %v1078_v18 = vld [vmem:[%s9470_s1 + $0x2010] sm:$0xff]  ;;  %v71_v14 = vld [vmem:[%s9470_s1 + $0x98] sm:$0xff] }
 0x1bf   :  { %2299 = vmatpush.msra.mxu0 %v1008_v6  ;;  %2322 = vmatpush.msra.mxu1 %v1120_v27  ;;  %v183_v15 = vld [vmem:[%s9470_s1 + $0x418] sm:$0xff] }
 0x1c0   :  { %2345 = vmatpush.msra.mxu2 %v113_v20  ;;  %2368 = vmatpush.msra.mxu3 %v225_v2  ;;  %v6873_v6 = vld [vmem:[%s9471_s0 + $0x78] sm:$0xff]  ;;  %v6882_v2 = vpop.f32.mrf.mxu3 }
 0x1c1   :  { %2300 = vmatpush.msra.mxu0 %v1001_v19  ;;  %2323 = vmatpush.msra.mxu1 %v1113_v22  ;;  %v959_v27 = vld [vmem:[%s9470_s1 + $0x1c58] sm:$0xff]  ;;  %v64_v19 = vld [vmem:[%s9470_s1 + $0x60] sm:$0xff] }
 0x1c2   :  { %2346 = vmatpush.msra.mxu2 %v106_v24  ;;  %2369 = vmatpush.msra.mxu3 %v218_v29  ;;  %v1071_v20 = vld [vmem:[%s9470_s1 + $0x1fd8] sm:$0xff]  ;;  %v176_v22 = vld [vmem:[%s9470_s1 + $0x3e0] sm:$0xff]  ;;  %v6893_v29 = vpop.f32.mrf.mxu0 }
 0x1c3   :  { %2301 = vmatpush.msra.mxu0 %v994_v36  ;;  %2324 = vmatpush.msra.mxu1 %v1106_v35  ;;  %v952_v24 = vld [vmem:[%s9470_s1 + $0x1c20] sm:$0xff]  ;;  %v57_v35 = vld [vmem:[%s9470_s1 + $0x28] sm:$0xff] }
 0x1c4   :  { %2347 = vmatpush.msra.mxu2 %v99_v33  ;;  %2370 = vmatpush.msra.mxu3 %v211_v45  ;;  %v1064_v36 = vld [vmem:[%s9470_s1 + $0x1fa0] sm:$0xff]  ;;  %v169_v33 = vld [vmem:[%s9470_s1 + $0x3a8] sm:$0xff] }
 0x1c5   :  { %2302 = vmatpush.msra.mxu0 %v987_v41  ;;  %2325 = vmatpush.msra.mxu1 %v1099_v43  ;;  %v6907_v45 = vld [vmem:[%s9471_s0 + $0x80] sm:$0xff]  ;;  %v386_v41 = vld [vmem:[%s9470_s1 + $0xa70] sm:$0xff]  ;;  %v6913_v43 = vpop.f32.mrf.mxu1 }
 0x1c6   :  { %2348 = vmatpush.msra.mxu2 %v92_v11  ;;  %2371 = vmatpush.msra.mxu3 %v204_v46  ;;  %v498_v11 = vld [vmem:[%s9470_s1 + $0xdf0] sm:$0xff] }
 0x1c7   :  { %2303 = vmatpush.msra.mxu0 %v980_v51  ;;  %2326 = vmatpush.msra.mxu1 %v1092_v53  ;;  %v610_v46 = vld [vmem:[%s9470_s1 + $0x1170] sm:$0xff]  ;;  %v6924_v51 = vld [vmem:[%s9471_s0 + $0x40] sm:$0xff] }
 0x1c8   :  { %2349 = vmatpush.msra.mxu2 %v85_v56  ;;  %2372 = vmatpush.msra.mxu3 %v197_v21  ;;  %v722_v53 = vld [vmem:[%s9470_s1 + $0x14f0] sm:$0xff]  ;;  %v6930_v56 = vpop.f32.mrf.mxu2  ;;  %v6935_v21 = vld [vmem:[%s9471_s0 + $0x88] sm:$0xff] }
 0x1c9   :  { %2219 = vmatmul.f32.gmra.mxu0 %v6855_v3  ;;  %2327 = vmatpush.msra.mxu1 %v1085_v44  ;;  %v379_v44 = vld [vmem:[%s9470_s1 + $0xa38] sm:$0xff] }
 0x1ca   :  { %2304 = vmatpush.msra.mxu0 %v973_v62  ;;  %2350 = vmatpush.msra.mxu2 %v78_v63  ;;  %v491_v62 = vld [vmem:[%s9470_s1 + $0xdb8] sm:$0xff] }
 0x1cb   :  { %2373 = vmatpush.msra.mxu3 %v190_v59  ;;  %2242 = vmatmul.f32.gmra.mxu1 %v6873_v6  ;;  %v603_v63 = vld [vmem:[%s9470_s1 + $0x1138] sm:$0xff] }
 0x1cc   :  { %2305 = vmatpush.msra.mxu0 %v966_v47  ;;  %2328 = vmatpush.msra.mxu1 %v1078_v18  ;;  %v715_v59 = vld [vmem:[%s9470_s1 + $0x14b8] sm:$0xff]  ;;  %v6953_v47 = vld [vmem:[%s9471_s0 + $0x48] sm:$0xff]  ;;  %v372_v18 = vld [vmem:[%s9470_s1 + $0xa00] sm:$0xff] }
 0x1cd   :  { %2351 = vmatpush.msra.mxu2 %v71_v14  ;;  %2374 = vmatpush.msra.mxu3 %v183_v15  ;;  %v484_v14 = vld [vmem:[%s9470_s1 + $0xd80] sm:$0xff]  ;;  %v6962_v15 = vpop.f32.mrf.mxu3 }
 0x1ce   :  { %2306 = vmatpush.msra.mxu0 %v959_v27  ;;  %2329 = vmatpush.msra.mxu1 %v1071_v20  ;;  %v596_v27 = vld [vmem:[%s9470_s1 + $0x1100] sm:$0xff] }
 0x1cf   :  { %2352 = vmatpush.msra.mxu2 %v64_v19  ;;  %2375 = vmatpush.msra.mxu3 %v176_v22  ;;  %v708_v20 = vld [vmem:[%s9470_s1 + $0x1480] sm:$0xff]  ;;  %v365_v19 = vld [vmem:[%s9470_s1 + $0x9c8] sm:$0xff] }
 0x1d0   :  { %2265 = vmatmul.f32.gmra.mxu2 %v6907_v45  ;;  %2307 = vmatpush.msra.mxu0 %v952_v24  ;;  %v477_v22 = vld [vmem:[%s9470_s1 + $0xd48] sm:$0xff]  ;;  %v6976_v24 = vpop.f32.mrf.mxu0 }
 0x1d1   :  { %2330 = vmatpush.msra.mxu1 %v1064_v36  ;;  %2353 = vmatpush.msra.mxu2 %v57_v35  ;;  %v589_v36 = vld [vmem:[%s9470_s1 + $0x10c8] sm:$0xff] }
 0x1d2   :  { %2376 = vmatpush.msra.mxu3 %v169_v33  ;;  %2308 = vmatmul.f32.vlgmr.msra.gmra.mxu0 %v6924_v51  ;;  %v701_v35 = vld [vmem:[%s9470_s1 + $0x1448] sm:$0xff]  ;;  %v470_v33 = vld [vmem:[%s9470_s1 + $0xd10] sm:$0xff] }
 0x1d3   :  { %2288 = vmatmul.f32.gmra.mxu3 %v6935_v21  ;;  %2384 = vmatpush.msrb.mxu0 %v386_v41  ;;  %v358_v41 = vld [vmem:[%s9470_s1 + $0x990] sm:$0xff] }
 0x1d4   :  { %2407 = vmatpush.msrb.mxu1 %v498_v11  ;;  %2430 = vmatpush.msrb.mxu2 %v610_v46  ;;  %v582_v11 = vld [vmem:[%s9470_s1 + $0x1090] sm:$0xff]  ;;  %v6993_v46 = vpop.f32.mrf.mxu1 }
 0x1d5   :  { %2453 = vmatpush.msrb.mxu3 %v722_v53  ;;  %2331 = vmatmul.f32.vlgmr.msra.gmra.mxu1 %v6953_v47  ;;  %v694_v53 = vld [vmem:[%s9470_s1 + $0x1410] sm:$0xff] }
 0x1d6   :  { %2385 = vmatpush.msrb.mxu0 %v379_v44  ;;  %2408 = vmatpush.msrb.mxu1 %v491_v62  ;;  %v7001_v44 = vld [vmem:[%s9471_s0 + $0x90] sm:$0xff]  ;;  %v351_v62 = vld [vmem:[%s9470_s1 + $0x958] sm:$0xff] }
 0x1d7   :  { %2431 = vmatpush.msrb.mxu2 %v603_v63  ;;  %2454 = vmatpush.msrb.mxu3 %v715_v59  ;;  %v463_v63 = vld [vmem:[%s9470_s1 + $0xcd8] sm:$0xff]  ;;  %v7010_v59 = vpop.f32.mrf.mxu2 }
 0x1d8   :  { %2386 = vmatpush.msrb.mxu0 %v372_v18  ;;  %2409 = vmatpush.msrb.mxu1 %v484_v14  ;;  %v575_v18 = vld [vmem:[%s9470_s1 + $0x1058] sm:$0xff] }
 0x1d9   :  { %2432 = vmatpush.msrb.mxu2 %v596_v27  ;;  %2455 = vmatpush.msrb.mxu3 %v708_v20  ;;  %v687_v14 = vld [vmem:[%s9470_s1 + $0x13d8] sm:$0xff]  ;;  %v344_v20 = vld [vmem:[%s9470_s1 + $0x920] sm:$0xff] }
 0x1da   :  { %2387 = vmatpush.msrb.mxu0 %v365_v19  ;;  %2410 = vmatpush.msrb.mxu1 %v477_v22  ;;  %v7021_v27 = vld [vmem:[%s9471_s0 + $0x98] sm:$0xff]  ;;  %v456_v19 = vld [vmem:[%s9470_s1 + $0xca0] sm:$0xff] }
 0x1db   :  { %2433 = vmatpush.msrb.mxu2 %v589_v36  ;;  %2456 = vmatpush.msrb.mxu3 %v701_v35  ;;  %v568_v22 = vld [vmem:[%s9470_s1 + $0x1020] sm:$0xff]  ;;  %v7036_v35 = vpop.f32.mrf.mxu3 }
 0x1dc   :  { %2311 = vmatmul.f32.gmra.mxu0 %v7001_v44  ;;  %2411 = vmatpush.msrb.mxu1 %v470_v33  ;;  %v680_v36 = vld [vmem:[%s9470_s1 + $0x13a0] sm:$0xff]  ;;  %v337_v33 = vld [vmem:[%s9470_s1 + $0x8e8] sm:$0xff] }
 0x1dd   :  { %2388 = vmatpush.msrb.mxu0 %v358_v41  ;;  %2434 = vmatpush.msrb.mxu2 %v582_v11  ;;  %v449_v41 = vld [vmem:[%s9470_s1 + $0xc68] sm:$0xff] }
 0x1de   :  { %2457 = vmatpush.msrb.mxu3 %v694_v53  ;;  %2334 = vmatmul.f32.gmra.mxu1 %v7021_v27  ;;  %v561_v11 = vld [vmem:[%s9470_s1 + $0xfe8] sm:$0xff] }
 0x1df   :  { %2389 = vmatpush.msrb.mxu0 %v351_v62  ;;  %2412 = vmatpush.msrb.mxu1 %v463_v63  ;;  %v673_v53 = vld [vmem:[%s9470_s1 + $0x1368] sm:$0xff]  ;;  %v7050_v62 = vpop.f32.mrf.mxu0  ;;  %v330_v63 = vld [vmem:[%s9470_s1 + $0x8b0] sm:$0xff] }
 0x1e0   :  { %2435 = vmatpush.msrb.mxu2 %v575_v18  ;;  %2458 = vmatpush.msrb.mxu3 %v687_v14  ;;  %v442_v18 = vld [vmem:[%s9470_s1 + $0xc30] sm:$0xff] }
 0x1e1   :  { %2390 = vmatpush.msrb.mxu0 %v344_v20  ;;  %2413 = vmatpush.msrb.mxu1 %v456_v19  ;;  %v554_v14 = vld [vmem:[%s9470_s1 + $0xfb0] sm:$0xff]  ;;  %v323_v19 = vld [vmem:[%s9470_s1 + $0x878] sm:$0xff] }
 0x1e2   :  { %2436 = vmatpush.msrb.mxu2 %v568_v22  ;;  %2459 = vmatpush.msrb.mxu3 %v680_v36  ;;  %v666_v20 = vld [vmem:[%s9470_s1 + $0x1330] sm:$0xff]  ;;  %v435_v22 = vld [vmem:[%s9470_s1 + $0xbf8] sm:$0xff]  ;;  %v7070_v36 = vpop.f32.mrf.mxu1 }
 0x1e3   :  { %2391 = vmatpush.msrb.mxu0 %v337_v33  ;;  %2414 = vmatpush.msrb.mxu1 %v449_v41  ;;  %v547_v33 = vld [vmem:[%s9470_s1 + $0xf78] sm:$0xff] }
 0x1e4   :  { %2437 = vmatpush.msrb.mxu2 %v561_v11  ;;  %2460 = vmatpush.msrb.mxu3 %v673_v53  ;;  %v659_v41 = vld [vmem:[%s9470_s1 + $0x12f8] sm:$0xff]  ;;  %v316_v11 = vld [vmem:[%s9470_s1 + $0x840] sm:$0xff] }
 0x1e5   :  { %2392 = vmatpush.msrb.mxu0 %v330_v63  ;;  %2415 = vmatpush.msrb.mxu1 %v442_v18  ;;  %v428_v53 = vld [vmem:[%s9470_s1 + $0xbc0] sm:$0xff]  ;;  %v7084_v63 = vpop.f32.mrf.mxu2 }
 0x1e6   :  { %2438 = vmatpush.msrb.mxu2 %v554_v14  ;;  %2461 = vmatpush.msrb.mxu3 %v666_v20  ;;  %v540_v18 = vld [vmem:[%s9470_s1 + $0xf40] sm:$0xff]  ;;  %v309_v20 = vld [vmem:[%s9470_s1 + $0x808] sm:$0xff] }
 0x1e7   :  { %2393 = vmatpush.msrb.mxu0 %v323_v19  ;;  %2416 = vmatpush.msrb.mxu1 %v435_v22  ;;  %v652_v14 = vld [vmem:[%s9470_s1 + $0x12c0] sm:$0xff]  ;;  %v533_v19 = vld [vmem:[%s9470_s1 + $0xf08] sm:$0xff] }
 0x1e8   :  { %2439 = vmatpush.msrb.mxu2 %v547_v33  ;;  %2462 = vmatpush.msrb.mxu3 %v659_v41  ;;  %v645_v22 = vld [vmem:[%s9470_s1 + $0x1288] sm:$0xff]  ;;  %v7104_v33 = vpop.f32.mrf.mxu3  ;;  %v7106_v41 = vpop.f32.mrf.mxu0 }
 0x1e9   :  { %2394 = vmatpush.msrb.mxu0 %v316_v11  ;;  %2417 = vmatpush.msrb.mxu1 %v428_v53  ;;  %9483 = vst [vmem:[#allocation5_spill] sm:$0xff] %v7104_v33  ;;  %v414_v11 = vld [vmem:[%s9470_s1 + $0xb50] sm:$0xff] }
 0x1ea   :  { %2440 = vmatpush.msrb.mxu2 %v540_v18  ;;  %2463 = vmatpush.msrb.mxu3 %v652_v14  ;;  %v526_v53 = vld [vmem:[%s9470_s1 + $0xed0] sm:$0xff]  ;;  %v295_v18 = vld [vmem:[%s9470_s1 + $0x798] sm:$0xff] }
 0x1eb   :  { %2395 = vmatpush.msrb.mxu0 %v309_v20  ;;  %2418 = vmatpush.msrb.mxu1 %v421_v42  ;;  %v407_v14 = vld [vmem:[%s9470_s1 + $0xb18] sm:$0xff]  ;;  %v7126_v20 = vpop.f32.mrf.mxu1 }
 0x1ec   :  { %2441 = vmatpush.msrb.mxu2 %v533_v19  ;;  %2464 = vmatpush.msrb.mxu3 %v645_v22  ;;  %9484 = vst [vmem:[#allocation6_spill] sm:$0xff] %v7126_v20  ;;  %v519_v42 = vld [vmem:[%s9470_s1 + $0xe98] sm:$0xff]  ;;  %v288_v22 = vld [vmem:[%s9470_s1 + $0x760] sm:$0xff] }
 0x1ed   :  { %2396 = vmatpush.msrb.mxu0 %v302_v60  ;;  %2419 = vmatpush.msrb.mxu1 %v414_v11  ;;  %v631_v19 = vld [vmem:[%s9470_s1 + $0x1218] sm:$0xff]  ;;  %v400_v20 = vld [vmem:[%s9470_s1 + $0xae0] sm:$0xff]  ;;  %v7140_v60 = vpop.f32.mrf.mxu2 }
 0x1ee   :  { %2442 = vmatpush.msrb.mxu2 %v526_v53  ;;  %2465 = vmatpush.msrb.mxu3 %v638_v49  ;;  %9485 = vst [vmem:[#allocation7_spill] sm:$0xff] %v7140_v60  ;;  %v512_v11 = vld [vmem:[%s9470_s1 + $0xe60] sm:$0xff]  ;;  %v281_v53 = vld [vmem:[%s9470_s1 + $0x728] sm:$0xff] }
 0x1ef   :  { %2397 = vmatpush.msrb.mxu0 %v295_v18  ;;  %2420 = vmatpush.msrb.mxu1 %v407_v14  ;;  %v624_v49 = vld [vmem:[%s9470_s1 + $0x11e0] sm:$0xff]  ;;  %v393_v18 = vld [vmem:[%s9470_s1 + $0xaa8] sm:$0xff] }
 0x1f0   :  { %2443 = vmatpush.msrb.mxu2 %v519_v42  ;;  %2466 = vmatpush.msrb.mxu3 %v631_v19  ;;  %v505_v14 = vld [vmem:[%s9470_s1 + $0xe28] sm:$0xff]  ;;  %v7157_v60 = vpop.f32.mrf.mxu3  ;;  %v7159_v33 = vpop.f32.mrf.mxu0  ;;  %v946_v19 = vld [vmem:[%s9470_s1 + $0x1bf0] sm:$0xff] }
 0x1f1   :  { %2398 = vmatpush.msrb.mxu0 %v288_v22  ;;  %2421 = vmatpush.msrb.mxu1 %v400_v20  ;;  %9486 = vst [vmem:[#allocation8_spill] sm:$0xff] %v7157_v60  ;;  %v617_v42 = vld [vmem:[%s9470_s1 + $0x11a8] sm:$0xff]  ;;  %v834_v20 = vld [vmem:[%s9470_s1 + $0x1870] sm:$0xff]  ;;  %v1156_v60 = vld [vmem:[%s9470_s1 + $0x2280] sm:$0xff] }
 0x1f2   :  { %2444 = vmatpush.msrb.mxu2 %v512_v11  ;;  %2467 = vmatpush.msrb.mxu3 %v624_v49  ;;  %v1058_v22 = vld [vmem:[%s9470_s1 + $0x1f70] sm:$0xff] }
 0x1f3   :  { %2354 = vmatmul.f32.vlgmr.msra.gmra.mxu2 %v6560_v10  ;;  %2399 = vmatpush.msrb.mxu0 %v281_v53  ;;  %v1170_v11 = vld [vmem:[%s9470_s1 + $0x22f0] sm:$0xff]  ;;  %v7177_v49 = vpop.f32.mrf.mxu1  ;;  %v827_v10 = vld [vmem:[%s9470_s1 + $0x1838] sm:$0xff] }
 0x1f4   :  { %2422 = vmatpush.msrb.mxu1 %v393_v18  ;;  %2445 = vmatpush.msrb.mxu2 %v505_v14  ;;  %v939_v53 = vld [vmem:[%s9470_s1 + $0x1bb8] sm:$0xff] }
 0x1f5   :  { %2468 = vmatpush.msrb.mxu3 %v617_v42  ;;  %2476 = vmatpush.msra.mxu0 %v834_v20  ;;  %v1051_v18 = vld [vmem:[%s9470_s1 + $0x1f38] sm:$0xff]  ;;  %v7192_v42 = vpop.f32.mrf.mxu2  ;;  %v820_v20 = vld [vmem:[%s9470_s1 + $0x1800] sm:$0xff] }
 0x1f6   :  { %2377 = vmatmul.f32.vlgmr.msra.gmra.mxu3 %v6589_v13  ;;  %2499 = vmatpush.msra.mxu1 %v946_v19  ;;  %v1163_v14 = vld [vmem:[%s9470_s1 + $0x22b8] sm:$0xff]  ;;  %9487 = vst [vmem:[#allocation9_spill] sm:$0xff] %v7192_v42  ;;  %v932_v13 = vld [vmem:[%s9470_s1 + $0x1b80] sm:$0xff] }
 0x1f7   :  { %2522 = vmatpush.msra.mxu2 %v1058_v22  ;;  %2545 = vmatpush.msra.mxu3 %v1170_v11  ;;  %v1044_v19 = vld [vmem:[%s9470_s1 + $0x1f00] sm:$0xff]  ;;  %v813_v22 = vld [vmem:[%s9470_s1 + $0x17c8] sm:$0xff] }
 0x1f8   :  { %2477 = vmatpush.msra.mxu0 %v827_v10  ;;  %2500 = vmatpush.msra.mxu1 %v939_v53  ;;  %v925_v11 = vld [vmem:[%s9470_s1 + $0x1b48] sm:$0xff]  ;;  %v7212_v10 = vpop.f32.mrf.mxu3  ;;  %v7223_v42 = vpop.f32.mrf.mxu0 }
 0x1f9   :  { %2523 = vmatpush.msra.mxu2 %v1051_v18  ;;  %2546 = vmatpush.msra.mxu3 %v1163_v14  ;;  %9488 = vst [vmem:[#allocation10_spill] sm:$0xff] %v7212_v10  ;;  %v1037_v53 = vld [vmem:[%s9470_s1 + $0x1ec8] sm:$0xff]  ;;  %v806_v14 = vld [vmem:[%s9470_s1 + $0x1790] sm:$0xff] }
 0x1fa   :  { %2478 = vmatpush.msra.mxu0 %v820_v20  ;;  %2501 = vmatpush.msra.mxu1 %v932_v13  ;;  %v1149_v18 = vld [vmem:[%s9470_s1 + $0x2248] sm:$0xff]  ;;  %v918_v20 = vld [vmem:[%s9470_s1 + $0x1b10] sm:$0xff] }
 0x1fb   :  { %2524 = vmatpush.msra.mxu2 %v1044_v19  ;;  %2547 = vmatpush.msra.mxu3 %v1156_v60  ;;  %v1030_v13 = vld [vmem:[%s9470_s1 + $0x1e90] sm:$0xff]  ;;  %v799_v19 = vld [vmem:[%s9470_s1 + $0x1758] sm:$0xff] }
 0x1fc   :  { %2479 = vmatpush.msra.mxu0 %v813_v22  ;;  %2502 = vmatpush.msra.mxu1 %v925_v11  ;;  %v1142_v60 = vld [vmem:[%s9470_s1 + $0x2210] sm:$0xff]  ;;  %v911_v22 = vld [vmem:[%s9470_s1 + $0x1ad8] sm:$0xff]  ;;  %v7241_v11 = vpop.f32.mrf.mxu1 }
 0x1fd   :  { %2525 = vmatpush.msra.mxu2 %v1037_v53  ;;  %2548 = vmatpush.msra.mxu3 %v1149_v18  ;;  %v1023_v53 = vld [vmem:[%s9470_s1 + $0x1e58] sm:$0xff] }
 0x1fe   :  { %2357 = vmatmul.f32.gmra.mxu2 %v6640_v32  ;;  %2480 = vmatpush.msra.mxu0 %v806_v14  ;;  %v1135_v18 = vld [vmem:[%s9470_s1 + $0x21d8] sm:$0xff]  ;;  %v792_v32 = vld [vmem:[%s9470_s1 + $0x1720] sm:$0xff] }
 0x1ff   :  { %2503 = vmatpush.msra.mxu1 %v918_v20  ;;  %2526 = vmatpush.msra.mxu2 %v1030_v13  ;;  %v904_v14 = vld [vmem:[%s9470_s1 + $0x1aa0] sm:$0xff]  ;;  %v7255_v20 = vpop.f32.mrf.mxu2 }
 0x200   :  { %2549 = vmatpush.msra.mxu3 %v1142_v60  ;;  %2481 = vmatpush.msra.mxu0 %v799_v19  ;;  %9489 = vst [vmem:[#allocation11_spill] sm:$0xff] %v7255_v20  ;;  %v1016_v13 = vld [vmem:[%s9470_s1 + $0x1e20] sm:$0xff]  ;;  %v785_v19 = vld [vmem:[%s9470_s1 + $0x16e8] sm:$0xff]  ;;  %v7287_v10 = vpop.f32.mrf.mxu0 }
 0x201   :  { %2380 = vmatmul.f32.gmra.mxu3 %v6669_v40  ;;  %2504 = vmatpush.msra.mxu1 %v911_v22  ;;  %v1128_v60 = vld [vmem:[%s9470_s1 + $0x21a0] sm:$0xff]  ;;  %v897_v20 = vld [vmem:[%s9470_s1 + $0x1a68] sm:$0xff] }
 0x202   :  { %2527 = vmatpush.msra.mxu2 %v1023_v53  ;;  %2550 = vmatpush.msra.mxu3 %v1135_v18  ;;  %v1009_v40 = vld [vmem:[%s9470_s1 + $0x1de8] sm:$0xff]  ;;  %v7276_v53 = vpop.f32.mrf.mxu3  ;;  %v778_v18 = vld [vmem:[%s9470_s1 + $0x16b0] sm:$0xff] }
 0x203   :  { %2482 = vmatpush.msra.mxu0 %v792_v32  ;;  %2505 = vmatpush.msra.mxu1 %v904_v14  ;;  %v1121_v22 = vld [vmem:[%s9470_s1 + $0x2168] sm:$0xff]  ;;  %9490 = vst [vmem:[#allocation12_spill] sm:$0xff] %v7276_v53  ;;  %v890_v32 = vld [vmem:[%s9470_s1 + $0x1a30] sm:$0xff] }
 0x204   :  { %2528 = vmatpush.msra.mxu2 %v1016_v13  ;;  %2551 = vmatpush.msra.mxu3 %v1128_v60  ;;  %v1002_v14 = vld [vmem:[%s9470_s1 + $0x1db0] sm:$0xff]  ;;  %v883_v60 = vld [vmem:[%s9470_s1 + $0x19f8] sm:$0xff] }
 0x205   :  { %2483 = vmatpush.msra.mxu0 %v785_v19  ;;  %2506 = vmatpush.msra.mxu1 %v897_v20  ;;  %v1114_v13 = vld [vmem:[%s9470_s1 + $0x2130] sm:$0xff]  ;;  %v771_v20 = vld [vmem:[%s9470_s1 + $0x1678] sm:$0xff] }
 0x206   :  { %2529 = vmatpush.msra.mxu2 %v1009_v40  ;;  %2552 = vmatpush.msra.mxu3 %v1121_v22  ;;  %v995_v19 = vld [vmem:[%s9470_s1 + $0x1d78] sm:$0xff]  ;;  %v7302_v40 = vpop.f32.mrf.mxu1  ;;  %v764_v22 = vld [vmem:[%s9470_s1 + $0x1640] sm:$0xff] }
 0x207   :  { %2446 = vmatmul.f32.vlgmr.msrb.gmra.mxu2 %v6722_v50  ;;  %2484 = vmatpush.msra.mxu0 %v778_v18  ;;  %9491 = vst [vmem:[#allocation13_spill] sm:$0xff] %v7302_v40  ;;  %v1107_v50 = vld [vmem:[%s9470_s1 + $0x20f8] sm:$0xff]  ;;  %v876_v18 = vld [vmem:[%s9470_s1 + $0x19c0] sm:$0xff]  ;;  %v513_v40 = vld [vmem:[%s9470_s1 + $0xe68] sm:$0xff] }
 0x208   :  { %2507 = vmatpush.msra.mxu1 %v890_v32  ;;  %2530 = vmatpush.msra.mxu2 %v1002_v14  ;;  %v7315_v32 = vpop.f32.mrf.mxu2  ;;  %v757_v14 = vld [vmem:[%s9470_s1 + $0x1608] sm:$0xff] }
 0x209   :  { %2553 = vmatpush.msra.mxu3 %v1114_v13  ;;  %2400 = vmatmul.f32.vlgmr.msrb.gmra.mxu0 %v6543_v9  ;;  %9492 = vst [vmem:[#allocation14_spill] sm:$0xff] %v7315_v32  ;;  %v988_v9 = vld [vmem:[%s9470_s1 + $0x1d40] sm:$0xff]  ;;  %v869_v13 = vld [vmem:[%s9470_s1 + $0x1988] sm:$0xff]  ;;  %v751_v32 = vld [vmem:[%s9470_s1 + $0x15d8] sm:$0xff] }
 0x20a   :  { %2469 = vmatmul.f32.vlgmr.msrb.gmra.mxu3 %v6751_v12  ;;  %2485 = vmatpush.msra.mxu0 %v771_v20  ;;  %v1100_v12 = vld [vmem:[%s9470_s1 + $0x20c0] sm:$0xff]  ;;  %v981_v20 = vld [vmem:[%s9470_s1 + $0x1d08] sm:$0xff] }
 0x20b   :  { %2508 = vmatpush.msra.mxu1 %v883_v60  ;;  %2531 = vmatpush.msra.mxu2 %v995_v19  ;;  %v1093_v60 = vld [vmem:[%s9470_s1 + $0x2088] sm:$0xff]  ;;  %v7336_v19 = vpop.f32.mrf.mxu3 }
 0x20c   :  { %2554 = vmatpush.msra.mxu3 %v1107_v50  ;;  %2423 = vmatmul.f32.vlgmr.msrb.gmra.mxu1 %v6569_v0  ;;  %9493 = vst [vmem:[#allocation15_spill] sm:$0xff] %v7336_v19  ;;  %v7338_v0 = vpop.f32.mrf.mxu0  ;;  %v750_v50 = vld [vmem:[%s9470_s1 + $0x15d0] sm:$0xff] }
 0x20d   :  { %2486 = vmatpush.msra.mxu0 %v764_v22  ;;  %2509 = vmatpush.msra.mxu1 %v876_v18  ;;  %9494 = vst [vmem:[#allocation16_spill] sm:$0xff] %v7338_v0  ;;  %v862_v22 = vld [vmem:[%s9470_s1 + $0x1950] sm:$0xff]  ;;  %v632_v0 = vld [vmem:[%s9470_s1 + $0x1220] sm:$0xff] }
 0x20e   :  { %2532 = vmatpush.msra.mxu2 %v988_v9  ;;  %2555 = vmatpush.msra.mxu3 %v1100_v12  ;;  %v974_v18 = vld [vmem:[%s9470_s1 + $0x1cd0] sm:$0xff]  ;;  %v7352_v12 = vpop.f32.mrf.mxu1 }
 0x20f   :  { %2487 = vmatpush.msra.mxu0 %v757_v14  ;;  %2510 = vmatpush.msra.mxu1 %v869_v13  ;;  %v1086_v9 = vld [vmem:[%s9470_s1 + $0x2050] sm:$0xff]  ;;  %9495 = vst [vmem:[#allocation17_spill] sm:$0xff] %v7352_v12  ;;  %v743_v14 = vld [vmem:[%s9470_s1 + $0x1598] sm:$0xff]  ;;  %v940_v12 = vld [vmem:[%s9470_s1 + $0x1bc0] sm:$0xff] }
 0x210   :  { %2533 = vmatpush.msra.mxu2 %v981_v20  ;;  %2556 = vmatpush.msra.mxu3 %v1093_v60  ;;  %v855_v13 = vld [vmem:[%s9470_s1 + $0x1918] sm:$0xff]  ;;  %v7364_v60 = vpop.f32.mrf.mxu2  ;;  %v170_v19 = vld [vmem:[%s9470_s1 + $0x3b0] sm:$0xff] }
 0x211   :  { %2449 = vmatmul.f32.gmra.mxu2 %v6855_v3  ;;  %2488 = vmatpush.msra.mxu0 %v750_v50  ;;  %v967_v20 = vld [vmem:[%s9470_s1 + $0x1c98] sm:$0xff]  ;;  %9496 = vst [vmem:[#allocation18_spill] sm:$0xff] %v7364_v60  ;;  %v736_v50 = vld [vmem:[%s9470_s1 + $0x1560] sm:$0xff] }
 0x212   :  { %2511 = vmatpush.msra.mxu1 %v862_v22  ;;  %2534 = vmatpush.msra.mxu2 %v974_v18  ;;  %v1079_v3 = vld [vmem:[%s9470_s1 + $0x2018] sm:$0xff]  ;;  %v848_v22 = vld [vmem:[%s9470_s1 + $0x18e0] sm:$0xff] }
 0x213   :  { %2557 = vmatpush.msra.mxu3 %v1086_v9  ;;  %2403 = vmatmul.f32.gmra.mxu0 %v6623_v23  ;;  %v960_v23 = vld [vmem:[%s9470_s1 + $0x1c60] sm:$0xff]  ;;  %v729_v9 = vld [vmem:[%s9470_s1 + $0x1528] sm:$0xff]  ;;  %v415_v60 = vld [vmem:[%s9470_s1 + $0xb58] sm:$0xff] }
 0x214   :  { %2472 = vmatmul.f32.gmra.mxu3 %v6873_v6  ;;  %2489 = vmatpush.msra.mxu0 %v743_v14  ;;  %v1072_v18 = vld [vmem:[%s9470_s1 + $0x1fe0] sm:$0xff]  ;;  %v7383_v6 = vpop.f32.mrf.mxu3  ;;  %v841_v14 = vld [vmem:[%s9470_s1 + $0x18a8] sm:$0xff] }
 0x215   :  { %2512 = vmatpush.msra.mxu1 %v855_v13  ;;  %2535 = vmatpush.msra.mxu2 %v967_v20  ;;  %9497 = vst [vmem:[#allocation19_spill] sm:$0xff] %v7383_v6  ;;  %v953_v13 = vld [vmem:[%s9470_s1 + $0x1c28] sm:$0xff] }
 0x216   :  { %2558 = vmatpush.msra.mxu3 %v1079_v3  ;;  %2426 = vmatmul.f32.gmra.mxu1 %v6649_v34  ;;  %v1065_v20 = vld [vmem:[%s9470_s1 + $0x1fa8] sm:$0xff]  ;;  %v7398_v3 = vpop.f32.mrf.mxu0  ;;  %v163_v34 = vld [vmem:[%s9470_s1 + $0x378] sm:$0xff] }
 0x217   :  { %2490 = vmatpush.msra.mxu0 %v736_v50  ;;  %2513 = vmatpush.msra.mxu1 %v848_v22  ;;  %9498 = vst [vmem:[#allocation20_spill] sm:$0xff] %v7398_v3  ;;  %v275_v50 = vld [vmem:[%s9470_s1 + $0x6f8] sm:$0xff]  ;;  %v177_v3 = vld [vmem:[%s9470_s1 + $0x3e8] sm:$0xff] }
 0x218   :  { %2536 = vmatpush.msra.mxu2 %v960_v23  ;;  %2559 = vmatpush.msra.mxu3 %v1072_v18  ;;  %v387_v22 = vld [vmem:[%s9470_s1 + $0xa78] sm:$0xff]  ;;  %v7412_v18 = vpop.f32.mrf.mxu1  ;;  %v7414_v6 = vpop.f32.mrf.mxu2 }
 0x219   :  { %2491 = vmatpush.msra.mxu0 %v729_v9  ;;  %2514 = vmatpush.msra.mxu1 %v841_v14  ;;  %v499_v23 = vld [vmem:[%s9470_s1 + $0xdf8] sm:$0xff]  ;;  %9499 = vst [vmem:[#allocation21_spill] sm:$0xff] %v7412_v18  ;;  %v156_v9 = vld [vmem:[%s9470_s1 + $0x340] sm:$0xff]  ;;  %v422_v18 = vld [vmem:[%s9470_s1 + $0xb90] sm:$0xff] }
 0x21a   :  { %2537 = vmatpush.msra.mxu2 %v953_v13  ;;  %2560 = vmatpush.msra.mxu3 %v1065_v20  ;;  %v268_v14 = vld [vmem:[%s9470_s1 + $0x6c0] sm:$0xff] }
 0x21b   :  { %2538 = vmatmul.f32.vlgmr.msra.gmra.mxu2 %v6924_v51  ;;  %2568 = vmatpush.msrb.mxu0 %v163_v34  ;;  %v380_v13 = vld [vmem:[%s9470_s1 + $0xa40] sm:$0xff]  ;;  %v149_v34 = vld [vmem:[%s9470_s1 + $0x308] sm:$0xff] }
 0x21c   :  { %2591 = vmatpush.msrb.mxu1 %v275_v50  ;;  %2614 = vmatpush.msrb.mxu2 %v387_v22  ;;  %v492_v51 = vld [vmem:[%s9470_s1 + $0xdc0] sm:$0xff]  ;;  %v7430_v20 = vpop.f32.mrf.mxu3  ;;  %v261_v50 = vld [vmem:[%s9470_s1 + $0x688] sm:$0xff] }
 0x21d   :  { %2637 = vmatpush.msrb.mxu3 %v499_v23  ;;  %2492 = vmatmul.f32.vlgmr.msra.gmra.mxu0 %v6705_v25  ;;  %v373_v25 = vld [vmem:[%s9470_s1 + $0xa08] sm:$0xff]  ;;  %v254_v23 = vld [vmem:[%s9470_s1 + $0x650] sm:$0xff] }
 0x21e   :  { %2561 = vmatmul.f32.vlgmr.msra.gmra.mxu3 %v6953_v47  ;;  %2569 = vmatpush.msrb.mxu0 %v156_v9  ;;  %v485_v22 = vld [vmem:[%s9470_s1 + $0xd88] sm:$0xff]  ;;  %v142_v47 = vld [vmem:[%s9470_s1 + $0x2d0] sm:$0xff] }
 0x21f   :  { %2592 = vmatpush.msrb.mxu1 %v268_v14  ;;  %2615 = vmatpush.msrb.mxu2 %v380_v13  ;;  %v366_v9 = vld [vmem:[%s9470_s1 + $0x9d0] sm:$0xff]  ;;  %v7458_v13 = vpop.f32.mrf.mxu0 }
 0x220   :  { %2638 = vmatpush.msrb.mxu3 %v492_v51  ;;  %2515 = vmatmul.f32.vlgmr.msra.gmra.mxu1 %v6731_v4  ;;  %v478_v14 = vld [vmem:[%s9470_s1 + $0xd50] sm:$0xff]  ;;  %9500 = vst [vmem:[#allocation22_spill] sm:$0xff] %v7458_v13  ;;  %v135_v4 = vld [vmem:[%s9470_s1 + $0x298] sm:$0xff]  ;;  %v205_v13 = vld [vmem:[%s9470_s1 + $0x4c8] sm:$0xff] }
 0x221   :  { %2570 = vmatpush.msrb.mxu0 %v149_v34  ;;  %2593 = vmatpush.msrb.mxu1 %v261_v50  ;;  %v247_v51 = vld [vmem:[%s9470_s1 + $0x618] sm:$0xff] }
 0x222   :  { %2616 = vmatpush.msrb.mxu2 %v373_v25  ;;  %2639 = vmatpush.msrb.mxu3 %v485_v22  ;;  %v359_v34 = vld [vmem:[%s9470_s1 + $0x998] sm:$0xff]  ;;  %v7472_v25 = vpop.f32.mrf.mxu1  ;;  %v7474_v22 = vpop.f32.mrf.mxu2 }
 0x223   :  { %2571 = vmatpush.msrb.mxu0 %v142_v47  ;;  %2594 = vmatpush.msrb.mxu1 %v254_v23  ;;  %v471_v50 = vld [vmem:[%s9470_s1 + $0xd18] sm:$0xff]  ;;  %9501 = vst [vmem:[#allocation23_spill] sm:$0xff] %v7472_v25  ;;  %v128_v47 = vld [vmem:[%s9470_s1 + $0x260] sm:$0xff] }
 0x224   :  { %2617 = vmatpush.msrb.mxu2 %v366_v9  ;;  %2640 = vmatpush.msrb.mxu3 %v478_v14  ;;  %v240_v23 = vld [vmem:[%s9470_s1 + $0x5e0] sm:$0xff]  ;;  %v7490_v14 = vpop.f32.mrf.mxu3 }
 0x225   :  { %2541 = vmatmul.f32.gmra.mxu2 %v7001_v44  ;;  %2572 = vmatpush.msrb.mxu0 %v135_v4  ;;  %v352_v9 = vld [vmem:[%s9470_s1 + $0x960] sm:$0xff]  ;;  %v121_v4 = vld [vmem:[%s9470_s1 + $0x228] sm:$0xff] }
 0x226   :  { %2595 = vmatpush.msrb.mxu1 %v247_v51  ;;  %2618 = vmatpush.msrb.mxu2 %v359_v34  ;;  %v464_v44 = vld [vmem:[%s9470_s1 + $0xce0] sm:$0xff]  ;;  %v233_v51 = vld [vmem:[%s9470_s1 + $0x5a8] sm:$0xff] }
 0x227   :  { %2641 = vmatpush.msrb.mxu3 %v471_v50  ;;  %2495 = vmatmul.f32.gmra.mxu0 %v6907_v45  ;;  %v345_v45 = vld [vmem:[%s9470_s1 + $0x928] sm:$0xff]  ;;  %v114_v50 = vld [vmem:[%s9470_s1 + $0x1f0] sm:$0xff]  ;;  %v212_v25 = vld [vmem:[%s9470_s1 + $0x500] sm:$0xff] }
 0x228   :  { %2564 = vmatmul.f32.gmra.mxu3 %v7021_v27  ;;  %2573 = vmatpush.msrb.mxu0 %v128_v47  ;;  %v457_v34 = vld [vmem:[%s9470_s1 + $0xca8] sm:$0xff]  ;;  %v7505_v27 = vpop.f32.mrf.mxu0  ;;  %v226_v47 = vld [vmem:[%s9470_s1 + $0x570] sm:$0xff] }
 0x229   :  { %2596 = vmatpush.msrb.mxu1 %v240_v23  ;;  %2619 = vmatpush.msrb.mxu2 %v352_v9  ;;  %v338_v23 = vld [vmem:[%s9470_s1 + $0x8f0] sm:$0xff] }
 0x22a   :  { %2642 = vmatpush.msrb.mxu3 %v464_v44  ;;  %2518 = vmatmul.f32.gmra.mxu1 %v6935_v21  ;;  %v450_v9 = vld [vmem:[%s9470_s1 + $0xc70] sm:$0xff]  ;;  %v107_v21 = vld [vmem:[%s9470_s1 + $0x1b8] sm:$0xff] }
 0x22b   :  { %2574 = vmatpush.msrb.mxu0 %v121_v4  ;;  %2597 = vmatpush.msrb.mxu1 %v233_v51  ;;  %v219_v44 = vld [vmem:[%s9470_s1 + $0x538] sm:$0xff]  ;;  %v7526_v4 = vpop.f32.mrf.mxu1 }
 0x22c   :  { %2620 = vmatpush.msrb.mxu2 %v345_v45  ;;  %2643 = vmatpush.msrb.mxu3 %v457_v34  ;;  %v331_v51 = vld [vmem:[%s9470_s1 + $0x8b8] sm:$0xff]  ;;  %v100_v34 = vld [vmem:[%s9470_s1 + $0x180] sm:$0xff] }
 0x22d   :  { %2575 = vmatpush.msrb.mxu0 %v114_v50  ;;  %2598 = vmatpush.msrb.mxu1 %v226_v47  ;;  %v443_v45 = vld [vmem:[%s9470_s1 + $0xc38] sm:$0xff]  ;;  %v7540_v50 = vpop.f32.mrf.mxu2  ;;  %v324_v47 = vld [vmem:[%s9470_s1 + $0x880] sm:$0xff] }
 0x22e   :  { %2621 = vmatpush.msrb.mxu2 %v338_v23  ;;  %2644 = vmatpush.msrb.mxu3 %v450_v9  ;;  %v436_v23 = vld [vmem:[%s9470_s1 + $0xc00] sm:$0xff]  ;;  %v93_v9 = vld [vmem:[%s9470_s1 + $0x148] sm:$0xff] }
 0x22f   :  { %2576 = vmatpush.msrb.mxu0 %v107_v21  ;;  %2599 = vmatpush.msrb.mxu1 %v219_v44  ;;  %v317_v21 = vld [vmem:[%s9470_s1 + $0x848] sm:$0xff] }
 0x230   :  { %2622 = vmatpush.msrb.mxu2 %v331_v51  ;;  %2645 = vmatpush.msrb.mxu3 %v443_v45  ;;  %v429_v44 = vld [vmem:[%s9470_s1 + $0xbc8] sm:$0xff]  ;;  %v7560_v51 = vpop.f32.mrf.mxu3  ;;  %v86_v45 = vld [vmem:[%s9470_s1 + $0x110] sm:$0xff] }
 0x231   :  { %2577 = vmatpush.msrb.mxu0 %v100_v34  ;;  %2600 = vmatpush.msrb.mxu1 %v212_v25  ;;  %9502 = vst [vmem:[#allocation24_spill] sm:$0xff] %v7560_v51  ;;  %v198_v25 = vld [vmem:[%s9470_s1 + $0x490] sm:$0xff] }
 0x232   :  { %2623 = vmatpush.msrb.mxu2 %v324_v47  ;;  %2646 = vmatpush.msrb.mxu3 %v436_v23  ;;  %v310_v34 = vld [vmem:[%s9470_s1 + $0x810] sm:$0xff]  ;;  %v7574_v47 = vpop.f32.mrf.mxu0  ;;  %v79_v23 = vld [vmem:[%s9470_s1 + $0xd8] sm:$0xff] }
 0x233   :  { %2578 = vmatpush.msrb.mxu0 %v93_v9  ;;  %2601 = vmatpush.msrb.mxu1 %v205_v13  ;;  %9503 = vst [vmem:[#allocation25_spill] sm:$0xff] %v7574_v47  ;;  %v191_v13 = vld [vmem:[%s9470_s1 + $0x458] sm:$0xff] }
 0x234   :  { %2624 = vmatpush.msrb.mxu2 %v317_v21  ;;  %2647 = vmatpush.msrb.mxu3 %v429_v44  ;;  %v303_v9 = vld [vmem:[%s9470_s1 + $0x7d8] sm:$0xff]  ;;  %v72_v21 = vld [vmem:[%s9470_s1 + $0xa0] sm:$0xff] }
 0x235   :  { %2579 = vmatpush.msrb.mxu0 %v86_v45  ;;  %2602 = vmatpush.msrb.mxu1 %v198_v25  ;;  %v184_v44 = vld [vmem:[%s9470_s1 + $0x420] sm:$0xff]  ;;  %v7594_v45 = vpop.f32.mrf.mxu1 }
 0x236   :  { %2625 = vmatpush.msrb.mxu2 %v310_v34  ;;  %2648 = vmatpush.msrb.mxu3 %v422_v18  ;;  %9504 = vst [vmem:[#allocation26_spill] sm:$0xff] %v7594_v45  ;;  %v296_v25 = vld [vmem:[%s9470_s1 + $0x7a0] sm:$0xff]  ;;  %v65_v34 = vld [vmem:[%s9470_s1 + $0x68] sm:$0xff] }
 0x237   :  { %2580 = vmatpush.msrb.mxu0 %v79_v23  ;;  %2603 = vmatpush.msrb.mxu1 %v191_v13  ;;  %v408_v18 = vld [vmem:[%s9470_s1 + $0xb20] sm:$0xff]  ;;  %v7608_v23 = vpop.f32.mrf.mxu2  ;;  %v289_v13 = vld [vmem:[%s9470_s1 + $0x768] sm:$0xff] }
 0x238   :  { %2626 = vmatpush.msrb.mxu2 %v303_v9  ;;  %2649 = vmatpush.msrb.mxu3 %v415_v60  ;;  %9505 = vst [vmem:[#allocation27_spill] sm:$0xff] %v7608_v23  ;;  %v401_v60 = vld [vmem:[%s9470_s1 + $0xae8] sm:$0xff]  ;;  %v58_v9 = vld [vmem:[%s9470_s1 + $0x30] sm:$0xff]  ;;  %v576_v23 = vld [vmem:[%s9470_s1 + $0x1060] sm:$0xff] }
 0x239   :  { %2581 = vmatpush.msrb.mxu0 %v72_v21  ;;  %2604 = vmatpush.msrb.mxu1 %v184_v44  ;;  %v282_v21 = vld [vmem:[%s9470_s1 + $0x730] sm:$0xff]  ;;  %v744_v45 = vld [vmem:[%s9470_s1 + $0x15a0] sm:$0xff] }
 0x23a   :  { %2627 = vmatpush.msrb.mxu2 %v296_v25  ;;  %2650 = vmatpush.msrb.mxu3 %v408_v18  ;;  %v394_v44 = vld [vmem:[%s9470_s1 + $0xab0] sm:$0xff]  ;;  %v7628_v25 = vpop.f32.mrf.mxu3  ;;  %v611_v18 = vld [vmem:[%s9470_s1 + $0x1178] sm:$0xff] }
 0x23b   :  { %2582 = vmatpush.msrb.mxu0 %v65_v34  ;;  %2605 = vmatpush.msrb.mxu1 %v177_v3  ;;  %9506 = vst [vmem:[#allocation28_spill] sm:$0xff] %v7628_v25  ;;  %v723_v3 = vld [vmem:[%s9470_s1 + $0x14f8] sm:$0xff] }
 0x23c   :  { %2628 = vmatpush.msrb.mxu2 %v289_v13  ;;  %2651 = vmatpush.msrb.mxu3 %v401_v60  ;;  %v835_v34 = vld [vmem:[%s9470_s1 + $0x1878] sm:$0xff]  ;;  %v7642_v13 = vpop.f32.mrf.mxu0  ;;  %v604_v60 = vld [vmem:[%s9470_s1 + $0x1140] sm:$0xff] }
 0x23d   :  { %2583 = vmatpush.msrb.mxu0 %v58_v9  ;;  %2606 = vmatpush.msrb.mxu1 %v170_v19  ;;  %v947_v25 = vld [vmem:[%s9470_s1 + $0x1bf8] sm:$0xff]  ;;  %9507 = vst [vmem:[#allocation29_spill] sm:$0xff] %v7642_v13  ;;  %v716_v19 = vld [vmem:[%s9470_s1 + $0x14c0] sm:$0xff] }
 0x23e   :  { %2629 = vmatpush.msrb.mxu2 %v282_v21  ;;  %2652 = vmatpush.msrb.mxu3 %v394_v44  ;;  %v828_v9 = vld [vmem:[%s9470_s1 + $0x1840] sm:$0xff]  ;;  %v597_v21 = vld [vmem:[%s9470_s1 + $0x1108] sm:$0xff]  ;;  %v863_v13 = vld [vmem:[%s9470_s1 + $0x1958] sm:$0xff] }
 0x23f   :  { %2660 = vmatpush.msra.mxu0 %v611_v18  ;;  %2683 = vmatpush.msra.mxu1 %v723_v3  ;;  %v709_v44 = vld [vmem:[%s9470_s1 + $0x1488] sm:$0xff]  ;;  %v7662_v18 = vpop.f32.mrf.mxu1 }
 0x240   :  { %2706 = vmatpush.msra.mxu2 %v835_v34  ;;  %2729 = vmatpush.msra.mxu3 %v947_v25  ;;  %9508 = vst [vmem:[#allocation30_spill] sm:$0xff] %v7662_v18  ;;  %v821_v3 = vld [vmem:[%s9470_s1 + $0x1808] sm:$0xff]  ;;  %v590_v34 = vld [vmem:[%s9470_s1 + $0x10d0] sm:$0xff] }
 0x241   :  { %2661 = vmatpush.msra.mxu0 %v604_v60  ;;  %2684 = vmatpush.msra.mxu1 %v716_v19  ;;  %v933_v25 = vld [vmem:[%s9470_s1 + $0x1b88] sm:$0xff]  ;;  %v702_v18 = vld [vmem:[%s9470_s1 + $0x1450] sm:$0xff]  ;;  %v7676_v60 = vpop.f32.mrf.mxu2 }
 0x242   :  { %2707 = vmatpush.msra.mxu2 %v828_v9  ;;  %2730 = vmatpush.msra.mxu3 %v940_v12  ;;  %9509 = vst [vmem:[#allocation31_spill] sm:$0xff] %v7676_v60  ;;  %v814_v19 = vld [vmem:[%s9470_s1 + $0x17d0] sm:$0xff]  ;;  %v583_v9 = vld [vmem:[%s9470_s1 + $0x1098] sm:$0xff] }
 0x243   :  { %2662 = vmatpush.msra.mxu0 %v597_v21  ;;  %2685 = vmatpush.msra.mxu1 %v709_v44  ;;  %v926_v12 = vld [vmem:[%s9470_s1 + $0x1b50] sm:$0xff]  ;;  %v695_v60 = vld [vmem:[%s9470_s1 + $0x1418] sm:$0xff] }
 0x244   :  { %2708 = vmatpush.msra.mxu2 %v821_v3  ;;  %2731 = vmatpush.msra.mxu3 %v933_v25  ;;  %v807_v21 = vld [vmem:[%s9470_s1 + $0x1798] sm:$0xff]  ;;  %v7696_v3 = vpop.f32.mrf.mxu3  ;;  %v7698_v25 = vpop.f32.mrf.mxu0 }
 0x245   :  { %2663 = vmatpush.msra.mxu0 %v590_v34  ;;  %2686 = vmatpush.msra.mxu1 %v702_v18  ;;  %v919_v44 = vld [vmem:[%s9470_s1 + $0x1b18] sm:$0xff]  ;;  %9510 = vst [vmem:[#allocation32_spill] sm:$0xff] %v7696_v3  ;;  %v688_v18 = vld [vmem:[%s9470_s1 + $0x13e0] sm:$0xff] }
 0x246   :  { %9511 = vst [vmem:[#allocation33_spill] sm:$0xff] %v7698_v25  ;;  %2709 = vmatpush.msra.mxu2 %v814_v19  ;;  %2732 = vmatpush.msra.mxu3 %v926_v12  ;;  %v800_v34 = vld [vmem:[%s9470_s1 + $0x1760] sm:$0xff]  ;;  %v569_v19 = vld [vmem:[%s9470_s1 + $0x1028] sm:$0xff] }
 0x247   :  { %2664 = vmatpush.msra.mxu0 %v583_v9  ;;  %2687 = vmatpush.msra.mxu1 %v695_v60  ;;  %v912_v3 = vld [vmem:[%s9470_s1 + $0x1ae0] sm:$0xff]  ;;  %v681_v12 = vld [vmem:[%s9470_s1 + $0x13a8] sm:$0xff]  ;;  %v7718_v9 = vpop.f32.mrf.mxu1 }
 0x248   :  { %2710 = vmatpush.msra.mxu2 %v807_v21  ;;  %2733 = vmatpush.msra.mxu3 %v919_v44  ;;  %9512 = vst [vmem:[#allocation34_spill] sm:$0xff] %v7718_v9  ;;  %v793_v60 = vld [vmem:[%s9470_s1 + $0x1728] sm:$0xff]  ;;  %v562_v44 = vld [vmem:[%s9470_s1 + $0xff0] sm:$0xff]  ;;  %v548_v25 = vld [vmem:[%s9470_s1 + $0xf80] sm:$0xff] }
 0x249   :  { %2665 = vmatpush.msra.mxu0 %v576_v23  ;;  %2688 = vmatpush.msra.mxu1 %v688_v18  ;;  %v905_v21 = vld [vmem:[%s9470_s1 + $0x1aa8] sm:$0xff]  ;;  %v674_v9 = vld [vmem:[%s9470_s1 + $0x1370] sm:$0xff]  ;;  %v7732_v23 = vpop.f32.mrf.mxu2 }
 0x24a   :  { %2711 = vmatpush.msra.mxu2 %v800_v34  ;;  %2734 = vmatpush.msra.mxu3 %v912_v3  ;;  %9513 = vst [vmem:[#allocation35_spill] sm:$0xff] %v7732_v23  ;;  %v786_v18 = vld [vmem:[%s9470_s1 + $0x16f0] sm:$0xff]  ;;  %v555_v34 = vld [vmem:[%s9470_s1 + $0xfb8] sm:$0xff] }
 0x24b   :  { %2666 = vmatpush.msra.mxu0 %v569_v19  ;;  %2689 = vmatpush.msra.mxu1 %v681_v12  ;;  %v898_v3 = vld [vmem:[%s9470_s1 + $0x1a70] sm:$0xff]  ;;  %v667_v23 = vld [vmem:[%s9470_s1 + $0x1338] sm:$0xff] }
 0x24c   :  { %2712 = vmatpush.msra.mxu2 %v793_v60  ;;  %2735 = vmatpush.msra.mxu3 %v905_v21  ;;  %v779_v19 = vld [vmem:[%s9470_s1 + $0x16b8] sm:$0xff]  ;;  %v7752_v60 = vpop.f32.mrf.mxu3  ;;  %v7754_v21 = vpop.f32.mrf.mxu0 }
 0x24d   :  { %2667 = vmatpush.msra.mxu0 %v562_v44  ;;  %2690 = vmatpush.msra.mxu1 %v674_v9  ;;  %v891_v12 = vld [vmem:[%s9470_s1 + $0x1a38] sm:$0xff]  ;;  %9514 = vst [vmem:[#allocation36_spill] sm:$0xff] %v7752_v60  ;;  %v660_v9 = vld [vmem:[%s9470_s1 + $0x1300] sm:$0xff] }
 0x24e   :  { %2713 = vmatpush.msra.mxu2 %v786_v18  ;;  %2736 = vmatpush.msra.mxu3 %v898_v3  ;;  %v772_v44 = vld [vmem:[%s9470_s1 + $0x1680] sm:$0xff]  ;;  %v541_v18 = vld [vmem:[%s9470_s1 + $0xf48] sm:$0xff] }
 0x24f   :  { %2668 = vmatpush.msra.mxu0 %v555_v34  ;;  %2691 = vmatpush.msra.mxu1 %v667_v23  ;;  %v884_v60 = vld [vmem:[%s9470_s1 + $0x1a00] sm:$0xff]  ;;  %v7771_v3 = vpop.f32.mrf.mxu1  ;;  %v653_v23 = vld [vmem:[%s9470_s1 + $0x12c8] sm:$0xff] }
 0x250   :  { %2714 = vmatpush.msra.mxu2 %v779_v19  ;;  %2737 = vmatpush.msra.mxu3 %v891_v12  ;;  %v765_v34 = vld [vmem:[%s9470_s1 + $0x1648] sm:$0xff] }
 0x251   :  { %2669 = vmatpush.msra.mxu0 %v548_v25  ;;  %2692 = vmatpush.msra.mxu1 %v660_v9  ;;  %v877_v19 = vld [vmem:[%s9470_s1 + $0x19c8] sm:$0xff]  ;;  %v7782_v12 = vpop.f32.mrf.mxu2  ;;  %v3923_v25 = vld [vmem:[%s9471_s0 + $0x10] sm:$0xff] }
 0x252   :  { %2715 = vmatpush.msra.mxu2 %v772_v44  ;;  %2738 = vmatpush.msra.mxu3 %v884_v60  ;;  %v534_v9 = vld [vmem:[%s9470_s1 + $0xf10] sm:$0xff] }
 0x253   :  { %2630 = vmatmul.f32.vlgmr.msrb.gmra.mxu2 %v3923_v25  ;;  %2670 = vmatpush.msra.mxu0 %v541_v18  ;;  %v646_v60 = vld [vmem:[%s9470_s1 + $0x1290] sm:$0xff]  ;;  %v3924_v25 = vld [vmem:[%s9471_s0] sm:$0xff] }
 0x254   :  { %2693 = vmatpush.msra.mxu1 %v653_v23  ;;  %2716 = vmatpush.msra.mxu2 %v765_v34  ;;  %v758_v44 = vld [vmem:[%s9470_s1 + $0x1610] sm:$0xff]  ;;  %v7802_v23 = vpop.f32.mrf.mxu3  ;;  %v3925_v34 = vld [vmem:[%s9471_s0 + $0x18] sm:$0xff] }
 0x255   :  { %2739 = vmatpush.msra.mxu3 %v877_v19  ;;  %2584 = vmatmul.f32.vlgmr.msrb.gmra.mxu0 %v3924_v25  ;;  %v870_v18 = vld [vmem:[%s9470_s1 + $0x1990] sm:$0xff]  ;;  %v527_v19 = vld [vmem:[%s9470_s1 + $0xed8] sm:$0xff] }
 0x256   :  { %2653 = vmatmul.f32.vlgmr.msrb.gmra.mxu3 %v3925_v34  ;;  %2671 = vmatpush.msra.mxu0 %v534_v9  ;;  %v639_v25 = vld [vmem:[%s9470_s1 + $0x1258] sm:$0xff]  ;;  %v7822_v9 = vld [vmem:[%s9472_s2] sm:$0xff]  ;;  %v7824_v34 = vpop.f32.mrf.mxu0 }
 0x257   :  { %2694 = vmatpush.msra.mxu1 %v646_v60  ;;  %2717 = vmatpush.msra.mxu2 %v758_v44  ;;  %v3926_v60 = vld [vmem:[%s9471_s0 + $0x8] sm:$0xff]  ;;  %v520_v44 = vld [vmem:[%s9470_s1 + $0xea0] sm:$0xff]  ;;  %v1174_v51 = vperm.slane %v7822_v9, 0  ;;  %v9516_v53 = vperm.slane %v7822_v9, 1 }
 0x258   :  { %2740 = vmatpush.msra.mxu3 %v870_v18  ;;  %2607 = vmatmul.f32.vlgmr.msrb.gmra.mxu1 %v3926_v60  ;;  %v856_v18 = vld [vmem:[%s9470_s1 + $0x1920] sm:$0xff]  ;;  %v737_v60 = vld [vmem:[%s9470_s1 + $0x1568] sm:$0xff] }
 0x259   :  { %2672 = vmatpush.msra.mxu0 %v527_v19  ;;  %2695 = vmatpush.msra.mxu1 %v639_v25  ;;  %v7846_v19 = vpop.f32.mrf.mxu1  ;;  %v625_v25 = vld [vmem:[%s9470_s1 + $0x11e8] sm:$0xff] }
 0x25a   :  { %2718 = vmatpush.msra.mxu2 %v751_v32  ;;  %2741 = vmatpush.msra.mxu3 %v863_v13  ;;  %v849_v32 = vld [vmem:[%s9470_s1 + $0x18e8] sm:$0xff]  ;;  %v7857_v13 = vpop.f32.mrf.mxu2 }
 0x25b   :  { %2673 = vmatpush.msra.mxu0 %v520_v44  ;;  %2696 = vmatpush.msra.mxu1 %v632_v0  ;;  %9515 = vst [vmem:[#allocation37_spill] sm:$0xff] %v7857_v13  ;;  %v3927_v0 = vld [vmem:[%s9471_s0 + $0x60] sm:$0xff]  ;;  %v506_v44 = vld [vmem:[%s9470_s1 + $0xe30] sm:$0xff] }
 0x25c   :  { %2719 = vmatpush.msra.mxu2 %v744_v45  ;;  %2742 = vmatpush.msra.mxu3 %v856_v18  ;;  %v1436_v45 = vadd.f32 %v6788_v28, %v9516_v53  ;;  %v618_v18 = vld [vmem:[%s9470_s1 + $0x11b0] sm:$0xff]  ;;  %v1059_v53 = vld [vmem:[%s9470_s1 + $0x1f78] sm:$0xff] }
 0x25d   :  { %2633 = vmatmul.f32.gmra.mxu2 %v3927_v0  ;;  %2674 = vmatpush.msra.mxu0 %v513_v40  ;;  %v730_v13 = vld [vmem:[%s9470_s1 + $0x1530] sm:$0xff]  ;;  %v1206_v40 = vadd.f32 %v6470_v38, %v1174_v51  ;;  %v3929_v38 = vld [vmem:[%s9471_s0 + $0x68] sm:$0xff] }
 0x25e   :  { %2697 = vmatpush.msra.mxu1 %v625_v25  ;;  %2720 = vmatpush.msra.mxu2 %v737_v60  ;;  %v3928_v0 = vld [vmem:[%s9471_s0 + $0x50] sm:$0xff]  ;;  %v7884_v60 = vpop.f32.mrf.mxu3  ;;  %v1171_v25 = vld [vmem:[%s9470_s1 + $0x22f8] sm:$0xff]  ;;  %v7899_v47 = vpop.f32.mrf.mxu0 }
 0x25f   :  { %2743 = vmatpush.msra.mxu3 %v849_v32  ;;  %2587 = vmatmul.f32.gmra.mxu0 %v3928_v0  ;;  %v842_v28 = vld [vmem:[%s9470_s1 + $0x18b0] sm:$0xff]  ;;  %9517 = vst [vmem:[#allocation38_spill] sm:$0xff] %v7884_v60  ;;  %v2857_v32 = vld [vmem:[%s9473_s3 + $0x168] sm:$0xff]  ;;  %v1459_v60 = vadd.f32 %v6808_v5, %v1436_v45 }
 0x260   :  { %2656 = vmatmul.f32.gmra.mxu3 %v3929_v38  ;;  %2675 = vmatpush.msra.mxu0 %v506_v44  ;;  %v2905_v0 = vld [vmem:[%s9473_s3 + $0x2e8] sm:$0xff]  ;;  %v1052_v44 = vld [vmem:[%s9470_s1 + $0x1f40] sm:$0xff]  ;;  %v2854_v5 = vld [vmem:[%s9473_s3 + $0x150] sm:$0xff] }
 0x261   :  { %2698 = vmatpush.msra.mxu1 %v618_v18  ;;  %2721 = vmatpush.msra.mxu2 %v730_v13  ;;  %v1164_v38 = vld [vmem:[%s9470_s1 + $0x22c0] sm:$0xff]  ;;  %v1229_v13 = vadd.f32 %v6490_v52, %v1206_v40  ;;  %v2902_v45 = vld [vmem:[%s9473_s3 + $0x2d0] sm:$0xff]  ;;  %v3930_v18 = vld [vmem:[%s9471_s0 + $0x58] sm:$0xff] }
 0x262   :  { %2744 = vmatpush.msra.mxu3 %v842_v28  ;;  %2752 = vmatpush.msrb.mxu0 %v1059_v53  ;;  %v1045_v52 = vld [vmem:[%s9470_s1 + $0x1f08] sm:$0xff]  ;;  %v7923_v28 = vpop.f32.mrf.mxu1  ;;  %v2851_v53 = vld [vmem:[%s9473_s3 + $0x138] sm:$0xff] }
 0x263   :  { %2775 = vmatpush.msrb.mxu1 %v1171_v25  ;;  %3156 = vmatpush.msrb.mxu2 %v2857_v32  ;;  %v1157_v40 = vld [vmem:[%s9470_s1 + $0x2288] sm:$0xff]  ;;  %9518 = vst [vmem:[#allocation39_spill] sm:$0xff] %v7923_v28  ;;  %v2899_v25 = vld [vmem:[%s9473_s3 + $0x2b8] sm:$0xff]  ;;  %v1482_v32 = vadd.f32 %v6893_v29, %v1459_v60  ;;  %v1150_v28 = vld [vmem:[%s9470_s1 + $0x2250] sm:$0xff]  ;;  %v9519_v60 = vperm.slane %v7822_v9, 1 }
 0x264   :  { %3179 = vmatpush.msrb.mxu3 %v2905_v0  ;;  %2610 = vmatmul.f32.gmra.mxu1 %v3930_v18  ;;  %v1038_v0 = vld [vmem:[%s9470_s1 + $0x1ed0] sm:$0xff]  ;;  %v1252_v18 = vadd.f32 %v6504_v58, %v1229_v13  ;;  %v2848_v29 = vld [vmem:[%s9473_s3 + $0x120] sm:$0xff] }
 0x265   :  { %2753 = vmatpush.msrb.mxu0 %v1052_v44  ;;  %2776 = vmatpush.msrb.mxu1 %v1164_v38  ;;  %v1209_v44 = vadd.f32 %v6535_v7, %v1174_v51  ;;  %v7937_v38 = vpop.f32.mrf.mxu2  ;;  %v2896_v58 = vld [vmem:[%s9473_s3 + $0x2a0] sm:$0xff]  ;;  %v3931_v7 = vld [vmem:[%s9471_s0 + $0x30] sm:$0xff]  ;;  %v1031_v51 = vld [vmem:[%s9470_s1 + $0x1e98] sm:$0xff]  ;;  %v1505_v13 = vadd.f32 %v6913_v43, %v1482_v32 }
 0x266   :  { %3157 = vmatpush.msrb.mxu2 %v2854_v5  ;;  %3180 = vmatpush.msrb.mxu3 %v2902_v45  ;;  %v1439_v5 = vadd.f32 %v6850_v31, %v9519_v60  ;;  %v7958_v45 = vpop.f32.mrf.mxu3  ;;  %v7960_v31 = vpop.f32.mrf.mxu0  ;;  %v3932_v43 = vld [vmem:[%s9471_s0 + $0x20] sm:$0xff]  ;;  %v3934_v60 = vld [vmem:[%s9471_s0 + $0x28] sm:$0xff] }
 0x267   :  { %2754 = vmatpush.msrb.mxu0 %v1045_v52  ;;  %2777 = vmatpush.msrb.mxu1 %v1157_v40  ;;  %v1143_v52 = vld [vmem:[%s9470_s1 + $0x2218] sm:$0xff]  ;;  %v2845_v40 = vld [vmem:[%s9473_s3 + $0x108] sm:$0xff] }
 0x268   :  { %3158 = vmatpush.msrb.mxu2 %v2851_v53  ;;  %3181 = vmatpush.msrb.mxu3 %v2899_v25  ;;  %v1275_v53 = vadd.f32 %v6524_v26, %v1252_v18  ;;  %v1232_v25 = vadd.f32 %v6555_v1, %v1209_v44  ;;  %v1462_v32 = vadd.f32 %v6882_v2, %v1439_v5  ;;  %v1024_v26 = vld [vmem:[%s9470_s1 + $0x1e60] sm:$0xff]  ;;  %v2842_v2 = vld [vmem:[%s9473_s3 + $0xf0] sm:$0xff]  ;;  %v1017_v5 = vld [vmem:[%s9470_s1 + $0x1e28] sm:$0xff] }
 0x269   :  { %2722 = vmatmul.f32.vlgmr.msra.gmra.mxu2 %v3931_v7  ;;  %2755 = vmatpush.msrb.mxu0 %v1038_v0  ;;  %v3933_v0 = vld [vmem:[%s9471_s0 + $0x38] sm:$0xff]  ;;  %v1136_v1 = vld [vmem:[%s9470_s1 + $0x21e0] sm:$0xff]  ;;  %v2890_v44 = vld [vmem:[%s9473_s3 + $0x270] sm:$0xff] }
 0x26a   :  { %2778 = vmatpush.msrb.mxu1 %v1150_v28  ;;  %3159 = vmatpush.msrb.mxu2 %v2848_v29  ;;  %v2893_v28 = vld [vmem:[%s9473_s3 + $0x288] sm:$0xff]  ;;  %v7986_v18 = vpop.f32.mrf.mxu1  ;;  %v1528_v29 = vadd.f32 %v6930_v56, %v1505_v13  ;;  %v1255_v7 = vadd.f32 %v6578_v8, %v1232_v25  ;;  %v2839_v56 = vld [vmem:[%s9473_s3 + $0xd8] sm:$0xff]  ;;  %v1010_v8 = vld [vmem:[%s9470_s1 + $0x1df0] sm:$0xff] }
 0x26b   :  { %3182 = vmatpush.msrb.mxu3 %v2896_v58  ;;  %2676 = vmatmul.f32.vlgmr.msra.gmra.mxu0 %v3932_v43  ;;  %v1129_v58 = vld [vmem:[%s9470_s1 + $0x21a8] sm:$0xff]  ;;  %v2887_v13 = vld [vmem:[%s9473_s3 + $0x258] sm:$0xff] }
 0x26c   :  { %2745 = vmatmul.f32.vlgmr.msra.gmra.mxu3 %v3933_v0  ;;  %2756 = vmatpush.msrb.mxu0 %v1031_v51  ;;  %v1298_v51 = vadd.f32 %v6615_v16, %v1275_v53  ;;  %v1122_v16 = vld [vmem:[%s9470_s1 + $0x2170] sm:$0xff]  ;;  %v2836_v53 = vld [vmem:[%s9473_s3 + $0xc0] sm:$0xff]  ;;  %v1551_v25 = vadd.f32 %v6962_v15, %v1528_v29  ;;  %v1003_v15 = vld [vmem:[%s9470_s1 + $0x1db8] sm:$0xff] }
 0x26d   :  { %2779 = vmatpush.msrb.mxu1 %v1143_v52  ;;  %3160 = vmatpush.msrb.mxu2 %v2845_v40  ;;  %v8006_v52 = vpop.f32.mrf.mxu2  ;;  %v1485_v40 = vadd.f32 %v6976_v24, %v1462_v32  ;;  %v2884_v24 = vld [vmem:[%s9473_s3 + $0x240] sm:$0xff]  ;;  %v3937_v29 = vld [vmem:[%s9471_s0 + $0x88] sm:$0xff] }
 0x26e   :  { %3183 = vmatpush.msrb.mxu3 %v2893_v28  ;;  %2699 = vmatmul.f32.vlgmr.msra.gmra.mxu1 %v3934_v60  ;;  %v8025_v43 = vpop.f32.mrf.mxu3  ;;  %v1278_v28 = vadd.f32 %v6604_v17, %v1255_v7  ;;  %v1321_v32 = vadd.f32 %v6635_v30, %v1298_v51  ;;  %v3935_v0 = vld [vmem:[%s9471_s0 + $0x80] sm:$0xff]  ;;  %v1115_v17 = vld [vmem:[%s9470_s1 + $0x2138] sm:$0xff]  ;;  %v2833_v30 = vld [vmem:[%s9473_s3 + $0xa8] sm:$0xff] }
 0x26f   :  { %2757 = vmatpush.msrb.mxu0 %v1024_v26  ;;  %2780 = vmatpush.msrb.mxu1 %v1136_v1  ;;  %v1508_v26 = vadd.f32 %v6993_v46, %v1485_v40  ;;  %v8039_v1 = vpop.f32.mrf.mxu0  ;;  %v2881_v46 = vld [vmem:[%s9473_s3 + $0x228] sm:$0xff]  ;;  %v996_v60 = vld [vmem:[%s9470_s1 + $0x1d80] sm:$0xff] }
 0x270   :  { %3161 = vmatpush.msrb.mxu2 %v2842_v2  ;;  %3184 = vmatpush.msrb.mxu3 %v2890_v44  ;;  %v3936_v2 = vld [vmem:[%s9471_s0 + $0x70] sm:$0xff]  ;;  %v1574_v44 = vadd.f32 %v7050_v62, %v1551_v25  ;;  %v1301_v7 = vadd.f32 %v6686_v48, %v1278_v28  ;;  %v989_v48 = vld [vmem:[%s9470_s1 + $0x1d48] sm:$0xff] }
 0x271   :  { %2758 = vmatpush.msrb.mxu0 %v1017_v5  ;;  %2781 = vmatpush.msrb.mxu1 %v1129_v58  ;;  %v1108_v5 = vld [vmem:[%s9470_s1 + $0x2100] sm:$0xff]  ;;  %v1344_v58 = vadd.f32 %v6658_v37, %v1321_v32  ;;  %v2830_v62 = vld [vmem:[%s9473_s3 + $0x90] sm:$0xff]  ;;  %v1531_v40 = vadd.f32 %v7010_v59, %v1508_v26  ;;  %v3938_v37 = vld [vmem:[%s9471_s0 + $0x78] sm:$0xff] }
 0x272   :  { %3162 = vmatpush.msrb.mxu2 %v2839_v56  ;;  %3185 = vmatpush.msrb.mxu3 %v2887_v13  ;;  %v8065_v51 = vpop.f32.mrf.mxu1  ;;  %v2878_v56 = vld [vmem:[%s9473_s3 + $0x210] sm:$0xff]  ;;  %v2827_v59 = vld [vmem:[%s9473_s3 + $0x78] sm:$0xff] }
 0x273   :  { %2725 = vmatmul.f32.gmra.mxu2 %v3935_v0  ;;  %2759 = vmatpush.msrb.mxu0 %v1010_v8  ;;  %v1101_v8 = vld [vmem:[%s9470_s1 + $0x20c8] sm:$0xff]  ;;  %v982_v25 = vld [vmem:[%s9470_s1 + $0x1d10] sm:$0xff]  ;;  %v1367_v32 = vadd.f32 %v6684_v54, %v1344_v58  ;;  %v1324_v0 = vadd.f32 %v6700_v57, %v1301_v7  ;;  %v1554_v26 = vadd.f32 %v7036_v35, %v1531_v40  ;;  %v975_v54 = vld [vmem:[%s9470_s1 + $0x1cd8] sm:$0xff]  ;;  %v1179_v7 = vperm.slane %v7822_v9, 5 }
 0x274   :  { %2782 = vmatpush.msrb.mxu1 %v1122_v16  ;;  %3163 = vmatpush.msrb.mxu2 %v2836_v53  ;;  %v2875_v16 = vld [vmem:[%s9473_s3 + $0x1f8] sm:$0xff]  ;;  %v1597_v53 = vadd.f32 %v7070_v36, %v1574_v44  ;;  %v2824_v36 = vld [vmem:[%s9473_s3 + $0x60] sm:$0xff]  ;;  %v2821_v35 = vld [vmem:[%s9473_s3 + $0x48] sm:$0xff]  ;;  %v1176_v44 = vperm.slane %v7822_v9, 2 }
 0x275   :  { %3186 = vmatpush.msrb.mxu3 %v2884_v24  ;;  %2679 = vmatmul.f32.gmra.mxu0 %v3936_v2  ;;  %v1094_v24 = vld [vmem:[%s9470_s1 + $0x2090] sm:$0xff]  ;;  %v1087_v57 = vld [vmem:[%s9470_s1 + $0x2058] sm:$0xff]  ;;  %v2869_v2 = vld [vmem:[%s9473_s3 + $0x1c8] sm:$0xff] }
 0x276   :  { %2748 = vmatmul.f32.gmra.mxu3 %v3937_v29  ;;  %2760 = vmatpush.msrb.mxu0 %v1003_v15  ;;  %v8073_v13 = vpop.f32.mrf.mxu2  ;;  %v2872_v15 = vld [vmem:[%s9473_s3 + $0x1e0] sm:$0xff]  ;;  %v2866_v58 = vld [vmem:[%s9473_s3 + $0x1b0] sm:$0xff]  ;;  %v1073_v40 = vld [vmem:[%s9470_s1 + $0x1fe8] sm:$0xff] }
 0x277   :  { %2783 = vmatpush.msrb.mxu1 %v1115_v17  ;;  %3164 = vmatpush.msrb.mxu2 %v2833_v30  ;;  %v1390_v17 = vadd.f32 %v6766_v61, %v1367_v32  ;;  %v1177_v30 = vperm.slane %v7822_v9, 3  ;;  %v8125_v29 = vpop.f32.mrf.mxu0  ;;  %v968_v61 = vld [vmem:[%s9470_s1 + $0x1ca0] sm:$0xff] }
 0x278   :  { %3187 = vmatpush.msrb.mxu3 %v2881_v46  ;;  %2702 = vmatmul.f32.gmra.mxu1 %v3938_v37  ;;  %v1620_v46 = vadd.f32 %v7084_v63, %v1597_v53  ;;  %v2818_v63 = vld [vmem:[%s9473_s3 + $0x30] sm:$0xff]  ;;  %v9520_v53 = vld [vmem:[#allocation5_spill] sm:$0xff]  ;;  %v9521_v32 = vld [vmem:[#allocation2_spill] sm:$0xff] }
 0x279   :  { %2761 = vmatpush.msrb.mxu0 %v996_v60  ;;  %2784 = vmatpush.msrb.mxu1 %v1108_v5  ;;  %v8098_v28 = vpop.f32.mrf.mxu3  ;;  %v1080_v60 = vld [vmem:[%s9470_s1 + $0x2020] sm:$0xff]  ;;  %v1347_v5 = vadd.f32 %v6717_v55, %v1324_v0  ;;  %v961_v55 = vld [vmem:[%s9470_s1 + $0x1c68] sm:$0xff]  ;;  %v1413_v37 = vadd.f32 %v6786_v39, %v1390_v17 }
 0x27a   :  { %3165 = vmatpush.msrb.mxu2 %v2830_v62  ;;  %3188 = vmatpush.msrb.mxu3 %v2878_v56  ;;  %v1577_v62 = vadd.f32 %v7106_v41, %v1554_v26  ;;  %v1178_v56 = vperm.slane %v7822_v9, 4  ;;  %v2815_v41 = vld [vmem:[%s9473_s3 + $0x18] sm:$0xff]  ;;  %v1643_v39 = vadd.f32 %v9520_v53, %v1620_v46  ;;  %v9522_v26 = vld [vmem:[#allocation6_spill] sm:$0xff]  ;;  %v3094_v53 = vld [vmem:[%s9473_s3 + $0x8d0] sm:$0xff] }
 0x27b   :  { %2762 = vmatpush.msrb.mxu0 %v989_v48  ;;  %2785 = vmatpush.msrb.mxu1 %v1101_v8  ;;  %v1896_v48 = vadd.f32 %v7414_v6, %v1177_v30  ;;  %v8153_v8 = vpop.f32.mrf.mxu1  ;;  %v1666_v6 = vadd.f32 %v7159_v33, %v1176_v44  ;;  %v1370_v0 = vadd.f32 %v9521_v32, %v1347_v5  ;;  %v2860_v33 = vld [vmem:[%s9473_s3 + $0x180] sm:$0xff]  ;;  %v9523_v5 = vld [vmem:[#allocation3_spill] sm:$0xff] }
 0x27c   :  { %3166 = vmatpush.msrb.mxu2 %v2827_v59  ;;  %3189 = vmatpush.msrb.mxu3 %v2875_v16  ;;  %v2863_v59 = vld [vmem:[%s9473_s3 + $0x198] sm:$0xff]  ;;  %v8195_v46 = vmax.f32 %v1643_v39, 0.0 }
 0x27d   :  { %2763 = vmatpush.msrb.mxu0 %v982_v25  ;;  %2786 = vmatpush.msrb.mxu1 %v1094_v24  ;;  %v954_v25 = vld [vmem:[%s9470_s1 + $0x1c30] sm:$0xff] }
 0x27e   :  { %3167 = vmatpush.msrb.mxu2 %v2824_v36  ;;  %3190 = vmatpush.msrb.mxu3 %v2872_v15  ;;  %v1066_v24 = vld [vmem:[%s9470_s1 + $0x1fb0] sm:$0xff]  ;;  %v2812_v36 = vld [vmem:[%s9473_s3] sm:$0xff]  ;;  %v2356_v15 = vadd.f32 %v8073_v13, %v1179_v7  ;;  %v2953_v13 = vld [vmem:[%s9473_s3 + $0x468] sm:$0xff] }
 0x27f   :  { %2764 = vmatpush.msrb.mxu0 %v975_v54  ;;  %2787 = vmatpush.msrb.mxu1 %v1087_v57  ;;  %v1600_v54 = vadd.f32 %v9522_v26, %v1577_v62  ;;  %v2126_v57 = vadd.f32 %v7754_v21, %v1178_v56  ;;  %v3001_v21 = vld [vmem:[%s9473_s3 + $0x5e8] sm:$0xff]  ;;  %v9527_v26 = vld [vmem:[#allocation8_spill] sm:$0xff] }
 0x280   :  { %3168 = vmatpush.msrb.mxu2 %v2821_v35  ;;  %3191 = vmatpush.msrb.mxu3 %v2869_v2  ;;  %v8189_v35 = vmax.f32 %v1413_v37, 0.0  ;;  %v1919_v2 = vadd.f32 %v7430_v20, %v1896_v48  ;;  %v3049_v20 = vld [vmem:[%s9473_s3 + $0x768] sm:$0xff]  ;;  %v2379_v62 = vadd.f32 %v8098_v28, %v2356_v15  ;;  %v2950_v48 = vld [vmem:[%s9473_s3 + $0x450] sm:$0xff] }
 0x281   :  { %2765 = vmatpush.msrb.mxu0 %v968_v61  ;;  %2788 = vmatpush.msrb.mxu1 %v1080_v60  ;;  %v8161_v16 = vpop.f32.mrf.mxu2  ;;  %v1689_v61 = vadd.f32 %v7177_v49, %v1666_v6  ;;  %v3097_v49 = vld [vmem:[%s9473_s3 + $0x8e8] sm:$0xff]  ;;  %v2149_v37 = vadd.f32 %v7771_v3, %v2126_v57  ;;  %v3046_v3 = vld [vmem:[%s9473_s3 + $0x750] sm:$0xff]  ;;  %v9525_v6 = vld [vmem:[#allocation9_spill] sm:$0xff] }
 0x282   :  { %3169 = vmatpush.msrb.mxu2 %v2818_v63  ;;  %3192 = vmatpush.msrb.mxu3 %v2866_v58  ;;  %v1393_v63 = vadd.f32 %v9523_v5, %v1370_v0  ;;  %v3939_v58 = vld [vmem:[%s9471_s0 + $0x40] sm:$0xff]  ;;  %v1942_v28 = vadd.f32 %v7505_v27, %v1919_v2  ;;  %v2947_v27 = vld [vmem:[%s9473_s3 + $0x438] sm:$0xff]  ;;  %v9526_v0 = vld [vmem:[#allocation4_spill] sm:$0xff] }
 0x283   :  { %2766 = vmatpush.msrb.mxu0 %v961_v55  ;;  %2789 = vmatpush.msrb.mxu1 %v1073_v40  ;;  %v9524_v55 = vld [vmem:[#allocation7_spill] sm:$0xff]  ;;  %v2172_v57 = vadd.f32 %v7782_v12, %v2149_v37  ;;  %v3040_v12 = vld [vmem:[%s9473_s3 + $0x720] sm:$0xff]  ;;  %v3941_v37 = vld [vmem:[%s9471_s0 + $0x90] sm:$0xff] }
 0x284   :  { %3170 = vmatpush.msrb.mxu2 %v2815_v41  ;;  %3193 = vmatpush.msrb.mxu3 %v2863_v59  ;;  %v8187_v17 = vpop.f32.mrf.mxu3  ;;  %v1623_v40 = vadd.f32 %v9524_v55, %v1600_v54  ;;  %v2998_v41 = vld [vmem:[%s9473_s3 + $0x5d0] sm:$0xff]  ;;  %v1669_v59 = vadd.f32 %v7223_v42, %v1176_v44  ;;  %v3940_v42 = vld [vmem:[%s9471_s0 + $0x48] sm:$0xff]  ;;  %v2995_v44 = vld [vmem:[%s9473_s3 + $0x5b8] sm:$0xff] }
 0x285   :  { %2767 = vmatpush.msrb.mxu0 %v954_v25  ;;  %2790 = vmatpush.msrb.mxu1 %v1066_v24  ;;  %v1712_v25 = vadd.f32 %v9525_v6, %v1689_v61  ;;  %v1899_v24 = vadd.f32 %v7474_v22, %v1177_v30  ;;  %v2129_v22 = vadd.f32 %v7824_v34, %v1178_v56  ;;  %v3043_v30 = vld [vmem:[%s9473_s3 + $0x738] sm:$0xff]  ;;  %v2944_v34 = vld [vmem:[%s9473_s3 + $0x420] sm:$0xff] }
 0x286   :  { %3171 = vmatpush.msrb.mxu2 %v2812_v36  ;;  %3194 = vmatpush.msrb.mxu3 %v2860_v33  ;;  %v2401_v60 = vpop.f32.mrf.mxu0  ;;  %v1416_v36 = vadd.f32 %v9526_v0, %v1393_v63  ;;  %v3091_v33 = vld [vmem:[%s9473_s3 + $0x8b8] sm:$0xff]  ;;  %v1646_v54 = vadd.f32 %v9527_v26, %v1623_v40  ;;  %v2992_v56 = vld [vmem:[%s9473_s3 + $0x5a0] sm:$0xff]  ;;  %v1692_v2 = vadd.f32 %v7241_v11, %v1669_v59 }
 0x287   :  { %2768 = vmatmul.f32.vlgmr.msrb.gmra.mxu0 %v3939_v58  ;;  %3172 = vmatmul.f32.vlgmr.msrb.gmra.mxu2 %v8189_v35  ;;  %v2402_v15 = vadd.f32 %v2401_v60, %v2379_v62  ;;  %v3088_v61 = vld [vmem:[%s9473_s3 + $0x8a0] sm:$0xff]  ;;  %v1922_v11 = vadd.f32 %v7490_v14, %v1899_v24  ;;  %v2152_v63 = vadd.f32 %v7846_v19, %v2129_v22  ;;  %v2941_v58 = vld [vmem:[%s9473_s3 + $0x408] sm:$0xff]  ;;  %v9530_v59 = vld [vmem:[#allocation25_spill] sm:$0xff] }
 0x288   :  { %3195 = vmatmul.f32.vlgmr.msrb.gmra.mxu3 %v8195_v46  ;;  %3202 = vmatpush.msra.mxu0 %v2953_v13  ;;  %v1965_v13 = vadd.f32 %v7526_v4, %v1942_v28  ;;  %v8276_v5 = vmax.f32 %v1416_v36, 0.0  ;;  %v2989_v14 = vld [vmem:[%s9473_s3 + $0x588] sm:$0xff]  ;;  %v9532_v36 = vld [vmem:[#allocation12_spill] sm:$0xff]  ;;  %v9534_v26 = vld [vmem:[#allocation13_spill] sm:$0xff] }
 0x289   :  { %3225 = vmatpush.msra.mxu1 %v3001_v21  ;;  %3248 = vmatpush.msra.mxu2 %v3049_v20  ;;  %v2424_v39 = vpop.f32.mrf.mxu1  ;;  %v2359_v21 = vadd.f32 %v8161_v16, %v1179_v7  ;;  %v9528_v20 = vld [vmem:[#allocation10_spill] sm:$0xff]  ;;  %v2195_v7 = vadd.f32 %v7802_v23, %v2172_v57  ;;  %v3037_v19 = vld [vmem:[%s9473_s3 + $0x708] sm:$0xff]  ;;  %v1945_v28 = vadd.f32 %v9530_v59, %v1922_v11  ;;  %v9533_v22 = vld [vmem:[#allocation24_spill] sm:$0xff] }
 0x28a   :  { %3271 = vmatpush.msra.mxu3 %v3097_v49  ;;  %2791 = vmatmul.f32.vlgmr.msrb.gmra.mxu1 %v3940_v42  ;;  %v2447_v32 = vpop.f32.mrf.mxu2  ;;  %v1735_v60 = vadd.f32 %v9528_v20, %v1712_v25  ;;  %v2425_v9 = vadd.f32 %v2424_v39, %v2402_v15  ;;  %v8282_v49 = vmax.f32 %v1646_v54, 0.0  ;;  %v9529_v62 = vld [vmem:[#allocation11_spill] sm:$0xff]  ;;  %v1988_v40 = vadd.f32 %v7540_v50, %v1965_v13  ;;  %v2938_v50 = vld [vmem:[%s9473_s3 + $0x3f0] sm:$0xff]  ;;  %v3942_v42 = vld [vmem:[%s9471_s0 + $0x98] sm:$0xff] }
 0x28b   :  { %3203 = vmatpush.msra.mxu0 %v2950_v48  ;;  %3226 = vmatpush.msra.mxu1 %v2998_v41  ;;  %v1715_v55 = vadd.f32 %v9529_v62, %v1692_v2  ;;  %v3085_v23 = vld [vmem:[%s9473_s3 + $0x888] sm:$0xff]  ;;  %v2382_v48 = vadd.f32 %v8187_v17, %v2359_v21  ;;  %v3082_v17 = vld [vmem:[%s9473_s3 + $0x870] sm:$0xff]  ;;  %v2218_v24 = vadd.f32 %v7899_v47, %v2195_v7  ;;  %v3031_v47 = vld [vmem:[%s9473_s3 + $0x6d8] sm:$0xff] }
 0x28c   :  { %3249 = vmatpush.msra.mxu2 %v3046_v3  ;;  %3272 = vmatpush.msra.mxu3 %v3094_v53  ;;  %v1758_v41 = vadd.f32 %v7287_v10, %v1735_v60  ;;  %v2986_v3 = vld [vmem:[%s9473_s3 + $0x570] sm:$0xff]  ;;  %v9531_v53 = vld [vmem:[#allocation37_spill] sm:$0xff]  ;;  %v2448_v6 = vadd.f32 %v2447_v32, %v2425_v9  ;;  %v9535_v57 = vld [vmem:[#allocation26_spill] sm:$0xff] }
 0x28d   :  { %3204 = vmatpush.msra.mxu0 %v2947_v27  ;;  %3227 = vmatpush.msra.mxu1 %v2995_v44  ;;  %v2470_v4 = vpop.f32.mrf.mxu3  ;;  %v2175_v39 = vadd.f32 %v9531_v53, %v2152_v63  ;;  %v3034_v10 = vld [vmem:[%s9473_s3 + $0x6f0] sm:$0xff]  ;;  %v2935_v27 = vld [vmem:[%s9473_s3 + $0x3d8] sm:$0xff]  ;;  %v1738_v32 = vadd.f32 %v9532_v36, %v1715_v55  ;;  %v2980_v2 = vld [vmem:[%s9473_s3 + $0x540] sm:$0xff] }
 0x28e   :  { %3250 = vmatpush.msra.mxu2 %v3043_v30  ;;  %3273 = vmatpush.msra.mxu3 %v3091_v33  ;;  %v2983_v44 = vld [vmem:[%s9473_s3 + $0x558] sm:$0xff]  ;;  %v2011_v30 = vadd.f32 %v9533_v22, %v1988_v40  ;;  %v1781_v54 = vadd.f32 %v9534_v26, %v1758_v41  ;;  %v9536_v13 = vld [vmem:[#allocation38_spill] sm:$0xff]  ;;  %v2471_v20 = vadd.f32 %v2470_v4, %v2448_v6  ;;  %v9537_v60 = vld [vmem:[#allocation39_spill] sm:$0xff] }
 0x28f   :  { %3205 = vmatpush.msra.mxu0 %v2944_v34  ;;  %3228 = vmatpush.msra.mxu1 %v2992_v56  ;;  %v3079_v33 = vld [vmem:[%s9473_s3 + $0x858] sm:$0xff]  ;;  %v1968_v34 = vadd.f32 %v9535_v57, %v1945_v28  ;;  %v2932_v56 = vld [vmem:[%s9473_s3 + $0x3c0] sm:$0xff]  ;;  %v2241_v11 = vadd.f32 %v9537_v60, %v2218_v24  ;;  %v2929_v63 = vld [vmem:[%s9473_s3 + $0x3a8] sm:$0xff] }
 0x290   :  { %3251 = vmatpush.msra.mxu2 %v3040_v12  ;;  %3274 = vmatpush.msra.mxu3 %v3088_v61  ;;  %v2404_v16 = vpop.f32.mrf.mxu0  ;;  %v2198_v12 = vadd.f32 %v9536_v13, %v2175_v39  ;;  %v3028_v61 = vld [vmem:[%s9473_s3 + $0x6c0] sm:$0xff]  ;;  %v9538_v7 = vld [vmem:[#allocation16_spill] sm:$0xff]  ;;  %v3025_v4 = vld [vmem:[%s9473_s3 + $0x6a8] sm:$0xff] }
 0x291   :  { %2771 = vmatmul.f32.gmra.mxu0 %v3941_v37  ;;  %3175 = vmatmul.f32.gmra.mxu2 %v8276_v5  ;;  %v2405_v15 = vadd.f32 %v2404_v16, %v2382_v48  ;;  %v3076_v21 = vld [vmem:[%s9473_s3 + $0x840] sm:$0xff]  ;;  %v3073_v62 = vld [vmem:[%s9473_s3 + $0x828] sm:$0xff]  ;;  %v2926_v41 = vld [vmem:[%s9473_s3 + $0x390] sm:$0xff] }
 0x292   :  { %3198 = vmatmul.f32.gmra.mxu3 %v8282_v49  ;;  %3206 = vmatpush.msra.mxu0 %v2941_v58  ;;  %v2977_v58 = vld [vmem:[%s9473_s3 + $0x528] sm:$0xff]  ;;  %v9540_v40 = vld [vmem:[#allocation14_spill] sm:$0xff]  ;;  %v2974_v59 = vld [vmem:[%s9473_s3 + $0x510] sm:$0xff] }
 0x293   :  { %3229 = vmatpush.msra.mxu1 %v2989_v14  ;;  %3252 = vmatpush.msra.mxu2 %v3037_v19  ;;  %v2427_v25 = vpop.f32.mrf.mxu1  ;;  %v1761_v14 = vadd.f32 %v9538_v7, %v1738_v32  ;;  %v9539_v19 = vld [vmem:[#allocation29_spill] sm:$0xff]  ;;  %v1804_v37 = vadd.f32 %v9540_v40, %v1781_v54  ;;  %v3070_v53 = vld [vmem:[%s9473_s3 + $0x810] sm:$0xff]  ;;  %v9543_v24 = vld [vmem:[#allocation30_spill] sm:$0xff] }
 0x294   :  { %3275 = vmatpush.msra.mxu3 %v3085_v23  ;;  %2794 = vmatmul.f32.gmra.mxu1 %v3942_v42  ;;  %v2450_v0 = vpop.f32.mrf.mxu2  ;;  %v2034_v16 = vadd.f32 %v9539_v19, %v2011_v30  ;;  %v2428_v55 = vadd.f32 %v2427_v25, %v2405_v15  ;;  %v9541_v23 = vld [vmem:[#allocation27_spill] sm:$0xff]  ;;  %v9542_v6 = vld [vmem:[#allocation17_spill] sm:$0xff]  ;;  %v9545_v30 = vld [vmem:[#allocation28_spill] sm:$0xff] }
 0x295   :  { %3207 = vmatpush.msra.mxu0 %v2938_v50  ;;  %3230 = vmatpush.msra.mxu1 %v2986_v3  ;;  %v1991_v48 = vadd.f32 %v9541_v23, %v1968_v34  ;;  %v2221_v50 = vadd.f32 %v7960_v31, %v2198_v12  ;;  %v3022_v3 = vld [vmem:[%s9473_s3 + $0x690] sm:$0xff]  ;;  %v2971_v31 = vld [vmem:[%s9473_s3 + $0x4f8] sm:$0xff]  ;;  %v1784_v25 = vadd.f32 %v9542_v6, %v1761_v14  ;;  %v9544_v32 = vld [vmem:[#allocation15_spill] sm:$0xff] }
 0x296   :  { %3253 = vmatpush.msra.mxu2 %v3034_v10  ;;  %3276 = vmatpush.msra.mxu3 %v3082_v17  ;;  %v2264_v10 = vadd.f32 %v7937_v38, %v2241_v11  ;;  %v2923_v17 = vld [vmem:[%s9473_s3 + $0x378] sm:$0xff]  ;;  %v2057_v42 = vadd.f32 %v9543_v24, %v2034_v16  ;;  %v1827_v22 = vadd.f32 %v9544_v32, %v1804_v37  ;;  %v2968_v15 = vld [vmem:[%s9473_s3 + $0x4e0] sm:$0xff]  ;;  %v2965_v12 = vld [vmem:[%s9473_s3 + $0x4c8] sm:$0xff] }
 0x297   :  { %3208 = vmatpush.msra.mxu0 %v2935_v27  ;;  %3231 = vmatpush.msra.mxu1 %v2983_v44  ;;  %v2473_v9 = vpop.f32.mrf.mxu3  ;;  %v3019_v38 = vld [vmem:[%s9473_s3 + $0x678] sm:$0xff]  ;;  %v2451_v44 = vadd.f32 %v2450_v0, %v2428_v55  ;;  %v2244_v57 = vadd.f32 %v7986_v18, %v2221_v50  ;;  %v3016_v0 = vld [vmem:[%s9473_s3 + $0x660] sm:$0xff]  ;;  %v2917_v18 = vld [vmem:[%s9473_s3 + $0x348] sm:$0xff] }
 0x298   :  { %3254 = vmatpush.msra.mxu2 %v3031_v47  ;;  %3277 = vmatpush.msra.mxu3 %v3079_v33  ;;  %v3067_v27 = vld [vmem:[%s9473_s3 + $0x7f8] sm:$0xff]  ;;  %v2014_v47 = vadd.f32 %v9545_v30, %v1991_v48  ;;  %v2920_v33 = vld [vmem:[%s9473_s3 + $0x360] sm:$0xff]  ;;  %v2287_v13 = vadd.f32 %v7958_v45, %v2264_v10  ;;  %v3013_v45 = vld [vmem:[%s9473_s3 + $0x648] sm:$0xff] }
 0x299   :  { %3209 = vmatpush.msra.mxu0 %v2932_v56  ;;  %3232 = vmatpush.msra.mxu1 %v2980_v2  ;;  %v3064_v34 = vld [vmem:[%s9473_s3 + $0x7e0] sm:$0xff]  ;;  %v9546_v56 = vld [vmem:[#allocation20_spill] sm:$0xff]  ;;  %v3061_v11 = vld [vmem:[%s9473_s3 + $0x7c8] sm:$0xff]  ;;  %v2267_v55 = vadd.f32 %v8006_v52, %v2244_v57 }
 0x29a   :  { %3255 = vmatpush.msra.mxu2 %v3028_v61  ;;  %3278 = vmatpush.msra.mxu3 %v3076_v21  ;;  %v2493_v28 = vpop.f32.mrf.mxu0  ;;  %v1850_v2 = vadd.f32 %v9546_v56, %v1827_v22  ;;  %v9547_v61 = vld [vmem:[#allocation18_spill] sm:$0xff]  ;;  %v2310_v14 = vadd.f32 %v8039_v1, %v2287_v13  ;;  %v2914_v19 = vld [vmem:[%s9473_s3 + $0x330] sm:$0xff]  ;;  %v9550_v40 = vld [vmem:[#allocation21_spill] sm:$0xff] }
 0x29b   :  { %3210 = vmatpush.msra.mxu0 %v2929_v63  ;;  %3233 = vmatpush.msra.mxu1 %v2977_v58  ;;  %v2494_v39 = vadd.f32 %v2493_v28, %v2471_v20  ;;  %v1807_v21 = vadd.f32 %v9547_v61, %v1784_v25  ;;  %v9548_v20 = vld [vmem:[#allocation31_spill] sm:$0xff]  ;;  %v2474_v63 = vadd.f32 %v2473_v9, %v2451_v44  ;;  %v9549_v58 = vld [vmem:[#allocation33_spill] sm:$0xff]  ;;  %v2962_v16 = vld [vmem:[%s9473_s3 + $0x4b0] sm:$0xff] }
 0x29c   :  { %3256 = vmatpush.msra.mxu2 %v3025_v4  ;;  %3279 = vmatpush.msra.mxu3 %v3073_v62  ;;  %v2080_v60 = vadd.f32 %v9548_v20, %v2057_v42  ;;  %v2037_v7 = vadd.f32 %v9549_v58, %v2014_v47  ;;  %v3010_v1 = vld [vmem:[%s9473_s3 + $0x630] sm:$0xff]  ;;  %v1873_v37 = vadd.f32 %v9550_v40, %v1850_v2  ;;  %v2911_v23 = vld [vmem:[%s9473_s3 + $0x318] sm:$0xff]  ;;  %v9553_v10 = vld [vmem:[#allocation34_spill] sm:$0xff] }
 0x29d   :  { %3211 = vmatpush.msra.mxu0 %v2926_v41  ;;  %3234 = vmatpush.msra.mxu1 %v2974_v59  ;;  %v2516_v36 = vpop.f32.mrf.mxu1  ;;  %v3058_v9 = vld [vmem:[%s9473_s3 + $0x7b0] sm:$0xff]  ;;  %v2959_v52 = vld [vmem:[%s9473_s3 + $0x498] sm:$0xff]  ;;  %v9551_v41 = vld [vmem:[#allocation19_spill] sm:$0xff]  ;;  %v2290_v42 = vadd.f32 %v8025_v43, %v2267_v55 }
 0x29e   :  { %3257 = vmatpush.msra.mxu2 %v3022_v3  ;;  %3280 = vmatpush.msra.mxu3 %v3070_v53  ;;  %v2517_v26 = vadd.f32 %v2516_v36, %v2494_v39  ;;  %v2539_v54 = vpop.f32.mrf.mxu2  ;;  %v1830_v59 = vadd.f32 %v9551_v41, %v1807_v21  ;;  %v9552_v28 = vld [vmem:[#allocation32_spill] sm:$0xff]  ;;  %v3007_v3 = vld [vmem:[%s9473_s3 + $0x618] sm:$0xff]  ;;  %v2908_v6 = vld [vmem:[%s9473_s3 + $0x300] sm:$0xff]  ;;  %v8471_v32 = vmax.f32 %v1873_v37, 0.0 }
 0x29f   :  { %3212 = vmatpush.msra.mxu0 %v2923_v17  ;;  %3235 = vmatpush.msra.mxu1 %v2971_v31  ;;  %v2103_v50 = vadd.f32 %v9552_v28, %v2080_v60  ;;  %v3055_v53 = vld [vmem:[%s9473_s3 + $0x798] sm:$0xff]  ;;  %v2060_v17 = vadd.f32 %v9553_v10, %v2037_v7  ;;  %v2333_v31 = vadd.f32 %v8065_v51, %v2310_v14  ;;  %v2956_v25 = vld [vmem:[%s9473_s3 + $0x480] sm:$0xff]  ;;  %v2858_v43 = vld [vmem:[%s9473_s3 + $0x170] sm:$0xff] }
 0x2a0   :  { %3258 = vmatpush.msra.mxu2 %v3019_v38  ;;  %3281 = vmatpush.msra.mxu3 %v3067_v27  ;;  %v2540_v4 = vadd.f32 %v2539_v54, %v2517_v26  ;;  %v3004_v38 = vld [vmem:[%s9473_s3 + $0x600] sm:$0xff]  ;;  %v2906_v54 = vld [vmem:[%s9473_s3 + $0x2f0] sm:$0xff]  ;;  %v2855_v56 = vld [vmem:[%s9473_s3 + $0x158] sm:$0xff] }
 0x2a1   :  { %3213 = vmatpush.msra.mxu0 %v2920_v33  ;;  %3236 = vmatpush.msra.mxu1 %v2968_v15  ;;  %v2562_v62 = vpop.f32.mrf.mxu3  ;;  %v3052_v51 = vld [vmem:[%s9473_s3 + $0x780] sm:$0xff]  ;;  %v8473_v22 = vmax.f32 %v2103_v50, 0.0  ;;  %v9555_v33 = vld [vmem:[#allocation35_spill] sm:$0xff]  ;;  %v8480_v26 = vmax.f32 %v2333_v31, 0.0  ;;  %v2954_v57 = vld [vmem:[%s9473_s3 + $0x470] sm:$0xff] }
 0x2a2   :  { %3259 = vmatpush.msra.mxu2 %v3016_v0  ;;  %3282 = vmatpush.msra.mxu3 %v3064_v34  ;;  %v2563_v24 = vadd.f32 %v2562_v62, %v2540_v4  ;;  %v9554_v30 = vld [vmem:[#allocation22_spill] sm:$0xff]  ;;  %v2083_v15 = vadd.f32 %v9555_v33, %v2060_v17  ;;  %v2313_v34 = vadd.f32 %v8125_v29, %v2290_v42  ;;  %v2903_v13 = vld [vmem:[%s9473_s3 + $0x2d8] sm:$0xff]  ;;  %v9556_v61 = vld [vmem:[#allocation23_spill] sm:$0xff] }
 0x2a3   :  { %3214 = vmatpush.msra.mxu0 %v2917_v18  ;;  %3237 = vmatpush.msra.mxu1 %v2965_v12  ;;  %v1853_v47 = vadd.f32 %v9554_v30, %v1830_v59  ;;  %v2951_v29 = vld [vmem:[%s9473_s3 + $0x458] sm:$0xff]  ;;  %v2852_v12 = vld [vmem:[%s9473_s3 + $0x140] sm:$0xff]  ;;  %v9557_v20 = vld [vmem:[#allocation36_spill] sm:$0xff] }
 0x2a4   :  { %3260 = vmatpush.msra.mxu2 %v3013_v45  ;;  %3283 = vmatpush.msra.mxu3 %v3061_v11  ;;  %v2496_v48 = vpop.f32.mrf.mxu0  ;;  %v8488_v0 = vmax.f32 %v2563_v24, 0.0  ;;  %v2106_v60 = vadd.f32 %v9557_v20, %v2083_v15  ;;  %v2900_v45 = vld [vmem:[%s9473_s3 + $0x2c0] sm:$0xff]  ;;  %v2849_v58 = vld [vmem:[%s9473_s3 + $0x128] sm:$0xff]  ;;  %v2846_v4 = vld [vmem:[%s9473_s3 + $0x110] sm:$0xff] }
 0x2a5   :  { %3215 = vmatpush.msra.mxu0 %v2914_v19  ;;  %3238 = vmatpush.msra.mxu1 %v2962_v16  ;;  %v2497_v39 = vadd.f32 %v2496_v48, %v2474_v63  ;;  %v1876_v21 = vadd.f32 %v9556_v61, %v1853_v47  ;;  %v2948_v11 = vld [vmem:[%s9473_s3 + $0x440] sm:$0xff]  ;;  %v2336_v63 = vadd.f32 %v8153_v8, %v2313_v34  ;;  %v2897_v14 = vld [vmem:[%s9473_s3 + $0x2a8] sm:$0xff]  ;;  %v2894_v55 = vld [vmem:[%s9473_s3 + $0x290] sm:$0xff] }
 0x2a6   :  { %3261 = vmatpush.msra.mxu2 %v3010_v1  ;;  %3284 = vmatpush.msra.mxu3 %v3058_v9  ;;  %v2945_v19 = vld [vmem:[%s9473_s3 + $0x428] sm:$0xff]  ;;  %v8527_v8 = vmax.f32 %v2106_v60, 0.0  ;;  %v2942_v1 = vld [vmem:[%s9473_s3 + $0x410] sm:$0xff]  ;;  %v2843_v40 = vld [vmem:[%s9473_s3 + $0xf8] sm:$0xff] }
 0x2a7   :  { %3216 = vmatpush.msra.mxu0 %v2911_v23  ;;  %3239 = vmatpush.msra.mxu1 %v2959_v52  ;;  %v2519_v27 = vpop.f32.mrf.mxu1  ;;  %v8525_v16 = vmax.f32 %v1876_v21, 0.0  ;;  %v8532_v62 = vmax.f32 %v2336_v63, 0.0  ;;  %v2891_v37 = vld [vmem:[%s9473_s3 + $0x278] sm:$0xff]  ;;  %v2840_v52 = vld [vmem:[%s9473_s3 + $0xe0] sm:$0xff]  ;;  %v3145_v48 = vld [vmem:[%s9473_s3 + $0xa68] sm:$0xff] }
 0x2a8   :  { %3262 = vmatpush.msra.mxu2 %v3007_v3  ;;  %3285 = vmatpush.msra.mxu3 %v3055_v53  ;;  %v2520_v44 = vadd.f32 %v2519_v27, %v2497_v39  ;;  %v2542_v36 = vpop.f32.mrf.mxu2  ;;  %v2939_v23 = vld [vmem:[%s9473_s3 + $0x3f8] sm:$0xff]  ;;  %v2888_v41 = vld [vmem:[%s9473_s3 + $0x260] sm:$0xff]  ;;  %v2837_v28 = vld [vmem:[%s9473_s3 + $0xc8] sm:$0xff] }
 0x2a9   :  { %3217 = vmatpush.msra.mxu0 %v2908_v6  ;;  %3240 = vmatpush.msra.mxu1 %v2956_v25  ;;  %v2936_v59 = vld [vmem:[%s9473_s3 + $0x3e0] sm:$0xff]  ;;  %v3142_v50 = vld [vmem:[%s9473_s3 + $0xa50] sm:$0xff]  ;;  %v2885_v3 = vld [vmem:[%s9473_s3 + $0x248] sm:$0xff] }
 0x2aa   :  { %3263 = vmatpush.msra.mxu2 %v3004_v38  ;;  %3286 = vmatpush.msra.mxu3 %v3052_v51  ;;  %v2543_v2 = vadd.f32 %v2542_v36, %v2520_v44  ;;  %v2933_v53 = vld [vmem:[%s9473_s3 + $0x3c8] sm:$0xff]  ;;  %v2834_v39 = vld [vmem:[%s9473_s3 + $0xb0] sm:$0xff]  ;;  %v3139_v10 = vld [vmem:[%s9473_s3 + $0xa38] sm:$0xff] }
 0x2ab   :  { %3218 = vmatmul.f32.vlgmr.msra.gmra.mxu0 %v8471_v32  ;;  %3241 = vmatmul.f32.vlgmr.msra.gmra.mxu1 %v8473_v22  ;;  %v2565_v18 = vpop.f32.mrf.mxu3  ;;  %v2882_v17 = vld [vmem:[%s9473_s3 + $0x230] sm:$0xff]  ;;  %v2831_v6 = vld [vmem:[%s9473_s3 + $0x98] sm:$0xff]  ;;  %v3136_v25 = vld [vmem:[%s9473_s3 + $0xa20] sm:$0xff] }
 0x2ac   :  { %3264 = vmatmul.f32.vlgmr.msra.gmra.mxu2 %v8480_v26  ;;  %3317 = vmatpush.msrb.mxu1 %v2858_v43  ;;  %v2566_v7 = vadd.f32 %v2565_v18, %v2543_v2  ;;  %v2930_v31 = vld [vmem:[%s9473_s3 + $0x3b0] sm:$0xff]  ;;  %v2879_v24 = vld [vmem:[%s9473_s3 + $0x218] sm:$0xff]  ;;  %v2828_v38 = vld [vmem:[%s9473_s3 + $0x80] sm:$0xff] }
 0x2ad   :  { %3340 = vmatpush.msrb.mxu2 %v2906_v54  ;;  %3363 = vmatpush.msrb.mxu3 %v2954_v57  ;;  %v2927_v42 = vld [vmem:[%s9473_s3 + $0x398] sm:$0xff]  ;;  %v3133_v51 = vld [vmem:[%s9473_s3 + $0xa08] sm:$0xff]  ;;  %v2876_v27 = vld [vmem:[%s9473_s3 + $0x200] sm:$0xff] }
 0x2ae   :  { %3318 = vmatpush.msrb.mxu1 %v2855_v56  ;;  %3287 = vmatmul.f32.vlgmr.msra.gmra.mxu3 %v8488_v0  ;;  %v8540_v9 = vmax.f32 %v2566_v7, 0.0  ;;  %v2924_v44 = vld [vmem:[%s9473_s3 + $0x380] sm:$0xff]  ;;  %v2825_v36 = vld [vmem:[%s9473_s3 + $0x68] sm:$0xff]  ;;  %v3130_v43 = vld [vmem:[%s9473_s3 + $0x9f0] sm:$0xff] }
 0x2af   :  { %3341 = vmatpush.msrb.mxu2 %v2903_v13  ;;  %3364 = vmatpush.msrb.mxu3 %v2951_v29  ;;  %v2873_v30 = vld [vmem:[%s9473_s3 + $0x1e8] sm:$0xff]  ;;  %v2822_v33 = vld [vmem:[%s9473_s3 + $0x50] sm:$0xff]  ;;  %v3127_v15 = vld [vmem:[%s9473_s3 + $0x9d8] sm:$0xff] }
 0x2b0   :  { %3319 = vmatpush.msrb.mxu1 %v2852_v12  ;;  %3294 = vmatpush.msrb.mxu0 %v3145_v48  ;;  %v2921_v47 = vld [vmem:[%s9473_s3 + $0x368] sm:$0xff]  ;;  %v2870_v54 = vld [vmem:[%s9473_s3 + $0x1d0] sm:$0xff]  ;;  %v2819_v34 = vld [vmem:[%s9473_s3 + $0x38] sm:$0xff] }
 0x2b1   :  { %3342 = vmatpush.msrb.mxu2 %v2900_v45  ;;  %3365 = vmatpush.msrb.mxu3 %v2948_v11  ;;  %v2918_v57 = vld [vmem:[%s9473_s3 + $0x350] sm:$0xff]  ;;  %v3124_v56 = vld [vmem:[%s9473_s3 + $0x9c0] sm:$0xff]  ;;  %v2867_v2 = vld [vmem:[%s9473_s3 + $0x1b8] sm:$0xff] }
 0x2b2   :  { %3320 = vmatpush.msrb.mxu1 %v2849_v58  ;;  %3295 = vmatpush.msrb.mxu0 %v3142_v50  ;;  %v2915_v13 = vld [vmem:[%s9473_s3 + $0x338] sm:$0xff]  ;;  %v2816_v29 = vld [vmem:[%s9473_s3 + $0x20] sm:$0xff]  ;;  %v3121_v18 = vld [vmem:[%s9473_s3 + $0x9a8] sm:$0xff] }
 0x2b3   :  { %3343 = vmatpush.msrb.mxu2 %v2897_v14  ;;  %3366 = vmatpush.msrb.mxu3 %v2945_v19  ;;  %v2864_v12 = vld [vmem:[%s9473_s3 + $0x1a0] sm:$0xff]  ;;  %v2813_v21 = vld [vmem:[%s9473_s3 + $0x8] sm:$0xff]  ;;  %v3118_v20 = vld [vmem:[%s9473_s3 + $0x990] sm:$0xff] }
 0x2b4   :  { %3221 = vmatmul.f32.gmra.mxu0 %v8525_v16  ;;  %3244 = vmatmul.f32.gmra.mxu1 %v8527_v8  ;;  %v2912_v61 = vld [vmem:[%s9473_s3 + $0x320] sm:$0xff]  ;;  %v2861_v60 = vld [vmem:[%s9473_s3 + $0x188] sm:$0xff]  ;;  %v3050_v11 = vld [vmem:[%s9473_s3 + $0x770] sm:$0xff] }
 0x2b5   :  { %3267 = vmatmul.f32.gmra.mxu2 %v8532_v62  ;;  %3321 = vmatpush.msrb.mxu1 %v2846_v4  ;;  %v2909_v45 = vld [vmem:[%s9473_s3 + $0x308] sm:$0xff]  ;;  %v3098_v63 = vld [vmem:[%s9473_s3 + $0x8f0] sm:$0xff]  ;;  %v3047_v7 = vld [vmem:[%s9473_s3 + $0x758] sm:$0xff] }
 0x2b6   :  { %3344 = vmatpush.msrb.mxu2 %v2894_v55  ;;  %3367 = vmatpush.msrb.mxu3 %v2942_v1  ;;  %v3146_v58 = vld [vmem:[%s9473_s3 + $0xa70] sm:$0xff]  ;;  %v3115_v14 = vld [vmem:[%s9473_s3 + $0x978] sm:$0xff]  ;;  %v3044_v55 = vld [vmem:[%s9473_s3 + $0x740] sm:$0xff] }
 0x2b7   :  { %3322 = vmatpush.msrb.mxu1 %v2843_v40  ;;  %3290 = vmatmul.f32.gmra.mxu3 %v8540_v9  ;;  %v3095_v19 = vld [vmem:[%s9473_s3 + $0x8d8] sm:$0xff]  ;;  %v3112_v1 = vld [vmem:[%s9473_s3 + $0x960] sm:$0xff]  ;;  %v3089_v48 = vld [vmem:[%s9473_s3 + $0x8a8] sm:$0xff] }
 0x2b8   :  { %3345 = vmatpush.msrb.mxu2 %v2891_v37  ;;  %3368 = vmatpush.msrb.mxu3 %v2939_v23  ;;  %v3143_v4 = vld [vmem:[%s9473_s3 + $0xa58] sm:$0xff]  ;;  %v3092_v40 = vld [vmem:[%s9473_s3 + $0x8c0] sm:$0xff]  ;;  %v3041_v23 = vld [vmem:[%s9473_s3 + $0x728] sm:$0xff] }
 0x2b9   :  { %3323 = vmatpush.msrb.mxu1 %v2840_v52  ;;  %3296 = vmatpush.msrb.mxu0 %v3139_v10  ;;  %v3140_v37 = vld [vmem:[%s9473_s3 + $0xa40] sm:$0xff]  ;;  %v3109_v52 = vld [vmem:[%s9473_s3 + $0x948] sm:$0xff]  ;;  %v3106_v50 = vld [vmem:[%s9473_s3 + $0x930] sm:$0xff] }
 0x2ba   :  { %3346 = vmatpush.msrb.mxu2 %v2888_v41  ;;  %3369 = vmatpush.msrb.mxu3 %v2936_v59  ;;  %v3038_v41 = vld [vmem:[%s9473_s3 + $0x710] sm:$0xff]  ;;  %v3103_v10 = vld [vmem:[%s9473_s3 + $0x918] sm:$0xff] }
 0x2bb   :  { %3324 = vmatpush.msrb.mxu1 %v2837_v28  ;;  %3297 = vmatpush.msrb.mxu0 %v3136_v25  ;;  %v3086_v59 = vld [vmem:[%s9473_s3 + $0x890] sm:$0xff]  ;;  %v3137_v28 = vld [vmem:[%s9473_s3 + $0xa28] sm:$0xff]  ;;  %v3100_v25 = vld [vmem:[%s9473_s3 + $0x900] sm:$0xff] }
 0x2bc   :  { %3347 = vmatpush.msrb.mxu2 %v2885_v3  ;;  %3370 = vmatpush.msrb.mxu3 %v2933_v53  ;;  %v3035_v3 = vld [vmem:[%s9473_s3 + $0x6f8] sm:$0xff] }
 0x2bd   :  { %3325 = vmatpush.msrb.mxu1 %v2834_v39  ;;  %3298 = vmatpush.msrb.mxu0 %v3133_v51  ;;  %v3083_v53 = vld [vmem:[%s9473_s3 + $0x878] sm:$0xff]  ;;  %v3134_v39 = vld [vmem:[%s9473_s3 + $0xa10] sm:$0xff] }
 0x2be   :  { %3348 = vmatpush.msrb.mxu2 %v2882_v17  ;;  %3371 = vmatpush.msrb.mxu3 %v2930_v31  ;;  %v3032_v17 = vld [vmem:[%s9473_s3 + $0x6e0] sm:$0xff]  ;;  %v3002_v51 = vld [vmem:[%s9473_s3 + $0x5f0] sm:$0xff] }
 0x2bf   :  { %3326 = vmatpush.msrb.mxu1 %v2831_v6  ;;  %3299 = vmatpush.msrb.mxu0 %v3130_v43  ;;  %v3080_v31 = vld [vmem:[%s9473_s3 + $0x860] sm:$0xff]  ;;  %v3131_v6 = vld [vmem:[%s9473_s3 + $0x9f8] sm:$0xff] }
 0x2c0   :  { %3349 = vmatpush.msrb.mxu2 %v2879_v24  ;;  %3372 = vmatpush.msrb.mxu3 %v2927_v42  ;;  %v3029_v24 = vld [vmem:[%s9473_s3 + $0x6c8] sm:$0xff]  ;;  %v2999_v43 = vld [vmem:[%s9473_s3 + $0x5d8] sm:$0xff] }
 0x2c1   :  { %3327 = vmatpush.msrb.mxu1 %v2828_v38  ;;  %3300 = vmatpush.msrb.mxu0 %v3127_v15  ;;  %v3077_v42 = vld [vmem:[%s9473_s3 + $0x848] sm:$0xff]  ;;  %v3128_v38 = vld [vmem:[%s9473_s3 + $0x9e0] sm:$0xff]  ;;  %v3122_v15 = vld [vmem:[%s9473_s3 + $0x9b0] sm:$0xff] }
 0x2c2   :  { %3350 = vmatpush.msrb.mxu2 %v2876_v27  ;;  %3373 = vmatpush.msrb.mxu3 %v2924_v44  ;;  %v3026_v27 = vld [vmem:[%s9473_s3 + $0x6b0] sm:$0xff] }
 0x2c3   :  { %3328 = vmatpush.msrb.mxu1 %v2825_v36  ;;  %3301 = vmatpush.msrb.mxu0 %v3124_v56  ;;  %v3074_v44 = vld [vmem:[%s9473_s3 + $0x830] sm:$0xff]  ;;  %v3125_v36 = vld [vmem:[%s9473_s3 + $0x9c8] sm:$0xff] }
 0x2c4   :  { %3351 = vmatpush.msrb.mxu2 %v2873_v30  ;;  %3374 = vmatpush.msrb.mxu3 %v2921_v47  ;;  %v3023_v30 = vld [vmem:[%s9473_s3 + $0x698] sm:$0xff] }
 0x2c5   :  { %3329 = vmatpush.msrb.mxu1 %v2822_v33  ;;  %3302 = vmatpush.msrb.mxu0 %v3121_v18  ;;  %v3071_v47 = vld [vmem:[%s9473_s3 + $0x818] sm:$0xff]  ;;  %v3065_v18 = vld [vmem:[%s9473_s3 + $0x7e8] sm:$0xff] }
 0x2c6   :  { %3352 = vmatpush.msrb.mxu2 %v2870_v54  ;;  %3375 = vmatpush.msrb.mxu3 %v2918_v57  ;;  %v2996_v54 = vld [vmem:[%s9473_s3 + $0x5c0] sm:$0xff] }
 0x2c7   :  { %3330 = vmatpush.msrb.mxu1 %v2819_v34  ;;  %3303 = vmatpush.msrb.mxu0 %v3118_v20  ;;  %v3020_v57 = vld [vmem:[%s9473_s3 + $0x680] sm:$0xff]  ;;  %v2990_v20 = vld [vmem:[%s9473_s3 + $0x590] sm:$0xff] }
 0x2c8   :  { %3353 = vmatpush.msrb.mxu2 %v2867_v2  ;;  %3376 = vmatpush.msrb.mxu3 %v2915_v13  ;;  %v3068_v34 = vld [vmem:[%s9473_s3 + $0x800] sm:$0xff]  ;;  %v3119_v2 = vld [vmem:[%s9473_s3 + $0x998] sm:$0xff]  ;;  %v2993_v13 = vld [vmem:[%s9473_s3 + $0x5a8] sm:$0xff] }
 0x2c9   :  { %3331 = vmatpush.msrb.mxu1 %v2816_v29  ;;  %3304 = vmatpush.msrb.mxu0 %v3115_v14  ;;  %v3017_v29 = vld [vmem:[%s9473_s3 + $0x668] sm:$0xff] }
 0x2ca   :  { %3354 = vmatpush.msrb.mxu2 %v2864_v12  ;;  %3377 = vmatpush.msrb.mxu3 %v2912_v61  ;;  %v3943_v12 = vld [vmem:[%s9472_s2] sm:$0xff] }
 0x2cb   :  { %3332 = vmatpush.msrb.mxu1 %v2813_v21  ;;  %3305 = vmatpush.msrb.mxu0 %v3112_v1  ;;  %v1180_v61 = vperm.slane %v3943_v12, 6  ;;  %v3116_v21 = vld [vmem:[%s9473_s3 + $0x980] sm:$0xff] }
 0x2cc   :  { %3355 = vmatpush.msrb.mxu2 %v2861_v60  ;;  %3378 = vmatpush.msrb.mxu3 %v2909_v45  ;;  %v3014_v60 = vld [vmem:[%s9473_s3 + $0x650] sm:$0xff]  ;;  %v3008_v1 = vld [vmem:[%s9473_s3 + $0x620] sm:$0xff] }
 0x2cd   :  { %3333 = vmatmul.f32.vlgmr.msrb.gmra.mxu1 %v8189_v35  ;;  %3356 = vmatmul.f32.vlgmr.msrb.gmra.mxu2 %v8195_v46  ;;  %v3062_v45 = vld [vmem:[%s9473_s3 + $0x7d0] sm:$0xff] }
 0x2ce   :  { %3379 = vmatmul.f32.vlgmr.msrb.gmra.mxu3 %v8471_v32  ;;  %3409 = vmatpush.msra.mxu1 %v3050_v11  ;;  %v3113_v11 = vld [vmem:[%s9473_s3 + $0x968] sm:$0xff] }
 0x2cf   :  { %3432 = vmatpush.msra.mxu2 %v3098_v63  ;;  %3455 = vmatpush.msra.mxu3 %v3146_v58  ;;  %v2987_v63 = vld [vmem:[%s9473_s3 + $0x578] sm:$0xff] }
 0x2d0   :  { %3410 = vmatpush.msra.mxu1 %v3047_v7  ;;  %3306 = vmatpush.msrb.mxu0 %v3109_v52  ;;  %v3011_v58 = vld [vmem:[%s9473_s3 + $0x638] sm:$0xff]  ;;  %v2981_v52 = vld [vmem:[%s9473_s3 + $0x548] sm:$0xff] }
 0x2d1   :  { %3433 = vmatpush.msra.mxu2 %v3095_v19  ;;  %3456 = vmatpush.msra.mxu3 %v3143_v4  ;;  %v3059_v7 = vld [vmem:[%s9473_s3 + $0x7b8] sm:$0xff]  ;;  %v3110_v19 = vld [vmem:[%s9473_s3 + $0x950] sm:$0xff]  ;;  %v2984_v4 = vld [vmem:[%s9473_s3 + $0x560] sm:$0xff] }
 0x2d2   :  { %3411 = vmatpush.msra.mxu1 %v3044_v55  ;;  %3307 = vmatpush.msrb.mxu0 %v3106_v50  ;;  %v2585_v33 = vpop.f32.mrf.mxu0 }
 0x2d3   :  { %3434 = vmatpush.msra.mxu2 %v3092_v40  ;;  %3457 = vmatpush.msra.mxu3 %v3140_v37  ;;  %v2586_v14 = vadd.f32 %v2585_v33, %v1180_v61  ;;  %v3056_v40 = vld [vmem:[%s9473_s3 + $0x7a0] sm:$0xff] }
 0x2d4   :  { %3412 = vmatpush.msra.mxu1 %v3041_v23  ;;  %3308 = vmatpush.msrb.mxu0 %v3103_v10  ;;  %v3107_v23 = vld [vmem:[%s9473_s3 + $0x938] sm:$0xff]  ;;  %v2978_v10 = vld [vmem:[%s9473_s3 + $0x530] sm:$0xff] }
 0x2d5   :  { %3435 = vmatpush.msra.mxu2 %v3089_v48  ;;  %3336 = vmatmul.f32.gmra.mxu1 %v8276_v5  ;;  %v2608_v56 = vpop.f32.mrf.mxu1  ;;  %v3005_v48 = vld [vmem:[%s9473_s3 + $0x608] sm:$0xff] }
 0x2d6   :  { %3359 = vmatmul.f32.gmra.mxu2 %v8282_v49  ;;  %3382 = vmatmul.f32.gmra.mxu3 %v8525_v16  ;;  %v2631_v55 = vpop.f32.mrf.mxu2 }
 0x2d7   :  { %3413 = vmatpush.msra.mxu1 %v3038_v41  ;;  %3436 = vmatpush.msra.mxu2 %v3086_v59  ;;  %v3053_v41 = vld [vmem:[%s9473_s3 + $0x788] sm:$0xff]  ;;  %v2609_v59 = vadd.f32 %v2608_v56, %v2586_v14  ;;  %v3000_v56 = vld [vmem:[%s9473_s3 + $0x5e0] sm:$0xff] }
 0x2d8   :  { %3458 = vmatpush.msra.mxu3 %v3137_v28  ;;  %3309 = vmatpush.msrb.mxu0 %v3100_v25  ;;  %v3101_v25 = vld [vmem:[%s9473_s3 + $0x908] sm:$0xff] }
 0x2d9   :  { %3414 = vmatpush.msra.mxu1 %v3035_v3  ;;  %3437 = vmatpush.msra.mxu2 %v3083_v53  ;;  %v2654_v50 = vpop.f32.mrf.mxu3  ;;  %v2907_v3 = vld [vmem:[%s9473_s3 + $0x2f8] sm:$0xff] }
 0x2da   :  { %3459 = vmatpush.msra.mxu3 %v3134_v39  ;;  %3386 = vmatpush.msra.mxu0 %v3002_v51  ;;  %v2955_v53 = vld [vmem:[%s9473_s3 + $0x478] sm:$0xff]  ;;  %v3104_v39 = vld [vmem:[%s9473_s3 + $0x920] sm:$0xff] }
 0x2db   :  { %3415 = vmatpush.msra.mxu1 %v3032_v17  ;;  %3438 = vmatpush.msra.mxu2 %v3080_v31  ;;  %v2904_v17 = vld [vmem:[%s9473_s3 + $0x2e0] sm:$0xff] }
 0x2dc   :  { %3460 = vmatpush.msra.mxu3 %v3131_v6  ;;  %3387 = vmatpush.msra.mxu0 %v2999_v43  ;;  %v2588_v37 = vpop.f32.mrf.mxu0  ;;  %v2952_v31 = vld [vmem:[%s9473_s3 + $0x460] sm:$0xff]  ;;  %v2632_v6 = vadd.f32 %v2631_v55, %v2609_v59  ;;  %v2898_v43 = vld [vmem:[%s9473_s3 + $0x2b0] sm:$0xff] }
 0x2dd   :  { %3416 = vmatpush.msra.mxu1 %v3029_v24  ;;  %3439 = vmatpush.msra.mxu2 %v3077_v42  ;;  %v2975_v24 = vld [vmem:[%s9473_s3 + $0x518] sm:$0xff]  ;;  %v2901_v42 = vld [vmem:[%s9473_s3 + $0x2c8] sm:$0xff]  ;;  %v2589_v51 = vadd.f32 %v2588_v37, %v1180_v61  ;;  %v2928_v59 = vld [vmem:[%s9473_s3 + $0x3a0] sm:$0xff] }
 0x2de   :  { %3461 = vmatpush.msra.mxu3 %v3128_v38  ;;  %3388 = vmatpush.msra.mxu0 %v2996_v54  ;;  %v2949_v38 = vld [vmem:[%s9473_s3 + $0x448] sm:$0xff]  ;;  %v2655_v33 = vadd.f32 %v2654_v50, %v2632_v6  ;;  %v2943_v54 = vld [vmem:[%s9473_s3 + $0x418] sm:$0xff]  ;;  %v2874_v6 = vld [vmem:[%s9473_s3 + $0x1f0] sm:$0xff] }
 0x2df   :  { %3417 = vmatpush.msra.mxu1 %v3026_v27  ;;  %3440 = vmatpush.msra.mxu2 %v3074_v44  ;;  %v3003_v27 = vld [vmem:[%s9473_s3 + $0x5f8] sm:$0xff]  ;;  %v2972_v44 = vld [vmem:[%s9473_s3 + $0x500] sm:$0xff]  ;;  %v2997_v61 = vld [vmem:[%s9473_s3 + $0x5c8] sm:$0xff] }
 0x2e0   :  { %3462 = vmatpush.msra.mxu3 %v3125_v36  ;;  %3389 = vmatpush.msra.mxu0 %v2993_v13  ;;  %v2634_v36 = vpop.f32.mrf.mxu2  ;;  %v2931_v37 = vld [vmem:[%s9473_s3 + $0x3b8] sm:$0xff] }
 0x2e1   :  { %3418 = vmatpush.msra.mxu1 %v3023_v30  ;;  %3441 = vmatpush.msra.mxu2 %v3071_v47  ;;  %v2611_v28 = vpop.f32.mrf.mxu1  ;;  %v2946_v30 = vld [vmem:[%s9473_s3 + $0x430] sm:$0xff] }
 0x2e2   :  { %3463 = vmatpush.msra.mxu3 %v3122_v15  ;;  %3390 = vmatpush.msra.mxu0 %v2990_v20  ;;  %v2895_v15 = vld [vmem:[%s9473_s3 + $0x298] sm:$0xff]  ;;  %v2889_v20 = vld [vmem:[%s9473_s3 + $0x268] sm:$0xff] }
 0x2e3   :  { %3419 = vmatpush.msra.mxu1 %v3020_v57  ;;  %3442 = vmatpush.msra.mxu2 %v3068_v34  ;;  %v2612_v57 = vadd.f32 %v2611_v28, %v2589_v51  ;;  %v2657_v13 = vpop.f32.mrf.mxu3  ;;  %v2919_v51 = vld [vmem:[%s9473_s3 + $0x358] sm:$0xff] }
 0x2e4   :  { %3464 = vmatpush.msra.mxu3 %v3119_v2  ;;  %3391 = vmatpush.msra.mxu0 %v2987_v63  ;;  %v2969_v2 = vld [vmem:[%s9473_s3 + $0x4e8] sm:$0xff]  ;;  %v2963_v63 = vld [vmem:[%s9473_s3 + $0x4b8] sm:$0xff] }
 0x2e5   :  { %3420 = vmatpush.msra.mxu1 %v3017_v29  ;;  %3443 = vmatpush.msra.mxu2 %v3065_v18  ;;  %v2892_v29 = vld [vmem:[%s9473_s3 + $0x280] sm:$0xff] }
 0x2e6   :  { %3465 = vmatpush.msra.mxu3 %v3116_v21  ;;  %3392 = vmatpush.msra.mxu0 %v2984_v4  ;;  %v2940_v18 = vld [vmem:[%s9473_s3 + $0x400] sm:$0xff]  ;;  %v2966_v21 = vld [vmem:[%s9473_s3 + $0x4d0] sm:$0xff] }
 0x2e7   :  { %3421 = vmatpush.msra.mxu1 %v3014_v60  ;;  %3444 = vmatpush.msra.mxu2 %v3062_v45  ;;  %v2937_v60 = vld [vmem:[%s9473_s3 + $0x3e8] sm:$0xff]  ;;  %v2635_v45 = vadd.f32 %v2634_v36, %v2612_v57  ;;  %v2960_v4 = vld [vmem:[%s9473_s3 + $0x4a0] sm:$0xff] }
 0x2e8   :  { %3466 = vmatpush.msra.mxu3 %v3113_v11  ;;  %3393 = vmatpush.msra.mxu0 %v2981_v52  ;;  %v2677_v47 = vpop.f32.mrf.mxu0  ;;  %v2994_v11 = vld [vmem:[%s9473_s3 + $0x5b0] sm:$0xff]  ;;  %v2988_v52 = vld [vmem:[%s9473_s3 + $0x580] sm:$0xff]  ;;  %v2865_v57 = vld [vmem:[%s9473_s3 + $0x1a8] sm:$0xff] }
 0x2e9   :  { %3422 = vmatpush.msra.mxu1 %v3011_v58  ;;  %3445 = vmatpush.msra.mxu2 %v3059_v7  ;;  %v2678_v12 = vadd.f32 %v2677_v47, %v2655_v33  ;;  %v2886_v58 = vld [vmem:[%s9473_s3 + $0x250] sm:$0xff]  ;;  %v2868_v47 = vld [vmem:[%s9473_s3 + $0x1c0] sm:$0xff] }
 0x2ea   :  { %3467 = vmatpush.msra.mxu3 %v3110_v19  ;;  %3394 = vmatpush.msra.mxu0 %v2978_v10  ;;  %v2934_v7 = vld [vmem:[%s9473_s3 + $0x3d0] sm:$0xff]  ;;  %v2991_v19 = vld [vmem:[%s9473_s3 + $0x598] sm:$0xff]  ;;  %v2925_v10 = vld [vmem:[%s9473_s3 + $0x388] sm:$0xff] }
 0x2eb   :  { %3423 = vmatpush.msra.mxu1 %v3008_v1  ;;  %3446 = vmatpush.msra.mxu2 %v3056_v40  ;;  %v2700_v34 = vpop.f32.mrf.mxu1  ;;  %v2883_v40 = vld [vmem:[%s9473_s3 + $0x238] sm:$0xff]  ;;  %v2916_v33 = vld [vmem:[%s9473_s3 + $0x340] sm:$0xff] }
 0x2ec   :  { %3468 = vmatpush.msra.mxu3 %v3107_v23  ;;  %3395 = vmatpush.msra.mxu0 %v2975_v24  ;;  %v2701_v14 = vadd.f32 %v2700_v34, %v2678_v12  ;;  %v2723_v55 = vpop.f32.mrf.mxu2  ;;  %v2658_v23 = vadd.f32 %v2657_v13, %v2635_v45  ;;  %v2913_v34 = vld [vmem:[%s9473_s3 + $0x328] sm:$0xff]  ;;  %v2970_v45 = vld [vmem:[%s9473_s3 + $0x4f0] sm:$0xff] }
 0x2ed   :  { %3424 = vmatpush.msra.mxu1 %v3005_v48  ;;  %3447 = vmatpush.msra.mxu2 %v3053_v41  ;;  %v2957_v48 = vld [vmem:[%s9473_s3 + $0x488] sm:$0xff]  ;;  %v2880_v41 = vld [vmem:[%s9473_s3 + $0x220] sm:$0xff] }
 0x2ee   :  { %3425 = vmatmul.f32.vlgmr.msra.gmra.mxu1 %v8480_v26  ;;  %3448 = vmatmul.f32.vlgmr.msra.gmra.mxu2 %v8488_v0  ;;  %v2724_v28 = vadd.f32 %v2723_v55, %v2701_v14  ;;  %v2856_v14 = vld [vmem:[%s9473_s3 + $0x160] sm:$0xff]  ;;  %v2853_v55 = vld [vmem:[%s9473_s3 + $0x148] sm:$0xff] }
 0x2ef   :  { %3501 = vmatpush.msrb.mxu1 %v2907_v3  ;;  %3524 = vmatpush.msrb.mxu2 %v2955_v53  ;;  %v2985_v3 = vld [vmem:[%s9473_s3 + $0x568] sm:$0xff]  ;;  %v2746_v53 = vpop.f32.mrf.mxu3 }
 0x2f0   :  { %3469 = vmatpush.msra.mxu3 %v3104_v39  ;;  %3396 = vmatpush.msra.mxu0 %v2972_v44  ;;  %v2877_v39 = vld [vmem:[%s9473_s3 + $0x208] sm:$0xff]  ;;  %v2747_v24 = vadd.f32 %v2746_v53, %v2724_v28  ;;  %v3084_v28 = vld [vmem:[%s9473_s3 + $0x880] sm:$0xff]  ;;  %v2847_v53 = vld [vmem:[%s9473_s3 + $0x118] sm:$0xff] }
 0x2f1   :  { %3502 = vmatpush.msrb.mxu1 %v2904_v17  ;;  %3525 = vmatpush.msrb.mxu2 %v2952_v31  ;;  %v2982_v31 = vld [vmem:[%s9473_s3 + $0x550] sm:$0xff] }
 0x2f2   :  { %3470 = vmatpush.msra.mxu3 %v3101_v25  ;;  %3397 = vmatpush.msra.mxu0 %v2969_v2  ;;  %v2680_v1 = vpop.f32.mrf.mxu0  ;;  %v2922_v25 = vld [vmem:[%s9473_s3 + $0x370] sm:$0xff] }
 0x2f3   :  { %3503 = vmatpush.msrb.mxu1 %v2901_v42  ;;  %3526 = vmatpush.msrb.mxu2 %v2949_v38  ;;  %v2681_v17 = vadd.f32 %v2680_v1, %v2658_v23  ;;  %v2979_v42 = vld [vmem:[%s9473_s3 + $0x538] sm:$0xff]  ;;  %v2964_v1 = vld [vmem:[%s9473_s3 + $0x4c0] sm:$0xff] }
 0x2f4   :  { %3547 = vmatpush.msrb.mxu3 %v3003_v27  ;;  %3398 = vmatpush.msra.mxu0 %v2966_v21  ;;  %v2871_v38 = vld [vmem:[%s9473_s3 + $0x1d8] sm:$0xff] }
 0x2f5   :  { %3504 = vmatpush.msrb.mxu1 %v2898_v43  ;;  %3527 = vmatpush.msrb.mxu2 %v2946_v30  ;;  %v2703_v50 = vpop.f32.mrf.mxu1  ;;  %v2976_v43 = vld [vmem:[%s9473_s3 + $0x520] sm:$0xff]  ;;  %v3147_v21 = vld [vmem:[%s9473_s3 + $0xa78] sm:$0xff] }
 0x2f6   :  { %3428 = vmatmul.f32.gmra.mxu1 %v8532_v62  ;;  %3451 = vmatmul.f32.gmra.mxu2 %v8540_v9  ;;  %v2704_v44 = vadd.f32 %v2703_v50, %v2681_v17  ;;  %v2726_v30 = vpop.f32.mrf.mxu2  ;;  %v3132_v50 = vld [vmem:[%s9473_s3 + $0xa00] sm:$0xff]  ;;  %v3126_v17 = vld [vmem:[%s9473_s3 + $0x9d0] sm:$0xff] }
 0x2f7   :  { %3505 = vmatpush.msrb.mxu1 %v2895_v15  ;;  %3528 = vmatpush.msrb.mxu2 %v2943_v54  ;;  %v2973_v54 = vld [vmem:[%s9473_s3 + $0x508] sm:$0xff] }
 0x2f8   :  { %3548 = vmatpush.msrb.mxu3 %v3000_v56  ;;  %3399 = vmatpush.msra.mxu0 %v2963_v63  ;;  %v2727_v2 = vadd.f32 %v2726_v30, %v2704_v44  ;;  %v3144_v63 = vld [vmem:[%s9473_s3 + $0xa60] sm:$0xff]  ;;  %v3117_v44 = vld [vmem:[%s9473_s3 + $0x988] sm:$0xff]  ;;  %v2835_v30 = vld [vmem:[%s9473_s3 + $0xb8] sm:$0xff] }
 0x2f9   :  { %3506 = vmatpush.msrb.mxu1 %v2892_v29  ;;  %3529 = vmatpush.msrb.mxu2 %v2940_v18  ;;  %v2749_v13 = vpop.f32.mrf.mxu3  ;;  %v2862_v29 = vld [vmem:[%s9473_s3 + $0x190] sm:$0xff] }
 0x2fa   :  { %3549 = vmatpush.msrb.mxu3 %v2997_v61  ;;  %3400 = vmatpush.msra.mxu0 %v2960_v4  ;;  %v2910_v18 = vld [vmem:[%s9473_s3 + $0x310] sm:$0xff]  ;;  %v3099_v61 = vld [vmem:[%s9473_s3 + $0x8f8] sm:$0xff] }
 0x2fb   :  { %3507 = vmatpush.msrb.mxu1 %v2889_v20  ;;  %3530 = vmatpush.msrb.mxu2 %v2937_v60  ;;  %v2750_v20 = vadd.f32 %v2749_v13, %v2727_v2  ;;  %v2859_v60 = vld [vmem:[%s9473_s3 + $0x178] sm:$0xff]  ;;  %v2826_v2 = vld [vmem:[%s9473_s3 + $0x70] sm:$0xff] }
 0x2fc   :  { %3550 = vmatpush.msrb.mxu3 %v2994_v11  ;;  %3401 = vmatpush.msra.mxu0 %v2957_v48  ;;  %v3096_v11 = vld [vmem:[%s9473_s3 + $0x8e0] sm:$0xff]  ;;  %v3135_v48 = vld [vmem:[%s9473_s3 + $0xa18] sm:$0xff]  ;;  %v3054_v13 = vld [vmem:[%s9473_s3 + $0x790] sm:$0xff] }
 0x2fd   :  { %3508 = vmatpush.msrb.mxu1 %v2886_v58  ;;  %3531 = vmatpush.msrb.mxu2 %v2934_v7 }
 0x2fe   :  { %3551 = vmatpush.msrb.mxu3 %v2991_v19  ;;  %v3141_v19 = vld [vmem:[%s9473_s3 + $0xa48] sm:$0xff] }
 0x2ff   :  { %3509 = vmatpush.msrb.mxu1 %v2883_v40  ;;  %3532 = vmatpush.msrb.mxu2 %v2931_v37  ;;  %v3090_v40 = vld [vmem:[%s9473_s3 + $0x8b0] sm:$0xff] }
 0x300   :  { %3552 = vmatpush.msrb.mxu3 %v2988_v52  ;;  %v3138_v37 = vld [vmem:[%s9473_s3 + $0xa30] sm:$0xff]  ;;  %v3087_v52 = vld [vmem:[%s9473_s3 + $0x898] sm:$0xff] }
 0x301   :  { %3510 = vmatpush.msrb.mxu1 %v2880_v41  ;;  %3533 = vmatpush.msrb.mxu2 %v2928_v59  ;;  %v2850_v59 = vld [vmem:[%s9473_s3 + $0x130] sm:$0xff] }
 0x302   :  { %3553 = vmatpush.msrb.mxu3 %v2985_v3  ;;  %v2961_v3 = vld [vmem:[%s9473_s3 + $0x4a8] sm:$0xff] }
 0x303   :  { %3511 = vmatpush.msrb.mxu1 %v2877_v39  ;;  %3534 = vmatpush.msrb.mxu2 %v2925_v10  ;;  %v2958_v39 = vld [vmem:[%s9473_s3 + $0x490] sm:$0xff] }
 0x304   :  { %v2769_v27 = vpop.f32.mrf.mxu0  ;;  %3554 = vmatpush.msrb.mxu3 %v2982_v31  ;;  %v3078_v10 = vld [vmem:[%s9473_s3 + $0x850] sm:$0xff]  ;;  %v2844_v31 = vld [vmem:[%s9473_s3 + $0x100] sm:$0xff] }
 0x305   :  { %3512 = vmatpush.msrb.mxu1 %v2874_v6  ;;  %3535 = vmatpush.msrb.mxu2 %v2922_v25  ;;  %v2770_v36 = vadd.f32 %v2769_v27, %v2747_v24  ;;  %v3075_v6 = vld [vmem:[%s9473_s3 + $0x838] sm:$0xff]  ;;  %v2841_v24 = vld [vmem:[%s9473_s3 + $0xe8] sm:$0xff] }
 0x306   :  { %3555 = vmatpush.msrb.mxu3 %v2979_v42  ;;  %v3123_v25 = vld [vmem:[%s9473_s3 + $0x9b8] sm:$0xff]  ;;  %v3072_v42 = vld [vmem:[%s9473_s3 + $0x820] sm:$0xff]  ;;  %v3069_v27 = vld [vmem:[%s9473_s3 + $0x808] sm:$0xff] }
 0x307   :  { %3513 = vmatpush.msrb.mxu1 %v2871_v38  ;;  %3536 = vmatpush.msrb.mxu2 %v2919_v51  ;;  %v2792_v15 = vpop.f32.mrf.mxu1  ;;  %v3120_v38 = vld [vmem:[%s9473_s3 + $0x9a0] sm:$0xff]  ;;  %v2838_v51 = vld [vmem:[%s9473_s3 + $0xd0] sm:$0xff] }
 0x308   :  { %v2793_v56 = vadd.f32 %v2792_v15, %v2770_v36  ;;  %3556 = vmatpush.msrb.mxu3 %v2976_v43  ;;  %v3066_v36 = vld [vmem:[%s9473_s3 + $0x7f0] sm:$0xff]  ;;  %v2832_v15 = vld [vmem:[%s9473_s3 + $0xa0] sm:$0xff] }
 0x309   :  { %3514 = vmatpush.msrb.mxu1 %v2868_v47  ;;  %3537 = vmatpush.msrb.mxu2 %v2916_v33  ;;  %v3114_v43 = vld [vmem:[%s9473_s3 + $0x970] sm:$0xff]  ;;  %v3063_v47 = vld [vmem:[%s9473_s3 + $0x7d8] sm:$0xff] }
 0x30a   :  { %v9027_v12 = vmax.f32 %v2793_v56, 0.0  ;;  %3557 = vmatpush.msrb.mxu3 %v2973_v54  ;;  %v3111_v33 = vld [vmem:[%s9473_s3 + $0x958] sm:$0xff]  ;;  %v3060_v54 = vld [vmem:[%s9473_s3 + $0x7c0] sm:$0xff]  ;;  %v3105_v56 = vld [vmem:[%s9473_s3 + $0x928] sm:$0xff] }
 0x30b   :  { %3515 = vmatpush.msrb.mxu1 %v2865_v57  ;;  %3538 = vmatpush.msrb.mxu2 %v2913_v34  ;;  %v2829_v57 = vld [vmem:[%s9473_s3 + $0x88] sm:$0xff] }
 0x30c   :  { %3310 = vmatmul.f32.vlgmr.msrb.gmra.mxu0 %v9027_v12  ;;  %3471 = vmatmul.f32.vlgmr.msra.gmra.mxu3 %v9027_v12  ;;  %v3057_v34 = vld [vmem:[%s9473_s3 + $0x7a8] sm:$0xff] }
 0x30d   :  { %3516 = vmatpush.msrb.mxu1 %v2862_v29  ;;  %3539 = vmatpush.msrb.mxu2 %v2910_v18  ;;  %v3102_v29 = vld [vmem:[%s9473_s3 + $0x910] sm:$0xff]  ;;  %v2823_v18 = vld [vmem:[%s9473_s3 + $0x58] sm:$0xff] }
 0x30e   :  { %3517 = vmatmul.f32.vlgmr.msrb.gmra.mxu1 %v8195_v46  ;;  %3540 = vmatmul.f32.vlgmr.msrb.gmra.mxu2 %v8471_v32  ;;  %v2772_v58 = vpop.f32.mrf.mxu0  ;;  %v2967_v46 = vld [vmem:[%s9473_s3 + $0x4d8] sm:$0xff]  ;;  %v3093_v32 = vld [vmem:[%s9473_s3 + $0x8c8] sm:$0xff] }
 0x30f   :  { %3593 = vmatpush.msra.mxu1 %v3099_v61  ;;  %3616 = vmatpush.msra.mxu2 %v3147_v21  ;;  %v2773_v7 = vadd.f32 %v2772_v58, %v2750_v20  ;;  %v2820_v61 = vld [vmem:[%s9473_s3 + $0x40] sm:$0xff]  ;;  %v2817_v21 = vld [vmem:[%s9473_s3 + $0x28] sm:$0xff]  ;;  %v2814_v20 = vld [vmem:[%s9473_s3 + $0x10] sm:$0xff] }
 0x310   :  { %3478 = vmatpush.msrb.mxu0 %v2859_v60  ;;  %3558 = vmatpush.msrb.mxu3 %v2970_v45  ;;  %v3042_v60 = vld [vmem:[%s9473_s3 + $0x730] sm:$0xff]  ;;  %v3036_v45 = vld [vmem:[%s9473_s3 + $0x700] sm:$0xff] }
 0x311   :  { %3594 = vmatpush.msra.mxu1 %v3096_v11  ;;  %3617 = vmatpush.msra.mxu2 %v3144_v63  ;;  %v2795_v4 = vpop.f32.mrf.mxu1  ;;  %v3030_v11 = vld [vmem:[%s9473_s3 + $0x6d0] sm:$0xff]  ;;  %v3027_v63 = vld [vmem:[%s9473_s3 + $0x6b8] sm:$0xff]  ;;  %v3024_v58 = vld [vmem:[%s9473_s3 + $0x6a0] sm:$0xff] }
 0x312   :  { %3479 = vmatpush.msrb.mxu0 %v2856_v14  ;;  %v2796_v23 = vadd.f32 %v2795_v4, %v2773_v7  ;;  %3559 = vmatpush.msrb.mxu3 %v2967_v46  ;;  %v3018_v7 = vld [vmem:[%s9473_s3 + $0x670] sm:$0xff]  ;;  %v3015_v14 = vld [vmem:[%s9473_s3 + $0x658] sm:$0xff]  ;;  %v3012_v46 = vld [vmem:[%s9473_s3 + $0x640] sm:$0xff] }
 0x313   :  { %3595 = vmatpush.msra.mxu1 %v3093_v32  ;;  %3618 = vmatpush.msra.mxu2 %v3141_v19  ;;  %v3009_v32 = vld [vmem:[%s9473_s3 + $0x628] sm:$0xff]  ;;  %v3006_v19 = vld [vmem:[%s9473_s3 + $0x610] sm:$0xff]  ;;  %v3660_v4 = vld [vmem:[%s9474_s5 + $0x78] sm:$0xff] }
 0x314   :  { %v9081_v41 = vmax.f32 %v2796_v23, 0.0  ;;  %3480 = vmatpush.msrb.mxu0 %v2853_v55  ;;  %3560 = vmatpush.msrb.mxu3 %v2964_v1  ;;  %v3659_v55 = vld [vmem:[%s9474_s5 + $0x70] sm:$0xff]  ;;  %v3658_v1 = vld [vmem:[%s9474_s5 + $0x68] sm:$0xff] }
 0x315   :  { %3596 = vmatpush.msra.mxu1 %v3090_v40  ;;  %3619 = vmatpush.msra.mxu2 %v3138_v37  ;;  %v3657_v40 = vld [vmem:[%s9474_s5 + $0x60] sm:$0xff]  ;;  %v3656_v37 = vld [vmem:[%s9474_s5 + $0x58] sm:$0xff]  ;;  %v3654_v23 = vld [vmem:[%s9474_s5 + $0x48] sm:$0xff] }
 0x316   :  { %3520 = vmatmul.f32.gmra.mxu1 %v8282_v49  ;;  %3543 = vmatmul.f32.gmra.mxu2 %v8525_v16  ;;  %v3081_v49 = vld [vmem:[%s9473_s3 + $0x868] sm:$0xff] }
 0x317   :  { %3597 = vmatpush.msra.mxu1 %v3087_v52  ;;  %3620 = vmatpush.msra.mxu2 %v3135_v48  ;;  %v3129_v16 = vld [vmem:[%s9473_s3 + $0x9e8] sm:$0xff]  ;;  %v3653_v52 = vld [vmem:[%s9474_s5 + $0x40] sm:$0xff]  ;;  %v3651_v48 = vld [vmem:[%s9474_s5 + $0x30] sm:$0xff] }
 0x318   :  { %3481 = vmatpush.msrb.mxu0 %v2850_v59  ;;  %3474 = vmatmul.f32.gmra.mxu3 %v9081_v41  ;;  %v3649_v59 = vld [vmem:[%s9474_s5 + $0x20] sm:$0xff] }
 0x319   :  { %3598 = vmatpush.msra.mxu1 %v3084_v28  ;;  %3621 = vmatpush.msra.mxu2 %v3132_v50  ;;  %v3676_v28 = vld [vmem:[%s9474_s5 + $0xf8] sm:$0xff] }
 0x31a   :  { %3313 = vmatmul.f32.gmra.mxu0 %v9081_v41  ;;  %3561 = vmatpush.msrb.mxu3 %v2961_v3  ;;  %v3648_v50 = vld [vmem:[%s9474_s5 + $0x18] sm:$0xff]  ;;  %v3173_v3 = vpop.f32.mrf.mxu2 }
 0x31b   :  { %3599 = vmatpush.msra.mxu1 %v3081_v49  ;;  %3622 = vmatpush.msra.mxu2 %v3129_v16  ;;  %v3196_v49 = vpop.f32.mrf.mxu3  ;;  %v3675_v16 = vld [vmem:[%s9474_s5 + $0xf0] sm:$0xff] }
 0x31c   :  { %3482 = vmatpush.msrb.mxu0 %v2847_v53  ;;  %3562 = vmatpush.msrb.mxu3 %v2958_v39  ;;  %v3647_v53 = vld [vmem:[%s9474_s5 + $0x10] sm:$0xff]  ;;  %v9309_v39 = vld [vmem:[%s9476_s4] sm:$0x7] }
 0x31d   :  { %3600 = vmatpush.msra.mxu1 %v3078_v10  ;;  %3623 = vmatpush.msra.mxu2 %v3126_v17  ;;  %v3674_v10 = vld [vmem:[%s9474_s5 + $0xe8] sm:$0xff] }
 0x31e   :  { %3483 = vmatpush.msrb.mxu0 %v2844_v31  ;;  %3697 = vmatpush.msra.mxu3 %v3660_v4  ;;  %v3646_v17 = vld [vmem:[%s9474_s5 + $0x8] sm:$0xff]  ;;  %v3673_v31 = vld [vmem:[%s9474_s5 + $0xe0] sm:$0xff]  ;;  %v3151_v4 = vperm.slane %v9309_v39, 1 }
 0x31f   :  { %3601 = vmatpush.msra.mxu1 %v3075_v6  ;;  %3624 = vmatpush.msra.mxu2 %v3123_v25  ;;  %v3645_v6 = vld [vmem:[%s9474_s5] sm:$0xff]  ;;  %v3672_v25 = vld [vmem:[%s9474_s5 + $0xd8] sm:$0xff] }
 0x320   :  { %3484 = vmatpush.msrb.mxu0 %v2841_v24  ;;  %3563 = vmatmul.f32.vlgmr.msrb.gmra.mxu3 %v8473_v22  ;;  %v3150_v24 = vperm.slane %v9309_v39, 0 }
 0x321   :  { %3602 = vmatpush.msra.mxu1 %v3072_v42  ;;  %3625 = vmatpush.msra.mxu2 %v3120_v38 }
 0x322   :  { %3485 = vmatpush.msrb.mxu0 %v2838_v51  ;;  %3698 = vmatpush.msra.mxu3 %v3659_v55  ;;  %v3176_v38 = vpop.f32.mrf.mxu2 }
 0x323   :  { %3603 = vmatpush.msra.mxu1 %v3069_v27  ;;  %3626 = vmatpush.msra.mxu2 %v3117_v44  ;;  %v3199_v51 = vpop.f32.mrf.mxu3  ;;  %v3671_v27 = vld [vmem:[%s9474_s5 + $0xd0] sm:$0xff]  ;;  %v3174_v44 = vadd.f32 %v3173_v3, %v3150_v24 }
 0x324   :  { %3402 = vmatmul.f32.vlgmr.msra.gmra.mxu0 %v8473_v22  ;;  %v3108_v22 = vld [vmem:[%s9473_s3 + $0x940] sm:$0xff]  ;;  %3699 = vmatpush.msra.mxu3 %v3658_v1 }
 0x325   :  { %3604 = vmatpush.msra.mxu1 %v3066_v36  ;;  %3627 = vmatpush.msra.mxu2 %v3114_v43  ;;  %v3670_v36 = vld [vmem:[%s9474_s5 + $0xc8] sm:$0xff]  ;;  %v3669_v43 = vld [vmem:[%s9474_s5 + $0xc0] sm:$0xff] }
 0x326   :  { %3486 = vmatpush.msrb.mxu0 %v2835_v30  ;;  %3700 = vmatpush.msra.mxu3 %v3657_v40  ;;  %v3668_v30 = vld [vmem:[%s9474_s5 + $0xb8] sm:$0xff] }
 0x327   :  { %3605 = vmatpush.msra.mxu1 %v3063_v47  ;;  %3628 = vmatpush.msra.mxu2 %v3111_v33  ;;  %v3197_v47 = vadd.f32 %v3196_v49, %v3174_v44 }
 0x328   :  { %3487 = vmatpush.msrb.mxu0 %v2832_v15  ;;  %3566 = vmatmul.f32.gmra.mxu3 %v8527_v8  ;;  %v3219_v42 = vpop.f32.mrf.mxu0  ;;  %v3242_v33 = vpop.f32.mrf.mxu1  ;;  %v3667_v15 = vld [vmem:[%s9474_s5 + $0xb0] sm:$0xff] }
 0x329   :  { %3606 = vmatpush.msra.mxu1 %v3060_v54  ;;  %3629 = vmatpush.msra.mxu2 %v3108_v22  ;;  %v3220_v54 = vadd.f32 %v3219_v42, %v3197_v47  ;;  %v3683_v47 = vld [vmem:[%s9474_s5 + $0x130] sm:$0xff] }
 0x32a   :  { %3488 = vmatpush.msrb.mxu0 %v2829_v57  ;;  %3701 = vmatpush.msra.mxu3 %v3656_v37 }
 0x32b   :  { %3607 = vmatpush.msra.mxu1 %v3057_v34  ;;  %3630 = vmatpush.msra.mxu2 %v3105_v56  ;;  %v3243_v56 = vadd.f32 %v3242_v33, %v3220_v54  ;;  %v3682_v54 = vld [vmem:[%s9474_s5 + $0x128] sm:$0xff] }
 0x32c   :  { %3489 = vmatpush.msrb.mxu0 %v2826_v2  ;;  %v3666_v2 = vld [vmem:[%s9474_s5 + $0xa8] sm:$0xff] }
 0x32d   :  { %3608 = vmatpush.msra.mxu1 %v3054_v13  ;;  %3631 = vmatpush.msra.mxu2 %v3102_v29  ;;  %v3665_v29 = vld [vmem:[%s9474_s5 + $0xa0] sm:$0xff] }
 0x32e   :  { %3609 = vmatmul.f32.vlgmr.msra.gmra.mxu1 %v8488_v0  ;;  %3632 = vmatmul.f32.vlgmr.msra.gmra.mxu2 %v9027_v12  ;;  %v3051_v0 = vld [vmem:[%s9473_s3 + $0x778] sm:$0xff]  ;;  %v3045_v12 = vld [vmem:[%s9473_s3 + $0x748] sm:$0xff] }
 0x32f   :  { %3405 = vmatmul.f32.gmra.mxu0 %v8527_v8  ;;  %v3048_v8 = vld [vmem:[%s9473_s3 + $0x760] sm:$0xff]  ;;  %v3265_v22 = vpop.f32.mrf.mxu2 }
 0x330   :  { %3490 = vmatpush.msrb.mxu0 %v2823_v18  ;;  %v3266_v13 = vadd.f32 %v3265_v22, %v3243_v56  ;;  %v3177_v18 = vadd.f32 %v3176_v38, %v3150_v24  ;;  %v3686_v24 = vld [vmem:[%s9474_s5 + $0x148] sm:$0xff] }
 0x331   :  { %v3222_v57 = vpop.f32.mrf.mxu0  ;;  %v3288_v34 = vpop.f32.mrf.mxu3 }
 0x332   :  { %3491 = vmatpush.msrb.mxu0 %v2820_v61  ;;  %v3289_v61 = vadd.f32 %v3288_v34, %v3266_v13 }
 0x334   :  { %3492 = vmatpush.msrb.mxu0 %v2817_v21  ;;  %v3664_v21 = vld [vmem:[%s9474_s5 + $0x98] sm:$0xff] }
 0x336   :  { %3493 = vmatpush.msrb.mxu0 %v2814_v20  ;;  %3612 = vmatmul.f32.gmra.mxu1 %v8540_v9  ;;  %v3039_v9 = vld [vmem:[%s9473_s3 + $0x718] sm:$0xff]  ;;  %v3245_v20 = vpop.f32.mrf.mxu1 }
 0x337   :  { %3635 = vmatmul.f32.gmra.mxu2 %v9081_v41  ;;  %3494 = vmatmul.f32.vlgmr.msrb.gmra.mxu0 %v8189_v35  ;;  %v3033_v35 = vld [vmem:[%s9473_s3 + $0x6e8] sm:$0xff] }
 0x338   :  { %3570 = vmatpush.msra.mxu0 %v3051_v0  ;;  %v3650_v41 = vld [vmem:[%s9474_s5 + $0x28] sm:$0xff] }
 0x33a   :  { %3571 = vmatpush.msra.mxu0 %v3048_v8 }
 0x33c   :  { %3572 = vmatpush.msra.mxu0 %v3045_v12  ;;  %v3663_v12 = vld [vmem:[%s9474_s5 + $0x90] sm:$0xff] }
 0x33e   :  { %3573 = vmatpush.msra.mxu0 %v3042_v60  ;;  %v3268_v60 = vpop.f32.mrf.mxu2 }
 0x33f   :  { %3497 = vmatmul.f32.gmra.mxu0 %v8276_v5  ;;  %v3021_v5 = vld [vmem:[%s9473_s3 + $0x688] sm:$0xff] }
 0x340   :  { %3574 = vmatpush.msra.mxu0 %v3039_v9  ;;  %v3291_v9 = vpop.f32.mrf.mxu3 }
 0x342   :  { %3575 = vmatpush.msra.mxu0 %v3036_v45  ;;  %v3200_v45 = vadd.f32 %v3199_v51, %v3177_v18 }
 0x344   :  { %3576 = vmatpush.msra.mxu0 %v3033_v35 }
 0x346   :  { %3577 = vmatpush.msra.mxu0 %v3030_v11  ;;  %v3662_v11 = vld [vmem:[%s9474_s5 + $0x88] sm:$0xff] }
 0x348   :  { %3578 = vmatpush.msra.mxu0 %v3027_v63  ;;  %v3223_v63 = vadd.f32 %v3222_v57, %v3200_v45 }
 0x34a   :  { %3579 = vmatpush.msra.mxu0 %v3024_v58  ;;  %v3661_v58 = vld [vmem:[%s9474_s5 + $0x80] sm:$0xff] }
 0x34c   :  { %3580 = vmatpush.msra.mxu0 %v3021_v5  ;;  %v3334_v5 = vpop.f32.mrf.mxu1 }
 0x34d   :  { %v3335_v40 = vadd.f32 %v3334_v5, %v3151_v4 }
 0x34e   :  { %3581 = vmatpush.msra.mxu0 %v3018_v7  ;;  %v3246_v7 = vadd.f32 %v3245_v20, %v3223_v63  ;;  %v3677_v20 = vld [vmem:[%s9474_s5 + $0x100] sm:$0xff] }
 0x350   :  { %3582 = vmatpush.msra.mxu0 %v3015_v14  ;;  %v3357_v14 = vpop.f32.mrf.mxu2 }
 0x352   :  { %3583 = vmatpush.msra.mxu0 %v3012_v46  ;;  %v3269_v46 = vadd.f32 %v3268_v60, %v3246_v7 }
 0x354   :  { %3584 = vmatpush.msra.mxu0 %v3009_v32  ;;  %v3380_v32 = vpop.f32.mrf.mxu3 }
 0x356   :  { %3585 = vmatpush.msra.mxu0 %v3006_v19  ;;  %v3292_v19 = vadd.f32 %v3291_v9, %v3269_v46 }
 0x357   :  { %3586 = vmatmul.f32.vlgmr.msra.gmra.mxu0 %v8480_v26  ;;  %v3655_v26 = vld [vmem:[%s9474_s5 + $0x50] sm:$0xff] }
 0x358   :  { %3702 = vmatpush.msra.mxu3 %v3655_v26  ;;  %3720 = vmatpush.msrb.mxu0 %v3676_v28  ;;  %v3337_v26 = vpop.f32.mrf.mxu1 }
 0x35a   :  { %3703 = vmatpush.msra.mxu3 %v3654_v23  ;;  %3721 = vmatpush.msrb.mxu0 %v3675_v16  ;;  %v3358_v23 = vadd.f32 %v3357_v14, %v3335_v40 }
 0x35c   :  { %3704 = vmatpush.msra.mxu3 %v3653_v52  ;;  %3722 = vmatpush.msrb.mxu0 %v3674_v10  ;;  %v3692_v52 = vld [vmem:[%s9474_s5 + $0x178] sm:$0xff] }
 0x35d   :  { %3743 = vmatpush.msrb.mxu1 %v3692_v52 }
 0x35e   :  { %3723 = vmatpush.msrb.mxu0 %v3673_v31 }
 0x35f   :  { %3589 = vmatmul.f32.gmra.mxu0 %v8532_v62  ;;  %v3652_v62 = vld [vmem:[%s9474_s5 + $0x38] sm:$0xff] }
 0x360   :  { %3705 = vmatpush.msra.mxu3 %v3652_v62  ;;  %3724 = vmatpush.msrb.mxu0 %v3672_v25  ;;  %v3360_v62 = vpop.f32.mrf.mxu2 }
 0x362   :  { %3706 = vmatpush.msra.mxu3 %v3651_v48  ;;  %3725 = vmatpush.msrb.mxu0 %v3671_v27  ;;  %v3691_v48 = vld [vmem:[%s9474_s5 + $0x170] sm:$0xff] }
 0x363   :  { %3744 = vmatpush.msrb.mxu1 %v3691_v48 }
 0x364   :  { %3707 = vmatpush.msra.mxu3 %v3650_v41  ;;  %3726 = vmatpush.msrb.mxu0 %v3670_v36  ;;  %v3383_v41 = vpop.f32.mrf.mxu3 }
 0x366   :  { %3708 = vmatpush.msra.mxu3 %v3649_v59  ;;  %3727 = vmatpush.msrb.mxu0 %v3669_v43  ;;  %v3381_v59 = vadd.f32 %v3380_v32, %v3358_v23 }
 0x368   :  { %3709 = vmatpush.msra.mxu3 %v3648_v50  ;;  %3728 = vmatpush.msrb.mxu0 %v3668_v30  ;;  %v3689_v50 = vld [vmem:[%s9474_s5 + $0x160] sm:$0xff] }
 0x36a   :  { %3710 = vmatpush.msra.mxu3 %v3647_v53  ;;  %3729 = vmatpush.msrb.mxu0 %v3667_v15 }
 0x36b   :  { %v3426_v53 = vpop.f32.mrf.mxu1 }
 0x36c   :  { %3711 = vmatpush.msra.mxu3 %v3646_v17  ;;  %3730 = vmatpush.msrb.mxu0 %v3666_v2  ;;  %v3687_v17 = vld [vmem:[%s9474_s5 + $0x150] sm:$0xff] }
 0x36e   :  { %3712 = vmatpush.msra.mxu3 %v3645_v6  ;;  %3731 = vmatpush.msrb.mxu0 %v3665_v29 }
 0x370   :  { %3857 = vmatpush.msrb.mxu3 %v3676_v28  ;;  %3732 = vmatpush.msrb.mxu0 %v3664_v21  ;;  %v3690_v28 = vld [vmem:[%s9474_s5 + $0x168] sm:$0xff] }
 0x371   :  { %3745 = vmatpush.msrb.mxu1 %v3690_v28  ;;  %v3449_v6 = vpop.f32.mrf.mxu2 }
 0x372   :  { %3858 = vmatpush.msrb.mxu3 %v3675_v16  ;;  %3733 = vmatpush.msrb.mxu0 %v3663_v12  ;;  %v3688_v16 = vld [vmem:[%s9474_s5 + $0x158] sm:$0xff] }
 0x373   :  { %3746 = vmatpush.msrb.mxu1 %v3689_v50 }
 0x374   :  { %3859 = vmatpush.msrb.mxu3 %v3674_v10  ;;  %3734 = vmatpush.msrb.mxu0 %v3662_v11 }
 0x375   :  { %3747 = vmatpush.msrb.mxu1 %v3688_v16  ;;  %v3781_v16 = vld [vmem:[%s9478_s7 + $0x68] sm:$0xff] }
 0x376   :  { %3860 = vmatpush.msrb.mxu3 %v3673_v31  ;;  %3735 = vmatpush.msrb.mxu0 %v3661_v58  ;;  %v3338_v31 = vadd.f32 %v3337_v26, %v3151_v4 }
 0x377   :  { %3748 = vmatpush.msrb.mxu1 %v3687_v17  ;;  %v3778_v17 = vld [vmem:[%s9478_s7 + $0x50] sm:$0xff] }
 0x378   :  { %3861 = vmatpush.msrb.mxu3 %v3672_v25  ;;  %v3361_v42 = vadd.f32 %v3360_v62, %v3338_v31  ;;  %v3777_v31 = vld [vmem:[%s9478_s7 + $0x48] sm:$0xff] }
 0x379   :  { %3749 = vmatpush.msrb.mxu1 %v3686_v24  ;;  %v3452_v57 = vpop.f32.mrf.mxu2  ;;  %v3774_v24 = vld [vmem:[%s9478_s7 + $0x30] sm:$0xff] }
 0x37a   :  { %3862 = vmatpush.msrb.mxu3 %v3671_v27  ;;  %v3685_v27 = vld [vmem:[%s9474_s5 + $0x140] sm:$0xff] }
 0x37b   :  { %3750 = vmatpush.msrb.mxu1 %v3685_v27  ;;  %v3770_v27 = vld [vmem:[%s9478_s7 + $0x10] sm:$0xff] }
 0x37c   :  { %3863 = vmatpush.msrb.mxu3 %v3670_v36  ;;  %v3684_v36 = vld [vmem:[%s9474_s5 + $0x138] sm:$0xff] }
 0x37d   :  { %3751 = vmatpush.msrb.mxu1 %v3684_v36  ;;  %v3768_v36 = vld [vmem:[%s9478_s7] sm:$0xff] }
 0x37e   :  { %3864 = vmatpush.msrb.mxu3 %v3669_v43  ;;  %v3384_v43 = vadd.f32 %v3383_v41, %v3361_v42  ;;  %v3773_v42 = vld [vmem:[%s9478_s7 + $0x28] sm:$0xff] }
 0x37f   :  { %3752 = vmatpush.msrb.mxu1 %v3683_v47 }
 0x380   :  { %3865 = vmatpush.msrb.mxu3 %v3668_v30 }
 0x381   :  { %3753 = vmatpush.msrb.mxu1 %v3682_v54 }
 0x382   :  { %3866 = vmatpush.msrb.mxu3 %v3667_v15  ;;  %v3429_v15 = vpop.f32.mrf.mxu1 }
 0x384   :  { %3867 = vmatpush.msrb.mxu3 %v3666_v2  ;;  %v3681_v2 = vld [vmem:[%s9474_s5 + $0x120] sm:$0xff] }
 0x385   :  { %3754 = vmatpush.msrb.mxu1 %v3681_v2 }
 0x386   :  { %3868 = vmatpush.msrb.mxu3 %v3665_v29  ;;  %v3680_v29 = vld [vmem:[%s9474_s5 + $0x118] sm:$0xff] }
 0x387   :  { %3755 = vmatpush.msrb.mxu1 %v3680_v29 }
 0x388   :  { %3869 = vmatpush.msrb.mxu3 %v3664_v21  ;;  %v3678_v21 = vld [vmem:[%s9474_s5 + $0x108] sm:$0xff] }
 0x389   :  { %v3311_v0 = vpop.f32.mrf.mxu0 }
 0x38a   :  { %v3312_v8 = vadd.f32 %v3311_v0, %v3289_v61  ;;  %3870 = vmatpush.msrb.mxu3 %v3663_v12  ;;  %v3679_v61 = vld [vmem:[%s9474_s5 + $0x110] sm:$0xff]  ;;  %v3152_v12 = vperm.slane %v9309_v39, 2 }
 0x38b   :  { %3756 = vmatpush.msrb.mxu1 %v3679_v61  ;;  %v3518_v0 = vpop.f32.mrf.mxu1 }
 0x38c   :  { %v3639_v35 = vmax.f32 %v3312_v8, 0.0  ;;  %3871 = vmatpush.msrb.mxu3 %v3662_v11 }
 0x38d   :  { %3757 = vmatpush.msrb.mxu1 %v3678_v21  ;;  %v3874_v21 = vld [vmem:[%s9477_s8] ss:$0 sm:$0xff] }
 0x38e   :  { %3713 = vmatmul.f32.vlgmr.msra.gmra.mxu3 %v3639_v35 }
 0x38f   :  { %3872 = vmatpush.msrb.mxu3 %v3661_v58  ;;  %v3472_v38 = vpop.f32.mrf.mxu3  ;;  %3758 = vmatpush.msrb.mxu1 %v3677_v20 }
 0x391   :  { %v3541_v60 = vpop.f32.mrf.mxu2 }
 0x393   :  { %v3521_v35 = vpop.f32.mrf.mxu1 }
 0x397   :  { %v3314_v55 = vpop.f32.mrf.mxu0 }
 0x398   :  { %v3315_v1 = vadd.f32 %v3314_v55, %v3292_v19 }
 0x399   :  { %v3544_v63 = vpop.f32.mrf.mxu2 }
 0x39a   :  { %v3642_v37 = vmax.f32 %v3315_v1, 0.0 }
 0x39b   :  { %v3475_v56 = vpop.f32.mrf.mxu3 }
 0x39c   :  { %3716 = vmatmul.f32.gmra.mxu3 %v3642_v37 }
 0x3a1   :  { %v3403_v3 = vpop.f32.mrf.mxu0 }
 0x3a2   :  { %v3404_v49 = vadd.f32 %v3403_v3, %v3381_v59  ;;  %v3783_v3 = vld [vmem:[%s9478_s7 + $0x78] sm:$0xff] }
 0x3a3   :  { %v3564_v7 = vpop.f32.mrf.mxu3  ;;  %3788 = vmatpush.msrb.mxu2 %v3783_v3 }
 0x3a4   :  { %v3427_v10 = vadd.f32 %v3426_v53, %v3404_v49  ;;  %v3782_v49 = vld [vmem:[%s9478_s7 + $0x70] sm:$0xff]  ;;  %v3780_v53 = vld [vmem:[%s9478_s7 + $0x60] sm:$0xff] }
 0x3a5   :  { %3789 = vmatpush.msrb.mxu2 %v3782_v49 }
 0x3a6   :  { %v3450_v25 = vadd.f32 %v3449_v6, %v3427_v10  ;;  %v3779_v10 = vld [vmem:[%s9478_s7 + $0x58] sm:$0xff]  ;;  %v3776_v6 = vld [vmem:[%s9478_s7 + $0x40] sm:$0xff] }
 0x3a7   :  { %3790 = vmatpush.msrb.mxu2 %v3781_v16 }
 0x3a8   :  { %v3473_v51 = vadd.f32 %v3472_v38, %v3450_v25  ;;  %v3775_v25 = vld [vmem:[%s9478_s7 + $0x38] sm:$0xff]  ;;  %v3772_v38 = vld [vmem:[%s9478_s7 + $0x20] sm:$0xff] }
 0x3a9   :  { %3791 = vmatpush.msrb.mxu2 %v3780_v53 }
 0x3aa   :  { %v3640_v44 = vmax.f32 %v3473_v51, 0.0  ;;  %v3771_v51 = vld [vmem:[%s9478_s7 + $0x18] sm:$0xff] }
 0x3ab   :  { %v3610_v32 = vpop.f32.mrf.mxu1  ;;  %v3567_v26 = vpop.f32.mrf.mxu3  ;;  %3792 = vmatpush.msrb.mxu2 %v3779_v10 }
 0x3ac   :  { %v3406_v30 = vpop.f32.mrf.mxu0  ;;  %3736 = vmatmul.f32.vlgmr.msrb.gmra.mxu0 %v3640_v44  ;;  %v3769_v44 = vld [vmem:[%s9478_s7 + $0x8] sm:$0xff] }
 0x3ad   :  { %v3407_v33 = vadd.f32 %v3406_v30, %v3384_v43  ;;  %3793 = vmatpush.msrb.mxu2 %v3778_v17  ;;  %v3873_v30 = vld [vmem:[%s9475_s6] ss:$0 sm:$0xff] }
 0x3af   :  { %v3430_v22 = vadd.f32 %v3429_v15, %v3407_v33  ;;  %3794 = vmatpush.msrb.mxu2 %v3777_v31 }
 0x3b1   :  { %v3453_v34 = vadd.f32 %v3452_v57, %v3430_v22  ;;  %v3633_v55 = vpop.f32.mrf.mxu2  ;;  %3795 = vmatpush.msrb.mxu2 %v3776_v6 }
 0x3b3   :  { %v3476_v13 = vadd.f32 %v3475_v56, %v3453_v34  ;;  %v3613_v48 = vpop.f32.mrf.mxu1  ;;  %3796 = vmatpush.msrb.mxu2 %v3775_v25 }
 0x3b4   :  { %v3495_v8 = vpop.f32.mrf.mxu0 }
 0x3b5   :  { %v3643_v18 = vmax.f32 %v3476_v13, 0.0  ;;  %v3496_v9 = vadd.f32 %v3495_v8, %v3152_v12  ;;  %3797 = vmatpush.msrb.mxu2 %v3774_v24 }
 0x3b7   :  { %3739 = vmatmul.f32.vlgmr.msrb.gmra.mxu3 %v3643_v18  ;;  %v3519_v45 = vadd.f32 %v3518_v0, %v3496_v9  ;;  %3798 = vmatpush.msrb.mxu2 %v3773_v42 }
 0x3b9   :  { %v3542_v5 = vadd.f32 %v3541_v60, %v3519_v45  ;;  %3799 = vmatpush.msrb.mxu2 %v3772_v38 }
 0x3ba   :  { %v3636_v59 = vpop.f32.mrf.mxu2 }
 0x3bb   :  { %v3565_v46 = vadd.f32 %v3564_v7, %v3542_v5  ;;  %3800 = vmatpush.msrb.mxu2 %v3771_v51 }
 0x3bc   :  { %v3498_v11 = vpop.f32.mrf.mxu0 }
 0x3bd   :  { %v3499_v58 = vadd.f32 %v3498_v11, %v3152_v12  ;;  %3801 = vmatpush.msrb.mxu2 %v3770_v27 }
 0x3bf   :  { %v3522_v14 = vadd.f32 %v3521_v35, %v3499_v58  ;;  %3802 = vmatpush.msrb.mxu2 %v3769_v44 }
 0x3c1   :  { %v3545_v40 = vadd.f32 %v3544_v63, %v3522_v14  ;;  %3803 = vmatpush.msrb.mxu2 %v3768_v36 }
 0x3c3   :  { %v3568_v23 = vadd.f32 %v3567_v26, %v3545_v40 }
 0x3d4   :  { %v3587_v19 = vpop.f32.mrf.mxu0 }
 0x3d5   :  { %v3588_v4 = vadd.f32 %v3587_v19, %v3565_v46 }
 0x3d7   :  { %v3611_v1 = vadd.f32 %v3610_v32, %v3588_v4 }
 0x3d9   :  { %v3634_v37 = vadd.f32 %v3633_v55, %v3611_v1 }
 0x3db   :  { %v3641_v39 = vmax.f32 %v3634_v37, 0.0 }
 0x3dc   :  { %v3590_v52 = vpop.f32.mrf.mxu0 }
 0x3dd   :  { %v3591_v62 = vadd.f32 %v3590_v52, %v3568_v23  ;;  %3759 = vmatmul.f32.vlgmr.msrb.gmra.mxu1 %v3641_v39 }
 0x3df   :  { %v3614_v41 = vadd.f32 %v3613_v48, %v3591_v62 }
 0x3e1   :  { %v3637_v28 = vadd.f32 %v3636_v59, %v3614_v41 }
 0x3e3   :  { %v3644_v50 = vmax.f32 %v3637_v28, 0.0 }
 0x3e5   :  { %3762 = vmatmul.f32.gmra.mxu1 %v3644_v50 }
 0x411   :  { %v3714_v43 = vpop.f32.mrf.mxu3 }
 0x412   :  { %v3715_v15 = vadd.f32 %v3873_v30, %v3714_v43 }
 0x41f   :  { %v3717_v47 = vpop.f32.mrf.mxu3 }
 0x420   :  { %v3718_v2 = vadd.f32 %v3873_v30, %v3717_v47 }
 0x429   :  { %v3737_v33 = vpop.f32.mrf.mxu0 }
 0x42a   :  { %v3738_v54 = vadd.f32 %v3737_v33, %v3715_v15 }
 0x43a   :  { %v3740_v56 = vpop.f32.mrf.mxu3 }
 0x43b   :  { %v3741_v13 = vadd.f32 %v3740_v56, %v3718_v2 }
 0x45a   :  { %v3760_v22 = vpop.f32.mrf.mxu1 }
 0x45b   :  { %v3761_v57 = vadd.f32 %v3760_v22, %v3738_v54 }
 0x45d   :  { %v3766_v34 = vmax.f32 %v3761_v57, 0.0 }
 0x45f   :  { %3804 = vmatmul.f32.vlgmr.msrb.gmra.mxu2 %v3766_v34 }
 0x462   :  { %v3763_v29 = vpop.f32.mrf.mxu1 }
 0x463   :  { %v3764_v18 = vadd.f32 %v3763_v29, %v3741_v13 }
 0x465   :  { %v3767_v61 = vmax.f32 %v3764_v18, 0.0 }
 0x467   :  { %3807 = vmatmul.f32.gmra.mxu2 %v3767_v61 }
 0x4e2   :  { %v3805_v20 = vpop.f32.mrf.mxu2 }
 0x4e3   :  { %v3806_v0 = vadd.f32 %v3874_v21, %v3805_v20 }
 0x4e5   :  { %v3855_v8 = vmul.f32 -1.442695, %v3806_v0 }
 0x4e7   :  { %3875 = vpow2.f32 %v3855_v8 }
 0x4ea   :  { %v3808_v12 = vpop.f32.mrf.mxu2 }
 0x4eb   :  { %v3809_v60 = vadd.f32 %v3874_v21, %v3808_v12 }
 0x4ed   :  { %v3876_v9 = vpop.eup %3875  ;;  %v3856_v45 = vmul.f32 -1.442695, %v3809_v60 }
 0x4ee   :  { %v3817_v35 = vadd.f32 1.0, %v3876_v9 }
 0x4ef   :  { %3877 = vpow2.f32 %v3856_v45 }
 0x4f0   :  { %3879 = vrcp.f32 %v3817_v35  ;;  %v3830_v14 = vand.u32 2147483648, %v3817_v35  ;;  %v3828_v32 = vand.u32 2147483647, %v3817_v35  ;;  %vm3824_vm1 = vweird.f32 %v3817_v35 }
 0x4f2   :  { %v3831_v55 = vor.u32 1.1754944e-38, %v3830_v14  ;;  %vm3829_vm3 = vcmp.eq.f32.partialorder %v3828_v32, 8.507059e+37 }
 0x4f5   :  { %v3878_v11 = vpop.eup %3877 }
 0x4f6   :  { %v3880_v63 = vpop.eup %3879  ;;  %v3818_v58 = vadd.f32 1.0, %v3878_v11 }
 0x4f7   :  { %v3820_v5 = vmul.f32 %v3880_v63, %v3817_v35  ;;  %vm3825_vm0 = vweird.f32 %v3880_v63 }
 0x4f8   :  { %3881 = vrcp.f32 %v3818_v58  ;;  %vm3826_vm2 = vmor %vm3824_vm1, %vm3825_vm0  ;;  %v3845_v39 = vand.u32 2147483648, %v3818_v58  ;;  %v3843_v52 = vand.u32 2147483647, %v3818_v58  ;;  %vm3839_vm5 = vweird.f32 %v3818_v58 }
 0x4f9   :  { %v3821_v7 = vsub.f32 1.0, %v3820_v5 }
 0x4fa   :  { %v3846_v48 = vor.u32 1.1754944e-38, %v3845_v39  ;;  %vm3844_vm7 = vcmp.eq.f32.partialorder %v3843_v52, 8.507059e+37 }
 0x4fb   :  { %v3822_v46 = vmul.f32 %v3880_v63, %v3821_v7 }
 0x4fd   :  { %v3823_v19 = vadd.f32 %v3880_v63, %v3822_v46 }
 0x4fe   :  { %v3882_v4 = vpop.eup %3881 }
 0x4ff   :  { %v3827_v1 = vsel %vm3826_vm2, %v3880_v63, %v3823_v19  ;;  %v3835_v40 = vmul.f32 %v3882_v4, %v3818_v58  ;;  %vm3840_vm4 = vweird.f32 %v3882_v4 }
 0x500   :  { %v3832_v37 = vsel %vm3829_vm3, %v3831_v55, %v3827_v1  ;;  %vm3841_vm6 = vmor %vm3839_vm5, %vm3840_vm4 }
 0x501   :  { %3849 = vst [vmem:[%s9479_s9] sm:$0xff] %v3832_v37  ;;  %v3836_v26 = vsub.f32 1.0, %v3835_v40 }
 0x503   :  { %v3837_v23 = vmul.f32 %v3882_v4, %v3836_v26 }
 0x505   :  { %v3838_v62 = vadd.f32 %v3882_v4, %v3837_v23 }
 0x507   :  { %v3842_v41 = vsel %vm3841_vm6, %v3882_v4, %v3838_v62 }
 0x508   :  { %v3847_v59 = vsel %vm3844_vm7, %v3846_v48, %v3842_v41 }
 0x509   :  { %3850 = vst [vmem:[%s9479_s9 + $0x8] sm:$0xff] %v3847_v59 }

</bundles_post_ra>
